<compile_context>
chip_gen: v7x
topology: tpu7x:2x2x1
jax: 0.10.0
libtpu: 0.0.40
codegen_flags: <defaults>
</compile_context>

<pallas_src>
import jax
import jax.numpy as jnp
from jax.experimental import pallas as pl
from jax.experimental.pallas import tpu as pltpu


def _basic_block_kernel(x_ref, w1_ref, b1_ref, w2_ref, b2_ref, o_ref,
                        x_pad_scr, h1_pad_scr):
    # x_ref:      (Bt, H, W, C)      unpadded input block (f32)
    # w*_ref:     (9, C, C)          bf16 conv weights, tap-major (ky*3+kx), BN folded
    # b*_ref:     (1, C)             f32 folded BN bias
    # o_ref:      (Bt, H, W, C)      output block
    # *_pad_scr:  (Bt, H+2, W+2, C)  bf16 VMEM scratch: zero halo + activation interior
    Bt, H, W, C = x_ref.shape

    def store_padded(pad_ref, val_f32):
        # Build the W-halo in registers (single sublane concat), store interior
        # rows [1:H+1] with one aligned store, and zero rows 0 / H+1 (aligned,
        # tiny).  Done every step -> correct under megacore grid splitting.
        v = val_f32.astype(pad_ref.dtype)
        zcol = jnp.zeros((Bt, H, 1, C), pad_ref.dtype)
        zrow = jnp.zeros((Bt, 1, W + 2, C), pad_ref.dtype)
        v = jnp.concatenate([zcol, v, zcol], axis=2)          # (Bt, H, W+2, C)
        pad_ref[:, 0:1, :, :] = zrow
        pad_ref[:, H + 1:H + 2, :, :] = zrow
        pad_ref[:, 1:H + 1, :, :] = v

    def conv3x3(pad_scr, w_ref):
        # 3x3 conv = 9 shifted-window bf16 matmuls accumulated in f32 on the MXU.
        # The kx (sublane-axis) shift is hoisted: 3 shifted bands per conv
        # instead of 9 misaligned window reads.
        acc = jnp.zeros((Bt * H * W, C), jnp.float32)
        for kx in range(3):
            band = pad_scr[:, :, kx:kx + W, :]                # (Bt, H+2, W, C) bf16
            for ky in range(3):
                tap = band[:, ky:ky + H, :, :].reshape(Bt * H * W, C)
                acc = acc + jnp.dot(tap, w_ref[ky * 3 + kx],
                                    preferred_element_type=jnp.float32)
        return acc

    # Park the input block in the padded bf16 scratch.
    store_padded(x_pad_scr, x_ref[...])

    # conv1 -> folded BN1 -> ReLU (f32 elementwise), park in padded scratch.
    h1 = jnp.maximum(conv3x3(x_pad_scr, w1_ref) + b1_ref[...], 0.0)
    store_padded(h1_pad_scr, h1.reshape(Bt, H, W, C))

    # conv2 -> folded BN2 -> residual add (identity straight from the unpadded
    # input block, full precision) -> ReLU.
    out = conv3x3(h1_pad_scr, w2_ref) + b2_ref[...]
    identity = x_ref[...].astype(jnp.float32).reshape(Bt * H * W, C)
    out = jnp.maximum(out + identity, 0.0)
    o_ref[...] = out.reshape(Bt, H, W, C).astype(o_ref.dtype)


def _fold_conv_bn(conv_w, bn_params, eps):
    """Fold inference BN into the conv. Returns (9, C_in, C_out) bf16 weights
    (tap-major ky*3+kx) and a (1, C_out) f32 bias."""
    gamma, beta, mean, var = bn_params
    scale = (gamma / jnp.sqrt(var + eps)).astype(jnp.float32)           # (C_out,)
    c_out, c_in = conv_w.shape[0], conv_w.shape[1]
    w = jnp.transpose(conv_w.astype(jnp.float32), (2, 3, 1, 0))         # (3,3,I,O)
    w = w.reshape(9, c_in, c_out) * scale[None, None, :]
    b = (beta.astype(jnp.float32) - mean.astype(jnp.float32) * scale).reshape(1, c_out)
    return w.astype(jnp.bfloat16), b


def _pick_block_batch(B, H, W, max_rows=256, min_steps=8):
    """Largest batch tile Bt dividing B with Bt*H*W <= max_rows (vreg-friendly
    accumulator) while keeping at least min(B, min_steps) grid steps (even step
    counts keep v7x's two TensorCores balanced)."""
    best = 1
    for bt in range(1, B + 1):
        if B % bt:
            continue
        if bt * H * W <= max_rows and (B // bt) >= min(B, min_steps):
            best = bt
    return best


def basic_block_forward_nhwc(x_nhwc, conv1_w, bn1, conv2_w, bn2, *,
                             eps=1e-5, block_batch=None):
    """BasicBlock forward on NHWC input (preferred TPU layout). NHWC in / NHWC out.

    conv*_w: (C_out, C_in, 3, 3) torch layout; bn* = (gamma, beta, mean, var).
    Only stride=1 / downsample=None (the module defaults) are implemented.
    """
    B, H, W, C = x_nhwc.shape
    w1, b1 = _fold_conv_bn(conv1_w, bn1, eps)
    w2, b2 = _fold_conv_bn(conv2_w, bn2, eps)

    Bt = block_batch if block_batch is not None else _pick_block_batch(B, H, W)
    assert B % Bt == 0, (B, Bt)

    return pl.pallas_call(
        _basic_block_kernel,
        out_shape=jax.ShapeDtypeStruct((B, H, W, C), x_nhwc.dtype),
        grid=(B // Bt,),
        in_specs=[
            pl.BlockSpec((Bt, H, W, C), lambda b: (b, 0, 0, 0)),
            # Constant index maps: weights/biases are DMA'd once and stay
            # resident in VMEM (weight-stationary across the batch grid).
            pl.BlockSpec((9, C, C), lambda b: (0, 0, 0)),
            pl.BlockSpec((1, C), lambda b: (0, 0)),
            pl.BlockSpec((9, C, C), lambda b: (0, 0, 0)),
            pl.BlockSpec((1, C), lambda b: (0, 0)),
        ],
        out_specs=pl.BlockSpec((Bt, H, W, C), lambda b: (b, 0, 0, 0)),
        scratch_shapes=[
            pltpu.VMEM((Bt, H + 2, W + 2, C), jnp.bfloat16),   # padded input
            pltpu.VMEM((Bt, H + 2, W + 2, C), jnp.bfloat16),   # padded mid activation
        ],
        compiler_params=pltpu.CompilerParams(
            dimension_semantics=("parallel",),     # batch tiles shard across TCs
            vmem_limit_bytes=32 * 1024 * 1024),
    )(x_nhwc, w1, b1, w2, b2)


def basic_block_forward(x_nchw, conv1_w, bn1, conv2_w, bn2, *, eps=1e-5,
                        block_batch=None):
    """PyTorch-parity entry point: NCHW in / NCHW out.

    If the surrounding model can run NHWC (standard for TPU ResNets), call
    `basic_block_forward_nhwc` directly and skip these two full-tensor transposes.
    """
    x_nhwc = jnp.transpose(x_nchw, (0, 2, 3, 1))
    out_nhwc = basic_block_forward_nhwc(x_nhwc, conv1_w, bn1, conv2_w, bn2,
                                        eps=eps, block_batch=block_batch)
    return jnp.transpose(out_nhwc, (0, 3, 1, 2)).astype(x_nchw.dtype)


def _reference_basic_block(x, conv1_w, bn1, conv2_w, bn2, eps=1e-5):
    """Pure-JAX reference matching the PyTorch forward (inference-mode BN)."""
    def bn(y, params):
        g, b, m, v = (t.reshape(1, -1, 1, 1) for t in params)
        return (y - m) * (g / jnp.sqrt(v + eps)) + b

    def conv(y, w):
        return jax.lax.conv_general_dilated(
            y, w, window_strides=(1, 1), padding=((1, 1), (1, 1)),
            dimension_numbers=("NCHW", "OIHW", "NCHW"),
            precision=jax.lax.Precision.HIGHEST)

    h = jax.nn.relu(bn(conv(x, conv1_w), bn1))
    h = bn(conv(h, conv2_w), bn2)
    return jax.nn.relu(h + x)


if __name__ == "__main__":
    # Lane-dense BasicBlock config (C=128 is a real ResNet-18/34 width); batch
    # large enough that each grid step carries multiple images (M = Bt*H*W rows)
    # and the grid has 8 steps to pipeline.
    B, C, H, W = 16, 128, 8, 8

    key = jax.random.PRNGKey(0)
    keys = jax.random.split(key, 11)

    x = jax.random.normal(keys[0], (B, C, H, W), jnp.float32)
    fan_in = 9 * C
    conv1_w = jax.random.normal(keys[1], (C, C, 3, 3), jnp.float32) / jnp.sqrt(fan_in)
    conv2_w = jax.random.normal(keys[2], (C, C, 3, 3), jnp.float32) / jnp.sqrt(fan_in)

    bn1 = (jax.random.uniform(keys[3], (C,), jnp.float32, 0.5, 1.5),   # gamma
           0.1 * jax.random.normal(keys[4], (C,), jnp.float32),        # beta
           0.1 * jax.random.normal(keys[5], (C,), jnp.float32),        # running_mean
           jax.random.uniform(keys[6], (C,), jnp.float32, 0.5, 1.5))   # running_var
    bn2 = (jax.random.uniform(keys[7], (C,), jnp.float32, 0.5, 1.5),
           0.1 * jax.random.normal(keys[8], (C,), jnp.float32),
           0.1 * jax.random.normal(keys[9], (C,), jnp.float32),
           jax.random.uniform(keys[10], (C,), jnp.float32, 0.5, 1.5))

    out = basic_block_forward(x, conv1_w, bn1, conv2_w, bn2)
    out = jax.block_until_ready(out)

    ref = _reference_basic_block(x, conv1_w, bn1, conv2_w, bn2)
    assert out.shape == (B, C, H, W)
    # bf16 MXU operands vs. a Precision.HIGHEST f32 reference -> loosened tolerance.
    max_err = float(jnp.max(jnp.abs(out - ref)))
    assert jnp.allclose(out, ref, atol=1e-1, rtol=1e-1), max_err

    print("KERNEL_OK")
</pallas_src>

<mosaic_0001>
module attributes {stable_mosaic.version = 11 : i64} {
  func.func @_basic_block_kernel(%arg0: i32, %arg1: memref<2x8x8x128xf32, #tpu.memory_space<vmem>>, %arg2: memref<9x128x128xbf16, #tpu.memory_space<vmem>>, %arg3: memref<1x128xf32, #tpu.memory_space<vmem>>, %arg4: memref<9x128x128xbf16, #tpu.memory_space<vmem>>, %arg5: memref<1x128xf32, #tpu.memory_space<vmem>>, %arg6: memref<2x8x8x128xf32, #tpu.memory_space<vmem>>, %arg7: memref<2x10x10x128xbf16, #tpu.memory_space<vmem>>, %arg8: memref<2x10x10x128xbf16, #tpu.memory_space<vmem>>) attributes {dimension_semantics = [#tpu.dimension_semantics<parallel>], iteration_bounds = array<i64: 8>, scalar_prefetch = 0 : i64, scratch_operands = 2 : i64, tpu.core_type = #tpu.core_type<tc>, window_params = [{transform_indices = @transform_0, window_bounds = array<i64: 2, 8, 8, 128>}, {pipeline_mode = #tpu.pipeline_mode<synchronous>, transform_indices = @transform_1, window_bounds = array<i64: 9, 128, 128>}, {pipeline_mode = #tpu.pipeline_mode<synchronous>, transform_indices = @transform_2, window_bounds = array<i64: 1, 128>}, {pipeline_mode = #tpu.pipeline_mode<synchronous>, transform_indices = @transform_3, window_bounds = array<i64: 9, 128, 128>}, {pipeline_mode = #tpu.pipeline_mode<synchronous>, transform_indices = @transform_4, window_bounds = array<i64: 1, 128>}, {transform_indices = @transform_5, window_bounds = array<i64: 2, 8, 8, 128>}]} {
    %c0 = arith.constant 0 : index
    %c0_0 = arith.constant 0 : index
    %c0_1 = arith.constant 0 : index
    %c0_2 = arith.constant 0 : index
    %0 = vector.load %arg1[%c0, %c0_0, %c0_1, %c0_2] : memref<2x8x8x128xf32, #tpu.memory_space<vmem>>, vector<2x8x8x128xf32>
    %1 = arith.truncf %0 : vector<2x8x8x128xf32> to vector<2x8x8x128xbf16>
    %cst = arith.constant 0.000000e+00 : bf16
    %2 = vector.broadcast %cst : bf16 to vector<2x8x1x128xbf16>
    %cst_3 = arith.constant 0.000000e+00 : bf16
    %3 = vector.broadcast %cst_3 : bf16 to vector<2x1x10x128xbf16>
    %4 = tpu.concatenate %2, %1, %2 in 2 : vector<2x8x1x128xbf16>, vector<2x8x8x128xbf16>, vector<2x8x1x128xbf16> -> vector<2x8x10x128xbf16>
    %c0_4 = arith.constant 0 : index
    %c0_5 = arith.constant 0 : index
    %c0_6 = arith.constant 0 : index
    %c0_7 = arith.constant 0 : index
    %5 = vector.load %arg7[%c0_4, %c0_5, %c0_6, %c0_7] : memref<2x10x10x128xbf16, #tpu.memory_space<vmem>>, vector<2x1x10x128xbf16>
    tpu.vector_store %arg7[%c0_4, %c0_5, %c0_6, %c0_7], %3 {strides = array<i32>} : memref<2x10x10x128xbf16, #tpu.memory_space<vmem>>, vector<2x1x10x128xbf16>,
    %c0_8 = arith.constant 0 : index
    %c9 = arith.constant 9 : index
    %c0_9 = arith.constant 0 : index
    %c0_10 = arith.constant 0 : index
    %6 = vector.load %arg7[%c0_8, %c9, %c0_9, %c0_10] : memref<2x10x10x128xbf16, #tpu.memory_space<vmem>>, vector<2x1x10x128xbf16>
    tpu.vector_store %arg7[%c0_8, %c9, %c0_9, %c0_10], %3 {strides = array<i32>} : memref<2x10x10x128xbf16, #tpu.memory_space<vmem>>, vector<2x1x10x128xbf16>,
    %c0_11 = arith.constant 0 : index
    %c1 = arith.constant 1 : index
    %c0_12 = arith.constant 0 : index
    %c0_13 = arith.constant 0 : index
    %7 = vector.load %arg7[%c0_11, %c1, %c0_12, %c0_13] : memref<2x10x10x128xbf16, #tpu.memory_space<vmem>>, vector<2x8x10x128xbf16>
    tpu.vector_store %arg7[%c0_11, %c1, %c0_12, %c0_13], %4 {strides = array<i32>} : memref<2x10x10x128xbf16, #tpu.memory_space<vmem>>, vector<2x8x10x128xbf16>,
    %cst_14 = arith.constant 0.000000e+00 : f32
    %8 = vector.broadcast %cst_14 : f32 to vector<128x128xf32>
    %c0_15 = arith.constant 0 : index
    %c0_16 = arith.constant 0 : index
    %c0_17 = arith.constant 0 : index
    %c0_18 = arith.constant 0 : index
    %9 = vector.load %arg7[%c0_15, %c0_16, %c0_17, %c0_18] : memref<2x10x10x128xbf16, #tpu.memory_space<vmem>>, vector<2x10x8x128xbf16>
    %10 = vector.extract_strided_slice %9 {offsets = [0, 0, 0, 0], sizes = [2, 8, 8, 128], strides = [1, 1, 1, 1]} : vector<2x10x8x128xbf16> to vector<2x8x8x128xbf16>
    %11 = vector.shape_cast %10 : vector<2x8x8x128xbf16> to vector<128x128xbf16>
    %c0_19 = arith.constant 0 : index
    %c0_20 = arith.constant 0 : index
    %c0_21 = arith.constant 0 : index
    %12 = vector.load %arg2[%c0_19, %c0_20, %c0_21] : memref<9x128x128xbf16, #tpu.memory_space<vmem>>, vector<1x128x128xbf16>
    %13 = vector.shape_cast %12 : vector<1x128x128xbf16> to vector<128x128xbf16>
    %cst_22 = arith.constant dense<0.000000e+00> : vector<128x128xf32>
    %14 = tpu.matmul %11, %13, %cst_22 {dimension_numbers = #tpu.dot_dimension_numbers<[1], [0], [0], [1], [0, 0, 1, 1], [], []>} : vector<128x128xbf16>, vector<128x128xbf16>, vector<128x128xf32> -> vector<128x128xf32>
    %15 = arith.addf %8, %14 : vector<128x128xf32>
    %16 = vector.extract_strided_slice %9 {offsets = [0, 1, 0, 0], sizes = [2, 8, 8, 128], strides = [1, 1, 1, 1]} : vector<2x10x8x128xbf16> to vector<2x8x8x128xbf16>
    %17 = vector.shape_cast %16 : vector<2x8x8x128xbf16> to vector<128x128xbf16>
    %c3 = arith.constant 3 : index
    %c0_23 = arith.constant 0 : index
    %c0_24 = arith.constant 0 : index
    %18 = vector.load %arg2[%c3, %c0_23, %c0_24] : memref<9x128x128xbf16, #tpu.memory_space<vmem>>, vector<1x128x128xbf16>
    %19 = vector.shape_cast %18 : vector<1x128x128xbf16> to vector<128x128xbf16>
    %cst_25 = arith.constant dense<0.000000e+00> : vector<128x128xf32>
    %20 = tpu.matmul %17, %19, %cst_25 {dimension_numbers = #tpu.dot_dimension_numbers<[1], [0], [0], [1], [0, 0, 1, 1], [], []>} : vector<128x128xbf16>, vector<128x128xbf16>, vector<128x128xf32> -> vector<128x128xf32>
    %21 = arith.addf %15, %20 : vector<128x128xf32>
    %22 = vector.extract_strided_slice %9 {offsets = [0, 2, 0, 0], sizes = [2, 8, 8, 128], strides = [1, 1, 1, 1]} : vector<2x10x8x128xbf16> to vector<2x8x8x128xbf16>
    %23 = vector.shape_cast %22 : vector<2x8x8x128xbf16> to vector<128x128xbf16>
    %c6 = arith.constant 6 : index
    %c0_26 = arith.constant 0 : index
    %c0_27 = arith.constant 0 : index
    %24 = vector.load %arg2[%c6, %c0_26, %c0_27] : memref<9x128x128xbf16, #tpu.memory_space<vmem>>, vector<1x128x128xbf16>
    %25 = vector.shape_cast %24 : vector<1x128x128xbf16> to vector<128x128xbf16>
    %cst_28 = arith.constant dense<0.000000e+00> : vector<128x128xf32>
    %26 = tpu.matmul %23, %25, %cst_28 {dimension_numbers = #tpu.dot_dimension_numbers<[1], [0], [0], [1], [0, 0, 1, 1], [], []>} : vector<128x128xbf16>, vector<128x128xbf16>, vector<128x128xf32> -> vector<128x128xf32>
    %27 = arith.addf %21, %26 : vector<128x128xf32>
    %c0_29 = arith.constant 0 : index
    %c0_30 = arith.constant 0 : index
    %c1_31 = arith.constant 1 : index
    %c0_32 = arith.constant 0 : index
    %28 = vector.load %arg7[%c0_29, %c0_30, %c1_31, %c0_32] : memref<2x10x10x128xbf16, #tpu.memory_space<vmem>>, vector<2x10x8x128xbf16>
    %29 = vector.extract_strided_slice %28 {offsets = [0, 0, 0, 0], sizes = [2, 8, 8, 128], strides = [1, 1, 1, 1]} : vector<2x10x8x128xbf16> to vector<2x8x8x128xbf16>
    %30 = vector.shape_cast %29 : vector<2x8x8x128xbf16> to vector<128x128xbf16>
    %c1_33 = arith.constant 1 : index
    %c0_34 = arith.constant 0 : index
    %c0_35 = arith.constant 0 : index
    %31 = vector.load %arg2[%c1_33, %c0_34, %c0_35] : memref<9x128x128xbf16, #tpu.memory_space<vmem>>, vector<1x128x128xbf16>
    %32 = vector.shape_cast %31 : vector<1x128x128xbf16> to vector<128x128xbf16>
    %cst_36 = arith.constant dense<0.000000e+00> : vector<128x128xf32>
    %33 = tpu.matmul %30, %32, %cst_36 {dimension_numbers = #tpu.dot_dimension_numbers<[1], [0], [0], [1], [0, 0, 1, 1], [], []>} : vector<128x128xbf16>, vector<128x128xbf16>, vector<128x128xf32> -> vector<128x128xf32>
    %34 = arith.addf %27, %33 : vector<128x128xf32>
    %35 = vector.extract_strided_slice %28 {offsets = [0, 1, 0, 0], sizes = [2, 8, 8, 128], strides = [1, 1, 1, 1]} : vector<2x10x8x128xbf16> to vector<2x8x8x128xbf16>
    %36 = vector.shape_cast %35 : vector<2x8x8x128xbf16> to vector<128x128xbf16>
    %c4 = arith.constant 4 : index
    %c0_37 = arith.constant 0 : index
    %c0_38 = arith.constant 0 : index
    %37 = vector.load %arg2[%c4, %c0_37, %c0_38] : memref<9x128x128xbf16, #tpu.memory_space<vmem>>, vector<1x128x128xbf16>
    %38 = vector.shape_cast %37 : vector<1x128x128xbf16> to vector<128x128xbf16>
    %cst_39 = arith.constant dense<0.000000e+00> : vector<128x128xf32>
    %39 = tpu.matmul %36, %38, %cst_39 {dimension_numbers = #tpu.dot_dimension_numbers<[1], [0], [0], [1], [0, 0, 1, 1], [], []>} : vector<128x128xbf16>, vector<128x128xbf16>, vector<128x128xf32> -> vector<128x128xf32>
    %40 = arith.addf %34, %39 : vector<128x128xf32>
    %41 = vector.extract_strided_slice %28 {offsets = [0, 2, 0, 0], sizes = [2, 8, 8, 128], strides = [1, 1, 1, 1]} : vector<2x10x8x128xbf16> to vector<2x8x8x128xbf16>
    %42 = vector.shape_cast %41 : vector<2x8x8x128xbf16> to vector<128x128xbf16>
    %c7 = arith.constant 7 : index
    %c0_40 = arith.constant 0 : index
    %c0_41 = arith.constant 0 : index
    %43 = vector.load %arg2[%c7, %c0_40, %c0_41] : memref<9x128x128xbf16, #tpu.memory_space<vmem>>, vector<1x128x128xbf16>
    %44 = vector.shape_cast %43 : vector<1x128x128xbf16> to vector<128x128xbf16>
    %cst_42 = arith.constant dense<0.000000e+00> : vector<128x128xf32>
    %45 = tpu.matmul %42, %44, %cst_42 {dimension_numbers = #tpu.dot_dimension_numbers<[1], [0], [0], [1], [0, 0, 1, 1], [], []>} : vector<128x128xbf16>, vector<128x128xbf16>, vector<128x128xf32> -> vector<128x128xf32>
    %46 = arith.addf %40, %45 : vector<128x128xf32>
    %c0_43 = arith.constant 0 : index
    %c0_44 = arith.constant 0 : index
    %c2 = arith.constant 2 : index
    %c0_45 = arith.constant 0 : index
    %47 = vector.load %arg7[%c0_43, %c0_44, %c2, %c0_45] : memref<2x10x10x128xbf16, #tpu.memory_space<vmem>>, vector<2x10x8x128xbf16>
    %48 = vector.extract_strided_slice %47 {offsets = [0, 0, 0, 0], sizes = [2, 8, 8, 128], strides = [1, 1, 1, 1]} : vector<2x10x8x128xbf16> to vector<2x8x8x128xbf16>
    %49 = vector.shape_cast %48 : vector<2x8x8x128xbf16> to vector<128x128xbf16>
    %c2_46 = arith.constant 2 : index
    %c0_47 = arith.constant 0 : index
    %c0_48 = arith.constant 0 : index
    %50 = vector.load %arg2[%c2_46, %c0_47, %c0_48] : memref<9x128x128xbf16, #tpu.memory_space<vmem>>, vector<1x128x128xbf16>
    %51 = vector.shape_cast %50 : vector<1x128x128xbf16> to vector<128x128xbf16>
    %cst_49 = arith.constant dense<0.000000e+00> : vector<128x128xf32>
    %52 = tpu.matmul %49, %51, %cst_49 {dimension_numbers = #tpu.dot_dimension_numbers<[1], [0], [0], [1], [0, 0, 1, 1], [], []>} : vector<128x128xbf16>, vector<128x128xbf16>, vector<128x128xf32> -> vector<128x128xf32>
    %53 = arith.addf %46, %52 : vector<128x128xf32>
    %54 = vector.extract_strided_slice %47 {offsets = [0, 1, 0, 0], sizes = [2, 8, 8, 128], strides = [1, 1, 1, 1]} : vector<2x10x8x128xbf16> to vector<2x8x8x128xbf16>
    %55 = vector.shape_cast %54 : vector<2x8x8x128xbf16> to vector<128x128xbf16>
    %c5 = arith.constant 5 : index
    %c0_50 = arith.constant 0 : index
    %c0_51 = arith.constant 0 : index
    %56 = vector.load %arg2[%c5, %c0_50, %c0_51] : memref<9x128x128xbf16, #tpu.memory_space<vmem>>, vector<1x128x128xbf16>
    %57 = vector.shape_cast %56 : vector<1x128x128xbf16> to vector<128x128xbf16>
    %cst_52 = arith.constant dense<0.000000e+00> : vector<128x128xf32>
    %58 = tpu.matmul %55, %57, %cst_52 {dimension_numbers = #tpu.dot_dimension_numbers<[1], [0], [0], [1], [0, 0, 1, 1], [], []>} : vector<128x128xbf16>, vector<128x128xbf16>, vector<128x128xf32> -> vector<128x128xf32>
    %59 = arith.addf %53, %58 : vector<128x128xf32>
    %60 = vector.extract_strided_slice %47 {offsets = [0, 2, 0, 0], sizes = [2, 8, 8, 128], strides = [1, 1, 1, 1]} : vector<2x10x8x128xbf16> to vector<2x8x8x128xbf16>
    %61 = vector.shape_cast %60 : vector<2x8x8x128xbf16> to vector<128x128xbf16>
    %c8 = arith.constant 8 : index
    %c0_53 = arith.constant 0 : index
    %c0_54 = arith.constant 0 : index
    %62 = vector.load %arg2[%c8, %c0_53, %c0_54] : memref<9x128x128xbf16, #tpu.memory_space<vmem>>, vector<1x128x128xbf16>
    %63 = vector.shape_cast %62 : vector<1x128x128xbf16> to vector<128x128xbf16>
    %cst_55 = arith.constant dense<0.000000e+00> : vector<128x128xf32>
    %64 = tpu.matmul %61, %63, %cst_55 {dimension_numbers = #tpu.dot_dimension_numbers<[1], [0], [0], [1], [0, 0, 1, 1], [], []>} : vector<128x128xbf16>, vector<128x128xbf16>, vector<128x128xf32> -> vector<128x128xf32>
    %65 = arith.addf %59, %64 : vector<128x128xf32>
    %c0_56 = arith.constant 0 : index
    %c0_57 = arith.constant 0 : index
    %66 = vector.load %arg3[%c0_56, %c0_57] : memref<1x128xf32, #tpu.memory_space<vmem>>, vector<1x128xf32>
    %67 = vector.broadcast %66 : vector<1x128xf32> to vector<128x128xf32>
    %68 = arith.addf %65, %67 : vector<128x128xf32>
    %cst_58 = arith.constant 0.000000e+00 : f32
    %69 = vector.broadcast %cst_58 : f32 to vector<128x128xf32>
    %70 = arith.maximumf %68, %69 : vector<128x128xf32>
    %71 = vector.shape_cast %70 : vector<128x128xf32> to vector<2x8x8x128xf32>
    %72 = arith.truncf %71 : vector<2x8x8x128xf32> to vector<2x8x8x128xbf16>
    %cst_59 = arith.constant 0.000000e+00 : bf16
    %73 = vector.broadcast %cst_59 : bf16 to vector<2x8x1x128xbf16>
    %cst_60 = arith.constant 0.000000e+00 : bf16
    %74 = vector.broadcast %cst_60 : bf16 to vector<2x1x10x128xbf16>
    %75 = tpu.concatenate %73, %72, %73 in 2 : vector<2x8x1x128xbf16>, vector<2x8x8x128xbf16>, vector<2x8x1x128xbf16> -> vector<2x8x10x128xbf16>
    %c0_61 = arith.constant 0 : index
    %c0_62 = arith.constant 0 : index
    %c0_63 = arith.constant 0 : index
    %c0_64 = arith.constant 0 : index
    %76 = vector.load %arg8[%c0_61, %c0_62, %c0_63, %c0_64] : memref<2x10x10x128xbf16, #tpu.memory_space<vmem>>, vector<2x1x10x128xbf16>
    tpu.vector_store %arg8[%c0_61, %c0_62, %c0_63, %c0_64], %74 {strides = array<i32>} : memref<2x10x10x128xbf16, #tpu.memory_space<vmem>>, vector<2x1x10x128xbf16>,
    %c0_65 = arith.constant 0 : index
    %c9_66 = arith.constant 9 : index
    %c0_67 = arith.constant 0 : index
    %c0_68 = arith.constant 0 : index
    %77 = vector.load %arg8[%c0_65, %c9_66, %c0_67, %c0_68] : memref<2x10x10x128xbf16, #tpu.memory_space<vmem>>, vector<2x1x10x128xbf16>
    tpu.vector_store %arg8[%c0_65, %c9_66, %c0_67, %c0_68], %74 {strides = array<i32>} : memref<2x10x10x128xbf16, #tpu.memory_space<vmem>>, vector<2x1x10x128xbf16>,
    %c0_69 = arith.constant 0 : index
    %c1_70 = arith.constant 1 : index
    %c0_71 = arith.constant 0 : index
    %c0_72 = arith.constant 0 : index
    %78 = vector.load %arg8[%c0_69, %c1_70, %c0_71, %c0_72] : memref<2x10x10x128xbf16, #tpu.memory_space<vmem>>, vector<2x8x10x128xbf16>
    tpu.vector_store %arg8[%c0_69, %c1_70, %c0_71, %c0_72], %75 {strides = array<i32>} : memref<2x10x10x128xbf16, #tpu.memory_space<vmem>>, vector<2x8x10x128xbf16>,
    %cst_73 = arith.constant 0.000000e+00 : f32
    %79 = vector.broadcast %cst_73 : f32 to vector<128x128xf32>
    %c0_74 = arith.constant 0 : index
    %c0_75 = arith.constant 0 : index
    %c0_76 = arith.constant 0 : index
    %c0_77 = arith.constant 0 : index
    %80 = vector.load %arg8[%c0_74, %c0_75, %c0_76, %c0_77] : memref<2x10x10x128xbf16, #tpu.memory_space<vmem>>, vector<2x10x8x128xbf16>
    %81 = vector.extract_strided_slice %80 {offsets = [0, 0, 0, 0], sizes = [2, 8, 8, 128], strides = [1, 1, 1, 1]} : vector<2x10x8x128xbf16> to vector<2x8x8x128xbf16>
    %82 = vector.shape_cast %81 : vector<2x8x8x128xbf16> to vector<128x128xbf16>
    %c0_78 = arith.constant 0 : index
    %c0_79 = arith.constant 0 : index
    %c0_80 = arith.constant 0 : index
    %83 = vector.load %arg4[%c0_78, %c0_79, %c0_80] : memref<9x128x128xbf16, #tpu.memory_space<vmem>>, vector<1x128x128xbf16>
    %84 = vector.shape_cast %83 : vector<1x128x128xbf16> to vector<128x128xbf16>
    %cst_81 = arith.constant dense<0.000000e+00> : vector<128x128xf32>
    %85 = tpu.matmul %82, %84, %cst_81 {dimension_numbers = #tpu.dot_dimension_numbers<[1], [0], [0], [1], [0, 0, 1, 1], [], []>} : vector<128x128xbf16>, vector<128x128xbf16>, vector<128x128xf32> -> vector<128x128xf32>
    %86 = arith.addf %79, %85 : vector<128x128xf32>
    %87 = vector.extract_strided_slice %80 {offsets = [0, 1, 0, 0], sizes = [2, 8, 8, 128], strides = [1, 1, 1, 1]} : vector<2x10x8x128xbf16> to vector<2x8x8x128xbf16>
    %88 = vector.shape_cast %87 : vector<2x8x8x128xbf16> to vector<128x128xbf16>
    %c3_82 = arith.constant 3 : index
    %c0_83 = arith.constant 0 : index
    %c0_84 = arith.constant 0 : index
    %89 = vector.load %arg4[%c3_82, %c0_83, %c0_84] : memref<9x128x128xbf16, #tpu.memory_space<vmem>>, vector<1x128x128xbf16>
    %90 = vector.shape_cast %89 : vector<1x128x128xbf16> to vector<128x128xbf16>
    %cst_85 = arith.constant dense<0.000000e+00> : vector<128x128xf32>
    %91 = tpu.matmul %88, %90, %cst_85 {dimension_numbers = #tpu.dot_dimension_numbers<[1], [0], [0], [1], [0, 0, 1, 1], [], []>} : vector<128x128xbf16>, vector<128x128xbf16>, vector<128x128xf32> -> vector<128x128xf32>
    %92 = arith.addf %86, %91 : vector<128x128xf32>
    %93 = vector.extract_strided_slice %80 {offsets = [0, 2, 0, 0], sizes = [2, 8, 8, 128], strides = [1, 1, 1, 1]} : vector<2x10x8x128xbf16> to vector<2x8x8x128xbf16>
    %94 = vector.shape_cast %93 : vector<2x8x8x128xbf16> to vector<128x128xbf16>
    %c6_86 = arith.constant 6 : index
    %c0_87 = arith.constant 0 : index
    %c0_88 = arith.constant 0 : index
    %95 = vector.load %arg4[%c6_86, %c0_87, %c0_88] : memref<9x128x128xbf16, #tpu.memory_space<vmem>>, vector<1x128x128xbf16>
    %96 = vector.shape_cast %95 : vector<1x128x128xbf16> to vector<128x128xbf16>
    %cst_89 = arith.constant dense<0.000000e+00> : vector<128x128xf32>
    %97 = tpu.matmul %94, %96, %cst_89 {dimension_numbers = #tpu.dot_dimension_numbers<[1], [0], [0], [1], [0, 0, 1, 1], [], []>} : vector<128x128xbf16>, vector<128x128xbf16>, vector<128x128xf32> -> vector<128x128xf32>
    %98 = arith.addf %92, %97 : vector<128x128xf32>
    %c0_90 = arith.constant 0 : index
    %c0_91 = arith.constant 0 : index
    %c1_92 = arith.constant 1 : index
    %c0_93 = arith.constant 0 : index
    %99 = vector.load %arg8[%c0_90, %c0_91, %c1_92, %c0_93] : memref<2x10x10x128xbf16, #tpu.memory_space<vmem>>, vector<2x10x8x128xbf16>
    %100 = vector.extract_strided_slice %99 {offsets = [0, 0, 0, 0], sizes = [2, 8, 8, 128], strides = [1, 1, 1, 1]} : vector<2x10x8x128xbf16> to vector<2x8x8x128xbf16>
    %101 = vector.shape_cast %100 : vector<2x8x8x128xbf16> to vector<128x128xbf16>
    %c1_94 = arith.constant 1 : index
    %c0_95 = arith.constant 0 : index
    %c0_96 = arith.constant 0 : index
    %102 = vector.load %arg4[%c1_94, %c0_95, %c0_96] : memref<9x128x128xbf16, #tpu.memory_space<vmem>>, vector<1x128x128xbf16>
    %103 = vector.shape_cast %102 : vector<1x128x128xbf16> to vector<128x128xbf16>
    %cst_97 = arith.constant dense<0.000000e+00> : vector<128x128xf32>
    %104 = tpu.matmul %101, %103, %cst_97 {dimension_numbers = #tpu.dot_dimension_numbers<[1], [0], [0], [1], [0, 0, 1, 1], [], []>} : vector<128x128xbf16>, vector<128x128xbf16>, vector<128x128xf32> -> vector<128x128xf32>
    %105 = arith.addf %98, %104 : vector<128x128xf32>
    %106 = vector.extract_strided_slice %99 {offsets = [0, 1, 0, 0], sizes = [2, 8, 8, 128], strides = [1, 1, 1, 1]} : vector<2x10x8x128xbf16> to vector<2x8x8x128xbf16>
    %107 = vector.shape_cast %106 : vector<2x8x8x128xbf16> to vector<128x128xbf16>
    %c4_98 = arith.constant 4 : index
    %c0_99 = arith.constant 0 : index
    %c0_100 = arith.constant 0 : index
    %108 = vector.load %arg4[%c4_98, %c0_99, %c0_100] : memref<9x128x128xbf16, #tpu.memory_space<vmem>>, vector<1x128x128xbf16>
    %109 = vector.shape_cast %108 : vector<1x128x128xbf16> to vector<128x128xbf16>
    %cst_101 = arith.constant dense<0.000000e+00> : vector<128x128xf32>
    %110 = tpu.matmul %107, %109, %cst_101 {dimension_numbers = #tpu.dot_dimension_numbers<[1], [0], [0], [1], [0, 0, 1, 1], [], []>} : vector<128x128xbf16>, vector<128x128xbf16>, vector<128x128xf32> -> vector<128x128xf32>
    %111 = arith.addf %105, %110 : vector<128x128xf32>
    %112 = vector.extract_strided_slice %99 {offsets = [0, 2, 0, 0], sizes = [2, 8, 8, 128], strides = [1, 1, 1, 1]} : vector<2x10x8x128xbf16> to vector<2x8x8x128xbf16>
    %113 = vector.shape_cast %112 : vector<2x8x8x128xbf16> to vector<128x128xbf16>
    %c7_102 = arith.constant 7 : index
    %c0_103 = arith.constant 0 : index
    %c0_104 = arith.constant 0 : index
    %114 = vector.load %arg4[%c7_102, %c0_103, %c0_104] : memref<9x128x128xbf16, #tpu.memory_space<vmem>>, vector<1x128x128xbf16>
    %115 = vector.shape_cast %114 : vector<1x128x128xbf16> to vector<128x128xbf16>
    %cst_105 = arith.constant dense<0.000000e+00> : vector<128x128xf32>
    %116 = tpu.matmul %113, %115, %cst_105 {dimension_numbers = #tpu.dot_dimension_numbers<[1], [0], [0], [1], [0, 0, 1, 1], [], []>} : vector<128x128xbf16>, vector<128x128xbf16>, vector<128x128xf32> -> vector<128x128xf32>
    %117 = arith.addf %111, %116 : vector<128x128xf32>
    %c0_106 = arith.constant 0 : index
    %c0_107 = arith.constant 0 : index
    %c2_108 = arith.constant 2 : index
    %c0_109 = arith.constant 0 : index
    %118 = vector.load %arg8[%c0_106, %c0_107, %c2_108, %c0_109] : memref<2x10x10x128xbf16, #tpu.memory_space<vmem>>, vector<2x10x8x128xbf16>
    %119 = vector.extract_strided_slice %118 {offsets = [0, 0, 0, 0], sizes = [2, 8, 8, 128], strides = [1, 1, 1, 1]} : vector<2x10x8x128xbf16> to vector<2x8x8x128xbf16>
    %120 = vector.shape_cast %119 : vector<2x8x8x128xbf16> to vector<128x128xbf16>
    %c2_110 = arith.constant 2 : index
    %c0_111 = arith.constant 0 : index
    %c0_112 = arith.constant 0 : index
    %121 = vector.load %arg4[%c2_110, %c0_111, %c0_112] : memref<9x128x128xbf16, #tpu.memory_space<vmem>>, vector<1x128x128xbf16>
    %122 = vector.shape_cast %121 : vector<1x128x128xbf16> to vector<128x128xbf16>
    %cst_113 = arith.constant dense<0.000000e+00> : vector<128x128xf32>
    %123 = tpu.matmul %120, %122, %cst_113 {dimension_numbers = #tpu.dot_dimension_numbers<[1], [0], [0], [1], [0, 0, 1, 1], [], []>} : vector<128x128xbf16>, vector<128x128xbf16>, vector<128x128xf32> -> vector<128x128xf32>
    %124 = arith.addf %117, %123 : vector<128x128xf32>
    %125 = vector.extract_strided_slice %118 {offsets = [0, 1, 0, 0], sizes = [2, 8, 8, 128], strides = [1, 1, 1, 1]} : vector<2x10x8x128xbf16> to vector<2x8x8x128xbf16>
    %126 = vector.shape_cast %125 : vector<2x8x8x128xbf16> to vector<128x128xbf16>
    %c5_114 = arith.constant 5 : index
    %c0_115 = arith.constant 0 : index
    %c0_116 = arith.constant 0 : index
    %127 = vector.load %arg4[%c5_114, %c0_115, %c0_116] : memref<9x128x128xbf16, #tpu.memory_space<vmem>>, vector<1x128x128xbf16>
    %128 = vector.shape_cast %127 : vector<1x128x128xbf16> to vector<128x128xbf16>
    %cst_117 = arith.constant dense<0.000000e+00> : vector<128x128xf32>
    %129 = tpu.matmul %126, %128, %cst_117 {dimension_numbers = #tpu.dot_dimension_numbers<[1], [0], [0], [1], [0, 0, 1, 1], [], []>} : vector<128x128xbf16>, vector<128x128xbf16>, vector<128x128xf32> -> vector<128x128xf32>
    %130 = arith.addf %124, %129 : vector<128x128xf32>
    %131 = vector.extract_strided_slice %118 {offsets = [0, 2, 0, 0], sizes = [2, 8, 8, 128], strides = [1, 1, 1, 1]} : vector<2x10x8x128xbf16> to vector<2x8x8x128xbf16>
    %132 = vector.shape_cast %131 : vector<2x8x8x128xbf16> to vector<128x128xbf16>
    %c8_118 = arith.constant 8 : index
    %c0_119 = arith.constant 0 : index
    %c0_120 = arith.constant 0 : index
    %133 = vector.load %arg4[%c8_118, %c0_119, %c0_120] : memref<9x128x128xbf16, #tpu.memory_space<vmem>>, vector<1x128x128xbf16>
    %134 = vector.shape_cast %133 : vector<1x128x128xbf16> to vector<128x128xbf16>
    %cst_121 = arith.constant dense<0.000000e+00> : vector<128x128xf32>
    %135 = tpu.matmul %132, %134, %cst_121 {dimension_numbers = #tpu.dot_dimension_numbers<[1], [0], [0], [1], [0, 0, 1, 1], [], []>} : vector<128x128xbf16>, vector<128x128xbf16>, vector<128x128xf32> -> vector<128x128xf32>
    %136 = arith.addf %130, %135 : vector<128x128xf32>
    %c0_122 = arith.constant 0 : index
    %c0_123 = arith.constant 0 : index
    %137 = vector.load %arg5[%c0_122, %c0_123] : memref<1x128xf32, #tpu.memory_space<vmem>>, vector<1x128xf32>
    %138 = vector.broadcast %137 : vector<1x128xf32> to vector<128x128xf32>
    %139 = arith.addf %136, %138 : vector<128x128xf32>
    %c0_124 = arith.constant 0 : index
    %c0_125 = arith.constant 0 : index
    %c0_126 = arith.constant 0 : index
    %c0_127 = arith.constant 0 : index
    %140 = vector.load %arg1[%c0_124, %c0_125, %c0_126, %c0_127] : memref<2x8x8x128xf32, #tpu.memory_space<vmem>>, vector<2x8x8x128xf32>
    %141 = vector.shape_cast %140 : vector<2x8x8x128xf32> to vector<128x128xf32>
    %142 = arith.addf %139, %141 : vector<128x128xf32>
    %cst_128 = arith.constant 0.000000e+00 : f32
    %143 = vector.broadcast %cst_128 : f32 to vector<128x128xf32>
    %144 = arith.maximumf %142, %143 : vector<128x128xf32>
    %145 = vector.shape_cast %144 : vector<128x128xf32> to vector<2x8x8x128xf32>
    %c0_129 = arith.constant 0 : index
    %c0_130 = arith.constant 0 : index
    %c0_131 = arith.constant 0 : index
    %c0_132 = arith.constant 0 : index
    %146 = vector.load %arg6[%c0_129, %c0_130, %c0_131, %c0_132] : memref<2x8x8x128xf32, #tpu.memory_space<vmem>>, vector<2x8x8x128xf32>
    tpu.vector_store %arg6[%c0_129, %c0_130, %c0_131, %c0_132], %145 {strides = array<i32>} : memref<2x8x8x128xf32, #tpu.memory_space<vmem>>, vector<2x8x8x128xf32>,
    return
  }
  func.func @transform_0(%arg0: i32) -> (i32, i32, i32, i32) {
    %c0_i32 = arith.constant 0 : i32
    %c0_i32_0 = arith.constant 0 : i32
    %c0_i32_1 = arith.constant 0 : i32
    %c0_i32_2 = arith.constant 0 : i32
    return %arg0, %c0_i32, %c0_i32_0, %c0_i32_1 : i32, i32, i32, i32
  }
  func.func @transform_1(%arg0: i32) -> (i32, i32, i32) {
    %c0_i32 = arith.constant 0 : i32
    %c0_i32_0 = arith.constant 0 : i32
    %c0_i32_1 = arith.constant 0 : i32
    %c0_i32_2 = arith.constant 0 : i32
    return %c0_i32, %c0_i32_0, %c0_i32_1 : i32, i32, i32
  }
  func.func @transform_2(%arg0: i32) -> (i32, i32) {
    %c0_i32 = arith.constant 0 : i32
    %c0_i32_0 = arith.constant 0 : i32
    %c0_i32_1 = arith.constant 0 : i32
    return %c0_i32, %c0_i32_0 : i32, i32
  }
  func.func @transform_3(%arg0: i32) -> (i32, i32, i32) {
    %c0_i32 = arith.constant 0 : i32
    %c0_i32_0 = arith.constant 0 : i32
    %c0_i32_1 = arith.constant 0 : i32
    %c0_i32_2 = arith.constant 0 : i32
    return %c0_i32, %c0_i32_0, %c0_i32_1 : i32, i32, i32
  }
  func.func @transform_4(%arg0: i32) -> (i32, i32) {
    %c0_i32 = arith.constant 0 : i32
    %c0_i32_0 = arith.constant 0 : i32
    %c0_i32_1 = arith.constant 0 : i32
    return %c0_i32, %c0_i32_0 : i32, i32
  }
  func.func @transform_5(%arg0: i32) -> (i32, i32, i32, i32) {
    %c0_i32 = arith.constant 0 : i32
    %c0_i32_0 = arith.constant 0 : i32
    %c0_i32_1 = arith.constant 0 : i32
    %c0_i32_2 = arith.constant 0 : i32
    return %arg0, %c0_i32, %c0_i32_0, %c0_i32_1 : i32, i32, i32, i32
  }
}

</mosaic_0001>

<bundles_post_ra>
// kernel: tpu_custom_call.1
= control target key start
LH: loop header
LB: loop body
LE: loop exit
PB: predicated region body
PF: predicated region fallthrough
CT: control target
= control target key end

     0   :  { %10 = vsyncpa [#allocation5], 0  ;;  %s9115_s0 = inlined_call_operand.hbm [shape: f32[16,8,8,128], index: 0, kind: input, shape index: {}]   ;;  %s9116_s1 = inlined_call_operand.hbm [shape: bf16[9,128,128], index: 1, kind: input, shape index: {}]   ;;  %s9117_s2 = inlined_call_operand.vmem [shape: f32[1,128], index: 2, kind: input, shape index: {}]   ;;  %s9118_s3 = inlined_call_operand.hbm [shape: bf16[9,128,128], index: 3, kind: input, shape index: {}]   ;;  %s9119_s4 = inlined_call_operand.vmem [shape: f32[1,128], index: 4, kind: input, shape index: {}]   ;;  %s9120_s5 = inlined_call_operand.hbm [shape: f32[16,8,8,128], index: 5, kind: output, shape index: {}]  }
   0x1   :  { %12 = vsyncpa [#allocation5 + $0x1], 0 }
   0x2   :  { %13 = vsyncpa [#allocation8], 0 }
   0x3   :  { %14 = vsyncpa [#allocation6], 0 }
   0x4   :  { %16 = vsyncpa [#allocation6 + $0x1], 0  ;;  %s7617_s18 = smov 0   ;;  %s7619_s19 = smov 0  }
   0x5   :  { %s7621_s20 = smov 0   ;;  %s7623_s21 = smov 0  }
   0x6 LB: > { %s7638_s22 = sadd.s32 4294967295, %s7574_s21   ;;  %s5671_s23 = sadd.s32 4294967294, %s7574_s21   ;;  %s7574_s21 = sphi %s7623_s21, %s9239_s21   ;;  %s7570_s20 = sphi %s7621_s20, %s9238_s20   ;;  %s7566_s19 = sphi %s7619_s19, %s9237_s19   ;;  %s7562_s18 = sphi %s7617_s18, %s9236_s18  }
   0x7   : > { %p42_p0 = scmp.ne.s32.totalorder %s7566_s19, %s7562_s18  ;;  %p9121_p1 = scmp.eq.s32.totalorder %s7638_s22, 0 }
   0x8   : > { %p156_p3 = scmp.eq.s32.totalorder %s5671_s23, 7  ;;  %p5672_p5 = scmp.ge.s32.totalorder %s7574_s21, 1 }
   0x9   : > { %p7647_p4 = por %p9121_p1, %p42_p0  ;;  %p163_p7 = scmp.lt.s32.totalorder %s7574_s21, 9 }
   0xa   : > { %p7652_p6 = por %p156_p3, %p42_p0  ;;  %s7576_s27 = smov [#allocation7]  }
   0xb   : > { %s9145_s24 = scalar_select %p7647_p4, 1, 0 }
   0xc   : > { %s9146_s25 = scalar_select %p7652_p6, 1, 0 }
   0xd   : > { %p7657_p8 = pnand %p5672_p5, %p163_p7  ;;  %s175_s28 = sshll.u32 %s7576_s27, 4  ;;  %s176_s28 = int_to_ptr.vmem [resolvable:$true] %s175_s28 }
   0xe   : > { %s7577_s30 = smov [#allocation9]   ;;  %s7418_s9 = scalar_lea.hbm %s9116_s1, 9216 }
   0xf   : > { %s9147_s26 = scalar_select %p7657_p8, 1, 0 }
  0x10   : > { %p7185_p9 = pneg %p7657_p8  ;;  %s191_s6 = sshll.u32 %s7577_s30, 4  ;;  %s7669_s6 = int_to_ptr.vmem [resolvable:$true] %s191_s6 }
  0x11   : > { %p7419_p11 = scmp.ne.s32.totalorder %s9116_s1, %s7418_s9  ;;  %p7425_p3 = scmp.lt.u32.totalorder %s7418_s9, %s9116_s1 }
  0x12   : > { %p7665_p10 = pnand %p7185_p9, %p9121_p1 }
  0x14   : > { %p7420_p12 = pneg %p7665_p10 }
  0x16   : > { %p7421_p13 = pnand %p7420_p12, %p7419_p11 }
  0x18   : > { %p7422_p0 = pneg %p7421_p13 }
  0x1a   : > { %p7427_p5 = pnand %p7425_p3, %p7422_p0 }
  0x1c   : > { %7430 = shalt.err (!%p7427_p5)
}
  0x1d   : > { %s7431_s14 = scalar_lea.vmem %s176_s28, 9216  ;;  %p7439_p2 = scmp.lt.s32.totalorder %s176_s28, %s176_s28 }
  0x1e   : > { %p7432_p7 = scmp.ne.s32.totalorder %s176_s28, %s7431_s14  ;;  %p7440_p6 = scmp.lt.s32.totalorder %s7431_s14, %s7431_s14 }
  0x20   : > { %p7434_p9 = pnand %p7432_p7, %p7420_p12  ;;  %p7441_p4 = por %p7440_p6, %p7439_p2 }
  0x22   : > { %p7435_p1 = pneg %p7434_p9 }
  0x24   : > { %p7442_p8 = pnand %p7441_p4, %p7435_p1 }
  0x26   : > { %7445 = shalt.err (!%p7442_p8)
}
  0x27   : > { %s7578_s15 = smov 64   ;;  %s7579_s16 = smov 4  }
  0x28   : > { %7188 = dma.hbm_to_vmem [thread:$0]  (!%p7665_p10), %s9116_s1, 9216, %s176_s28, [#allocation8], %s7578_s15, %s7578_s15, %s7579_s16  }
  0x29   : > { %s7446_s7 = scalar_lea.hbm %s9118_s3, 9216 }
  0x2a   : > { %p7447_p11 = scmp.ne.s32.totalorder %s9118_s3, %s7446_s7  ;;  %p7453_p4 = scmp.lt.u32.totalorder %s7446_s7, %s9118_s3 }
  0x2c   : > { %p7449_p1 = pnand %p7447_p11, %p7420_p12 }
  0x2e   : > { %p7450_p2 = pneg %p7449_p1 }
  0x30   : > { %p7455_p6 = pnand %p7453_p4, %p7450_p2 }
  0x32   : > { %7458 = shalt.err (!%p7455_p6)
}
  0x33   : > { %s7459_s28 = scalar_lea.vmem %s7669_s6, 9216  ;;  %p7467_p3 = scmp.lt.s32.totalorder %s7669_s6, %s7669_s6 }
  0x34   : > { %p7460_p8 = scmp.ne.s32.totalorder %s7669_s6, %s7459_s28  ;;  %p7468_p5 = scmp.lt.s32.totalorder %s7459_s28, %s7459_s28 }
  0x36   : > { %p7462_p13 = pnand %p7460_p8, %p7420_p12  ;;  %p7469_p7 = por %p7468_p5, %p7467_p3 }
  0x38   : > { %p7463_p0 = pneg %p7462_p13 }
  0x3a   : > { %p7470_p9 = pnand %p7469_p7, %p7463_p0 }
  0x3c   : > { %7473 = shalt.err (!%p7470_p9)
}
  0x3d   : > { %7191 = dma.hbm_to_vmem [thread:$0]  (!%p7665_p10), %s9118_s3, 9216, %s7669_s6, [#allocation8], %s7578_s15, %s7578_s15, %s7579_s16  }
  0x3e   : > { %s7719_s14 = sadd.s32 1, %s7574_s21   ;;  %s29_s29 = sadd.s32 1, %s7570_s20 }
  0x3f   : > { %s26_s17 = ssub.s32 %s7574_s21, %s7719_s14  ;;  %p36_p12 = scmp.ne.s32.totalorder %s7570_s20, %s7566_s19 }
  0x40   : > { %p27_p11 = scmp.eq.s32.totalorder %s26_s17, 0  ;;  %p37_p1 = scmp.eq.s32.totalorder %s7574_s21, 0 }
  0x41   : > { %p9149_p2 = scmp.eq.s32.totalorder %s7638_s22, 7  ;;  %p7202_p6 = scmp.lt.s32.totalorder %s7574_s21, 8 }
  0x42   : > { %s7735_s27 = scalar_select %p27_p11, %s7570_s20, %s29_s29  }
  0x43   : > { %p7729_p4 = por %p9149_p2, %p36_p12  ;;  %p38_p8 = por %p37_p1, %p36_p12 }
  0x44   : > { %s208_s30 = sand.u32 1, %s7570_s20   ;;  %s6050_s6 = sshll.u32 %s7574_s21, 11 }
  0x45   : > { %s5676_s7 = sshll.u32 %s208_s30, 7  ;;  %s7742_s8 = scalar_lea.hbm %s9115_s0, %s6050_s6 }
  0x46   : > { %s212_s9 = scalar_lea.vmem [#allocation4], %s5676_s7  ;;  %p7746_p10 = pnand %p7202_p6, %p38_p8 }
  0x47   : > { %s220_s10 = sshll.u32 %s212_s9, 4  ;;  %s7750_s28 = scalar_lea.sflag [#allocation5], %s208_s30  ;;  %s7744_s10 = int_to_ptr.vmem [resolvable:$true] %s220_s10 }
  0x48   : > { %s7474_s12 = scalar_lea.hbm %s7742_s8, 2048  ;;  %p7476_p0 = pneg %p7746_p10 }
  0x49   : > { %p7475_p13 = scmp.ne.s32.totalorder %s7742_s8, %s7474_s12  ;;  %s7479_s17 = scalar_lea.hbm %s9115_s0, 16384 }
  0x4a   : > { %p7480_p7 = scmp.lt.u32.totalorder %s7742_s8, %s9115_s0  ;;  %p7481_p9 = scmp.lt.u32.totalorder %s7479_s17, %s7474_s12 }
  0x4b   : > { %p7477_p3 = pnand %p7476_p0, %p7475_p13  ;;  %p7483_p11 = scmp.lt.u32.totalorder %s7474_s12, %s7742_s8 }
  0x4c   : > { %p7482_p12 = por %p7481_p9, %p7480_p7 }
  0x4d   : > { %p7478_p5 = pneg %p7477_p3 }
  0x4e   : > { %p7484_p1 = por %p7483_p11, %p7482_p12 }
  0x50   : > { %p7485_p2 = pnand %p7484_p1, %p7478_p5 }
  0x52   : > { %7488 = shalt.err (!%p7485_p2)
}
  0x53   : > { %s7489_s30 = scalar_lea.vmem %s7744_s10, 2048  ;;  %s7580_s15 = smov [#allocation4]  }
  0x54   : > { %p7490_p6 = scmp.ne.s32.totalorder %s7744_s10, %s7489_s30  ;;  %s7494_s16 = sshll.u32 %s7580_s15, 4  ;;  %s7495_s16 = int_to_ptr.vmem [resolvable:$false] %s7494_s16 }
  0x55   : > { %s7496_s9 = scalar_lea.vmem %s7495_s16, 4096  ;;  %p7497_p3 = scmp.lt.s32.totalorder %s7744_s10, %s7495_s16 }
  0x56   : > { %p7492_p8 = pnand %p7490_p6, %p7476_p0  ;;  %p7498_p7 = scmp.lt.s32.totalorder %s7496_s9, %s7489_s30 }
  0x58   : > { %p7493_p13 = pneg %p7492_p8  ;;  %p7499_p9 = por %p7498_p7, %p7497_p3 }
  0x5a   : > { %p7500_p12 = pnand %p7499_p9, %p7493_p13 }
  0x5c   : > { %7503 = shalt.err (!%p7500_p12)
}
  0x5d   : > { %s7581_s12 = smov 128   ;;  %s7582_s13 = smov 8  }
  0x5e   : > { %7195 = dma.hbm_to_vmem [thread:$0]  (!%p7746_p10), %s7742_s8, 2048, %s7744_s10, %s7750_s28, %s7581_s12, %s7581_s12, %s7582_s13  }
  0x5f   : > { %p9152_p0 = scmp.ne.s32.totalorder %s9147_s26, 0 }
  0x61   : > { %232 = sbr.rel (%p9152_p0) target bundleno = 1172 (0x494), region = 40 }
  0x68   : > { %s7781_s29 = sand.u32 1, %s7566_s19   ;;  %p9153_p5 = scmp.ne.s32.totalorder %s9145_s24, 0 }
  0x69   : > { %s5681_s17 = sshll.u32 %s7781_s29, 7  ;;  %s235_s7 = scalar_lea.sflag [#allocation5], %s7781_s29 }
  0x6a   : > { %s7787_s6 = scalar_lea.vmem [#allocation4], %s5681_s17 }
  0x6b   : > { %7549 = dma.done.wait (%p9153_p5), %s235_s7, 2048  }
  0x6c   : > { %7551 = vsyncadd (%p9153_p5), %s235_s7, 4294965248  ;;  %p9154_p10 = scmp.eq.s32.totalorder %s7638_s22, 0 }
  0x6e   : > { %7553 = dma.done.wait (%p9154_p10), [#allocation8], 18432   ;;  %p9155_p11 = pmov %p9154_p10 }
  0x6f   : > { %v7583_v0 = vmov 0   ;;  %v7247_v1 = vld [vmem:[#allocation7 + $0xc0] sm:$0xff]   ;;  %v7248_v2 = vld [vmem:[#allocation7 + $0xc8] sm:$0xff]   ;;  %v7249_v3 = vld [vmem:[#allocation7 + $0xd0] sm:$0xff]   ;;  %vm436_vm0 = vcmask 1040384   ;;  %vm455_vm2 = vcmask 1044480  }
  0x70   : > { %7555 = vsyncadd (%p9155_p11), [#allocation8], 4294948864  ;;  %474 = vst [vmem:[#allocation2] sm:$0xf] %v7583_v0  ;;  %6341 = vmatprep.subr.bf16.mxu0 %v7247_v1  ;;  %v7250_v4 = vld [vmem:[#allocation7 + $0xd8] sm:$0xff]   ;;  %v276_v5 = vld [vmem:[%s7787_s6] sm:$0xff] }
  0x71   : > { %475 = vst [vmem:[#allocation2 + $0x4] sm:$0x1] %v7583_v0  ;;  %476 = vst [vmem:[#allocation2 + $0x50] sm:$0xf] %v7583_v0  ;;  %6342 = vmatpush3.bf16.msra.mxu0 %v7247_v1  ;;  %v277_v6 = vld [vmem:[%s7787_s6 + $0x8] sm:$0xff]  ;;  %v278_v7 = vld [vmem:[%s7787_s6 + $0x10] sm:$0xff]  ;;  %v292_v8 = vpack.c.bf16 %v276_v5, %v276_v5 }
  0x72   : > { %477 = vst [vmem:[#allocation2 + $0x54] sm:$0x1] %v7583_v0  ;;  %479 = vst [vmem:[#allocation2 + $0x48] sm:$0xf] %v7583_v0  ;;  %6343 = vmatprep.subr.bf16.mxu0 %v7248_v2  ;;  %vm437_vm1 = vsmask.f32 256  ;;  %v293_v9 = vpack.c.bf16 %v277_v6, %v277_v6  ;;  %v294_v10 = vpack.c.bf16 %v278_v7, %v278_v7 }
  0x73   : > { %480 = vst [vmem:[#allocation2 + $0x4c] sm:$0x1] %v7583_v0  ;;  %481 = vst [vmem:[#allocation2 + $0x98] sm:$0xf] %v7583_v0  ;;  %v279_v11 = vld [vmem:[%s7787_s6 + $0x18] sm:$0xff]  ;;  %v309_v13 = vshrl.u32 %v292_v8, 16 }
  0x74   : > { %482 = vst [vmem:[#allocation2 + $0x9c] sm:$0x1] %v7583_v0  ;;  %3086 = vst [vmem:[#allocation3] sm:$0xf] %v7583_v0  ;;  %vm456_vm3 = vsmask.f32 4352  ;;  %v295_v12 = vpack.c.bf16 %v279_v11, %v279_v11 }
  0x75   : > { %3087 = vst [vmem:[#allocation3 + $0x4] sm:$0x1] %v7583_v0  ;;  %3088 = vst [vmem:[#allocation3 + $0x50] sm:$0xf] %v7583_v0  ;;  %6344 = vmatpush3.bf16.msra.mxu0 %v7248_v2  ;;  %v312_v14 = vshll.u32 %v292_v8, 16  ;;  %v316_v15 = vshrl.u32 %v293_v9, 16 }
  0x76   : > { %3089 = vst [vmem:[#allocation3 + $0x54] sm:$0x1] %v7583_v0  ;;  %3091 = vst [vmem:[#allocation3 + $0x48] sm:$0xf] %v7583_v0  ;;  %6345 = vmatprep.subr.bf16.mxu0 %v7249_v3  ;;  %v319_v16 = vshll.u32 %v293_v9, 16  ;;  %v7251_v17 = vld [vmem:[#allocation7 + $0xe0] sm:$0xff]  }
  0x77   : > { %3092 = vst [vmem:[#allocation3 + $0x4c] sm:$0x1] %v7583_v0  ;;  %3093 = vst [vmem:[#allocation3 + $0x98] sm:$0xf] %v7583_v0  ;;  %v323_v18 = vshrl.u32 %v294_v10, 16  ;;  %v326_v19 = vshll.u32 %v294_v10, 16 }
  0x78   : > { %3094 = vst [vmem:[#allocation3 + $0x9c] sm:$0x1] %v7583_v0  ;;  %v330_v20 = vshrl.u32 %v295_v12, 16  ;;  %v333_v21 = vshll.u32 %v295_v12, 16  ;;  %v280_v22 = vld [vmem:[%s7787_s6 + $0x20] sm:$0xff]  ;;  %v311_v23 = vrot.slane %v309_v13, 7  ;;  %vm7807_vm4 = vmand %vm436_vm0, %vm437_vm1 }
  0x79   : > { %6346 = vmatpush3.bf16.msra.mxu0 %v7249_v3  ;;  %v318_v24 = vrot.slane %v316_v15, 7  ;;  %v281_v25 = vld [vmem:[%s7787_s6 + $0x28] sm:$0xff]  ;;  %v296_v26 = vpack.c.bf16 %v280_v22, %v280_v22  ;;  %v282_v27 = vld [vmem:[%s7787_s6 + $0x30] sm:$0xff]  ;;  %v283_v28 = vld [vmem:[%s7787_s6 + $0x38] sm:$0xff]  ;;  %v325_v29 = vrot.slane %v323_v18, 7  ;;  %v9156_v30 = vmov 0 }
  0x7a   : > { %6347 = vmatprep.subr.bf16.mxu0 %v7250_v4  ;;  %v9157_v30 = vsel %vm7807_vm4, 4294967295, %v9156_v30  ;;  %v332_v31 = vrot.slane %v330_v20, 7  ;;  %v297_v32 = vpack.c.bf16 %v281_v25, %v281_v25  ;;  %v7811_v33 = vpack.c.bf16 %v282_v27, %v282_v27  ;;  %vm7815_vm5 = vmand %vm455_vm2, %vm456_vm3  ;;  %v7252_v39 = vld [vmem:[#allocation7 + $0xe8] sm:$0xff]   ;;  %v7253_v52 = vld [vmem:[#allocation7 + $0xf0] sm:$0xff]   ;;  %s9023_s11 = scalar_lea.vmem [#allocation10], %s5681_s17  ;;  %s6052_s28 = sshll.u32 %s7638_s22, 11 }
  0x7b   : > { %9158 = vst [vmem:[#allocation14_spill] sm:$0xff] %v9157_v30  ;;  %v314_v34 = vor.u32 %v312_v14, %v311_v23  ;;  %v321_v35 = vor.u32 %v319_v16, %v318_v24  ;;  %v9159_v36 = vmov 0  ;;  %v337_v37 = vshrl.u32 %v296_v26, 16  ;;  %v284_v61 = vld [vmem:[%s7787_s6 + $0x40] sm:$0xff]  ;;  %v285_v62 = vld [vmem:[%s7787_s6 + $0x48] sm:$0xff]  ;;  %v7254_v7 = vld [vmem:[#allocation7 + $0xf8] sm:$0xff]   ;;  %s9067_s9 = scalar_lea.hbm %s9120_s5, %s6052_s28 }
  0x7c   : > { %v9160_v36 = vsel %vm7815_vm5, 4294967295, %v9159_v36  ;;  %v340_v38 = vshll.u32 %v296_v26, 16  ;;  %v328_v40 = vor.u32 %v326_v19, %v325_v29  ;;  %v335_v41 = vor.u32 %v333_v21, %v332_v31  ;;  %v286_v15 = vld [vmem:[%s7787_s6 + $0x50] sm:$0xff]  ;;  %v287_v20 = vld [vmem:[%s7787_s6 + $0x58] sm:$0xff]  ;;  %v288_v21 = vld [vmem:[%s7787_s6 + $0x60] sm:$0xff]  ;;  %s5579_s30 = sshll.u32 %s9023_s11, 4  ;;  %s9069_s30 = int_to_ptr.vmem [resolvable:$true] %s5579_s30 }
  0x7d   : > { %6348 = vmatpush3.bf16.msra.mxu0 %v7250_v4  ;;  %9161 = vst [vmem:[#allocation15_spill] sm:$0xff] %v9160_v36  ;;  %v344_v42 = vshrl.u32 %v297_v32, 16  ;;  %v347_v43 = vshll.u32 %v297_v32, 16  ;;  %v439_v44 = vsel %vm7807_vm4, 0, %v314_v34  ;;  %v440_v45 = vsel %vm7807_vm4, 0, %v321_v35  ;;  %v7258_v22 = vld [vmem:[#allocation7] sm:$0xff]  }
  0x7e   : > { %6349 = vmatprep.subr.bf16.mxu0 %v7251_v17  ;;  %v339_v46 = vrot.slane %v337_v37, 7  ;;  %v299_v47 = vpack.c.bf16 %v283_v28, %v283_v28  ;;  %v441_v48 = vsel %vm7807_vm4, 0, %v328_v40  ;;  %v458_v49 = vsel %vm7815_vm5, %v439_v44, 0  ;;  %s5565_s22 = scalar_lea.sflag [#allocation6], %s7781_s29  ;;  %s7504_s12 = scalar_lea.vmem %s9069_s30, 2048 }
  0x7f   : > { %v459_v50 = vsel %vm7815_vm5, %v440_v45, 0  ;;  %v442_v51 = vsel %vm7807_vm4, 0, %v335_v41  ;;  %v460_v53 = vsel %vm7815_vm5, %v441_v48, 0  ;;  %v5685_v54 = vcombine.low %v458_v49, %v458_v49  ;;  %p7505_p1 = scmp.ne.s32.totalorder %s9069_s30, %s7504_s12  ;;  %s7584_s13 = smov [#allocation10]  }
  0x80   : > { %v5686_v55 = vcombine.high %v458_v49, %v458_v49  ;;  %v5687_v56 = vcombine.low %v459_v50, %v459_v50  ;;  %v5688_v57 = vcombine.high %v459_v50, %v459_v50  ;;  %v5689_v58 = vcombine.low %v460_v53, %v460_v53  ;;  %v7259_v50 = vld [vmem:[#allocation7 + $0x8] sm:$0xff]   ;;  %s7508_s17 = sshll.u32 %s7584_s13, 4  ;;  %s7509_s17 = int_to_ptr.vmem [resolvable:$false] %s7508_s17 }
  0x81   : > { %6350 = vmatpush3.bf16.msra.mxu0 %v7251_v17  ;;  %v5690_v59 = vcombine.high %v460_v53, %v460_v53  ;;  %v461_v60 = vsel %vm7815_vm5, %v442_v51, 0  ;;  %596 = vst [vmem:[#allocation2 + $0x8] sm:$0xf] %v5685_v54  ;;  %v342_v1 = vor.u32 %v340_v38, %v339_v46  ;;  %v346_v2 = vrot.slane %v344_v42, 7  ;;  %p7506_p2 = pnand %p7505_p1, %p7729_p4  ;;  %s7510_s7 = scalar_lea.vmem %s7509_s17, 4096 }
  0x82   : > { %6351 = vmatprep.subr.bf16.mxu0 %v7252_v39  ;;  %597 = vst [vmem:[#allocation2 + $0xc] sm:$0x1] %v5686_v55  ;;  %598 = vst [vmem:[#allocation2 + $0x10] sm:$0xf] %v5687_v56  ;;  %v5691_v63 = vcombine.low %v461_v60, %v461_v60  ;;  %v5692_v0 = vcombine.high %v461_v60, %v461_v60  ;;  %v351_v3 = vshrl.u32 %v7811_v33, 16  ;;  %v354_v4 = vshll.u32 %v7811_v33, 16  ;;  %p7511_p8 = scmp.lt.s32.totalorder %s9069_s30, %s7509_s17  ;;  %p7512_p13 = scmp.lt.s32.totalorder %s7510_s7, %s7504_s12 }
  0x83   : > { %599 = vst [vmem:[#allocation2 + $0x14] sm:$0x1] %v5688_v57  ;;  %600 = vst [vmem:[#allocation2 + $0x18] sm:$0xf] %v5689_v58  ;;  %v358_v5 = vshrl.u32 %v299_v47, 16  ;;  %v361_v6 = vshll.u32 %v299_v47, 16  ;;  %v349_v8 = vor.u32 %v347_v43, %v346_v2  ;;  %v300_v10 = vpack.c.bf16 %v284_v61, %v284_v61  ;;  %p7507_p6 = pneg %p7506_p2 }
  0x84   : > { %601 = vst [vmem:[#allocation2 + $0x1c] sm:$0x1] %v5690_v59  ;;  %602 = vst [vmem:[#allocation2 + $0x20] sm:$0xf] %v5691_v63  ;;  %v443_v9 = vsel %vm7807_vm4, 0, %v342_v1  ;;  %v7841_v11 = vpack.c.bf16 %v285_v62, %v285_v62  ;;  %v353_v13 = vrot.slane %v351_v3, 7  ;;  %v302_v37 = vpack.c.bf16 %v286_v15, %v286_v15  ;;  %p7513_p3 = por %p7512_p13, %p7511_p8 }
  0x85   : > { %6352 = vmatpush3.bf16.msra.mxu0 %v7252_v39  ;;  %603 = vst [vmem:[#allocation2 + $0x24] sm:$0x1] %v5692_v0  ;;  %v462_v12 = vsel %vm7815_vm5, %v443_v9, 0  ;;  %v360_v14 = vrot.slane %v358_v5, 7  ;;  %v444_v16 = vsel %vm7807_vm4, 0, %v349_v8  ;;  %v365_v19 = vshrl.u32 %v300_v10, 16 }
  0x86   : > { %6353 = vmatprep.subr.bf16.mxu0 %v7253_v52  ;;  %v5693_v17 = vcombine.low %v462_v12, %v462_v12  ;;  %v5694_v18 = vcombine.high %v462_v12, %v462_v12  ;;  %v463_v23 = vsel %vm7815_vm5, %v444_v16, 0  ;;  %v356_v24 = vor.u32 %v354_v4, %v353_v13  ;;  %v289_v43 = vld [vmem:[%s7787_s6 + $0x68] sm:$0xff]  ;;  %v7262_v63 = vld [vmem:[#allocation7 + $0x10] sm:$0xff]   ;;  %v291_v5 = vld [vmem:[%s7787_s6 + $0x78] sm:$0xff]  ;;  %p7514_p7 = pnand %p7513_p3, %p7507_p6 }
  0x87   : > { %v363_v25 = vor.u32 %v361_v6, %v360_v14  ;;  %v368_v26 = vshll.u32 %v300_v10, 16  ;;  %v5695_v27 = vcombine.low %v463_v23, %v463_v23  ;;  %v5696_v28 = vcombine.high %v463_v23, %v463_v23  ;;  %v290_v4 = vld [vmem:[%s7787_s6 + $0x70] sm:$0xff] }
  0x88   : > { %604 = vst [vmem:[#allocation2 + $0x28] sm:$0xf] %v5693_v17  ;;  %605 = vst [vmem:[#allocation2 + $0x2c] sm:$0x1] %v5694_v18  ;;  %v367_v29 = vrot.slane %v365_v19, 7  ;;  %v372_v31 = vshrl.u32 %v7841_v11, 16  ;;  %v303_v38 = vpack.c.bf16 %v287_v20, %v287_v20  ;;  %v304_v44 = vpack.c.bf16 %v288_v21, %v288_v21 }
  0x89   : > { %6354 = vmatpush3.bf16.msra.mxu0 %v7253_v52  ;;  %v7853_v32 = vld [vmem:[#allocation2 + $0x8] sm:$0xf]  ;;  %v7855_v33 = vld [vmem:[#allocation2 + $0x10] sm:$0xf]  ;;  %v445_v34 = vsel %vm7807_vm4, 0, %v356_v24  ;;  %v446_v35 = vsel %vm7807_vm4, 0, %v363_v25  ;;  %v7877_v60 = vpack.c.bf16 %v289_v43, %v289_v43 }
  0x8a   : > { %6355 = vmatprep.subr.bf16.mxu0 %v7254_v7  ;;  %v7861_v39 = vld [vmem:[#allocation2 + $0x18] sm:$0xf]  ;;  %v5717_v40 = vcombine.low %v7853_v32, %v7855_v33  ;;  %606 = vst [vmem:[#allocation2 + $0x30] sm:$0xf] %v5695_v27  ;;  %607 = vst [vmem:[#allocation2 + $0x34] sm:$0x1] %v5696_v28  ;;  %v370_v52 = vor.u32 %v368_v26, %v367_v29  ;;  %v306_v28 = vpack.c.bf16 %v290_v4, %v290_v4 }
  0x8b   : > { %v464_v41 = vsel %vm7815_vm5, %v445_v34, 0  ;;  %v465_v42 = vsel %vm7815_vm5, %v446_v35, 0  ;;  %v7870_v45 = vld [vmem:[#allocation2 + $0x20] sm:$0xf]  ;;  %v374_v53 = vrot.slane %v372_v31, 7  ;;  %v375_v54 = vshll.u32 %v7841_v11, 16 }
  0x8c   : > { %v5697_v46 = vcombine.low %v464_v41, %v464_v41  ;;  %v5698_v47 = vcombine.high %v464_v41, %v464_v41  ;;  %v5699_v48 = vcombine.low %v465_v42, %v465_v42  ;;  %6357 = vmatprep.mubr.bf16.mxu0 %v5717_v40  ;;  %v5718_v49 = vcombine.low %v7861_v39, %v7870_v45  ;;  %v7263_v19 = vld [vmem:[#allocation7 + $0x18] sm:$0xff]  }
  0x8d   : > { %6356 = vmatpush3.bf16.msra.mxu0 %v7254_v7  ;;  %v5700_v51 = vcombine.high %v465_v42, %v465_v42  ;;  %v379_v55 = vshrl.u32 %v302_v37, 16  ;;  %v382_v56 = vshll.u32 %v302_v37, 16  ;;  %v386_v57 = vshrl.u32 %v303_v38, 16 }
  0x8e   : > { %6373 = vmatprep.subr.bf16.mxu0 %v7258_v22  ;;  %608 = vst [vmem:[#allocation2 + $0x38] sm:$0xf] %v5697_v46  ;;  %610 = vst [vmem:[#allocation2 + $0x40] sm:$0xf] %v5699_v48  ;;  %v447_v58 = vsel %vm7807_vm4, 0, %v370_v52  ;;  %v389_v59 = vshll.u32 %v303_v38, 16  ;;  %v377_v0 = vor.u32 %v375_v54, %v374_v53  ;;  %v307_v29 = vpack.c.bf16 %v291_v5, %v291_v5 }
  0x8f   : > { %609 = vst [vmem:[#allocation2 + $0x3c] sm:$0x1] %v5698_v47  ;;  %611 = vst [vmem:[#allocation2 + $0x44] sm:$0x1] %v5700_v51  ;;  %v393_v61 = vshrl.u32 %v304_v44, 16  ;;  %v466_v1 = vsel %vm7815_vm5, %v447_v58, 0 }
  0x90   : > { %6358 = vmatmul.mubr.bf16.vlgmr.msra.gmra.mrb[0].mxu0 %v5718_v49  ;;  %v7879_v62 = vld [vmem:[#allocation2 + $0x28] sm:$0xf]  ;;  %v381_v2 = vrot.slane %v379_v55, 7  ;;  %v388_v3 = vrot.slane %v386_v57, 7  ;;  %v5701_v6 = vcombine.low %v466_v1, %v466_v1  ;;  %v5702_v7 = vcombine.high %v466_v1, %v466_v1  ;;  %v7266_v53 = vld [vmem:[#allocation7 + $0x20] sm:$0xff]  }
  0x91   : > { %6374 = vmatpush3.bf16.msra.mxu0 %v7258_v22  ;;  %v395_v8 = vrot.slane %v393_v61, 7  ;;  %v396_v9 = vshll.u32 %v304_v44, 16  ;;  %v7885_v10 = vld [vmem:[#allocation2 + $0x30] sm:$0xf]  ;;  %v448_v11 = vsel %vm7807_vm4, 0, %v377_v0  ;;  %v400_v14 = vshrl.u32 %v7877_v60, 16 }
  0x92   : > { %6375 = vmatprep.subr.bf16.mxu0 %v7259_v50  ;;  %v384_v12 = vor.u32 %v382_v56, %v381_v2  ;;  %v391_v13 = vor.u32 %v389_v59, %v388_v3  ;;  %v5719_v15 = vcombine.low %v7879_v62, %v7885_v10  ;;  %v467_v16 = vsel %vm7815_vm5, %v448_v11, 0  ;;  %612 = vst [vmem:[#allocation2 + $0x58] sm:$0xf] %v5701_v6 }
  0x93   : > { %613 = vst [vmem:[#allocation2 + $0x5c] sm:$0x1] %v5702_v7  ;;  %v398_v17 = vor.u32 %v396_v9, %v395_v8  ;;  %v403_v18 = vshll.u32 %v7877_v60, 16  ;;  %v5703_v20 = vcombine.low %v467_v16, %v467_v16  ;;  %v5704_v21 = vcombine.high %v467_v16, %v467_v16  ;;  %v7267_v60 = vld [vmem:[#allocation7 + $0x28] sm:$0xff]  }
  0x94   : > { %v449_v22 = vsel %vm7807_vm4, 0, %v384_v12  ;;  %v450_v23 = vsel %vm7807_vm4, 0, %v391_v13  ;;  %6361 = vmatprep.mubr.bf16.mxu0 %v5719_v15  ;;  %v402_v40 = vrot.slane %v400_v14, 7  ;;  %v407_v42 = vshrl.u32 %v306_v28, 16  ;;  %v7270_v13 = vld [vmem:[#allocation7 + $0x30] sm:$0xff]  }
  0x95   : > { %6376 = vmatpush3.bf16.msra.mxu0 %v7259_v50  ;;  %v7899_v24 = vld [vmem:[#allocation2 + $0x38] sm:$0xf]  ;;  %v7901_v25 = vld [vmem:[#allocation2 + $0x40] sm:$0xf]  ;;  %v468_v26 = vsel %vm7815_vm5, %v449_v22, 0  ;;  %v469_v27 = vsel %vm7815_vm5, %v450_v23, 0 }
  0x96   : > { %v5720_v31 = vcombine.low %v7899_v24, %v7901_v25  ;;  %6377 = vmatprep.subr.bf16.mxu0 %v7262_v63  ;;  %614 = vst [vmem:[#allocation2 + $0x60] sm:$0xf] %v5703_v20  ;;  %615 = vst [vmem:[#allocation2 + $0x64] sm:$0x1] %v5704_v21  ;;  %v5705_v34 = vcombine.low %v468_v26, %v468_v26  ;;  %v5706_v35 = vcombine.high %v468_v26, %v468_v26  ;;  %v628_v15 = vld [vmem:[#allocation2] sm:$0xf] }
  0x97   : > { %v5707_v37 = vcombine.low %v469_v27, %v469_v27  ;;  %v5708_v38 = vcombine.high %v469_v27, %v469_v27  ;;  %v451_v41 = vsel %vm7807_vm4, 0, %v398_v17  ;;  %v410_v44 = vshll.u32 %v306_v28, 16  ;;  %v7271_v17 = vld [vmem:[#allocation7 + $0x38] sm:$0xff]   ;;  %v1225_v20 = vld [vmem:[#allocation2] sm:$0xf] }
  0x98   : > { %6362 = vmatmul.mubr.bf16.gmra.mrb[4].mxu0 %v5720_v31  ;;  %616 = vst [vmem:[#allocation2 + $0x68] sm:$0xf] %v5705_v34  ;;  %617 = vst [vmem:[#allocation2 + $0x6c] sm:$0x1] %v5706_v35  ;;  %v470_v43 = vsel %vm7815_vm5, %v451_v41, 0  ;;  %v414_v46 = vshrl.u32 %v307_v29, 16  ;;  %v405_v48 = vor.u32 %v403_v18, %v402_v40  ;;  %v5733_v21 = vcombine.low %v628_v15, %v7853_v32 }
  0x99   : > { %618 = vst [vmem:[#allocation2 + $0x70] sm:$0xf] %v5707_v37  ;;  %v417_v47 = vshll.u32 %v307_v29, 16  ;;  %6378 = vmatpush3.bf16.msra.mxu0 %v7262_v63  ;;  %619 = vst [vmem:[#allocation2 + $0x74] sm:$0x1] %v5708_v38  ;;  %v5709_v49 = vcombine.low %v470_v43, %v470_v43  ;;  %v5710_v50 = vcombine.high %v470_v43, %v470_v43  ;;  %v409_v51 = vrot.slane %v407_v42, 7 }
  0x9a   : > { %6379 = vmatprep.subr.bf16.mxu0 %v7263_v19  ;;  %v7913_v52 = vld [vmem:[#allocation2 + $0x58] sm:$0xf]  ;;  %v416_v54 = vrot.slane %v414_v46, 7  ;;  %v452_v55 = vsel %vm7807_vm4, 0, %v405_v48  ;;  %v1227_v23 = vld [vmem:[#allocation2 + $0x8] sm:$0xf]  ;;  %v7956_v41 = vcombine.low %v7855_v33, %v7861_v39 }
  0x9b   : > { %620 = vst [vmem:[#allocation2 + $0x78] sm:$0xf] %v5709_v49  ;;  %621 = vst [vmem:[#allocation2 + $0x7c] sm:$0x1] %v5710_v50  ;;  %v412_v56 = vor.u32 %v410_v44, %v409_v51  ;;  %v471_v57 = vsel %vm7815_vm5, %v452_v55, 0  ;;  %v7272_v27 = vld [vmem:[#allocation7 + $0x180] sm:$0xff]  }
  0x9c   : > { %v419_v58 = vor.u32 %v417_v47, %v416_v54  ;;  %v5711_v61 = vcombine.low %v471_v57, %v471_v57  ;;  %v5712_v63 = vcombine.high %v471_v57, %v471_v57  ;;  %v1269_v28 = vshrl.u32 %v1225_v20, 16  ;;  %v7950_v34 = vld [vmem:[#allocation2 + $0x4] sm:$0x1]  ;;  %v1229_v32 = vld [vmem:[#allocation2 + $0x10] sm:$0xf]  ;;  %v7273_v42 = vld [vmem:[#allocation7 + $0x188] sm:$0xff]  }
  0x9d   : > { %6380 = vmatpush3.bf16.msra.mxu0 %v7263_v19  ;;  %v7919_v59 = vld [vmem:[#allocation2 + $0x60] sm:$0xf]  ;;  %v453_v0 = vsel %vm7807_vm4, 0, %v412_v56  ;;  %v1272_v29 = vshll.u32 %v1225_v20, 16  ;;  %v1283_v31 = vshrl.u32 %v1227_v23, 16  ;;  %v1286_v35 = vshll.u32 %v1227_v23, 16 }
  0x9e   : > { %v5721_v1 = vcombine.low %v7913_v52, %v7919_v59  ;;  %6381 = vmatprep.subr.bf16.mxu0 %v7266_v53  ;;  %v454_v2 = vsel %vm7807_vm4, 0, %v419_v58  ;;  %v472_v3 = vsel %vm7815_vm5, %v453_v0, 0  ;;  %622 = vst [vmem:[#allocation2 + $0x80] sm:$0xf] %v5711_v61  ;;  %623 = vst [vmem:[#allocation2 + $0x84] sm:$0x1] %v5712_v63  ;;  %v7961_v47 = vcombine.low %v7870_v45, %v7879_v62 }
  0x9f   : > { %v7929_v4 = vld [vmem:[#allocation2 + $0x68] sm:$0xf]  ;;  %v473_v6 = vsel %vm7815_vm5, %v454_v2, 0  ;;  %v5713_v7 = vcombine.low %v472_v3, %v472_v3  ;;  %v5714_v8 = vcombine.high %v472_v3, %v472_v3  ;;  %v7952_v37 = vld [vmem:[#allocation2 + $0xc] sm:$0x1]  ;;  %v1271_v38 = vrot.slane %v1269_v28, 4 }
  0xa0   : > { %v7931_v5 = vld [vmem:[#allocation2 + $0x70] sm:$0xf]  ;;  %6365 = vmatprep.mubr.bf16.mxu0 %v5721_v1  ;;  %v5715_v11 = vcombine.low %v473_v6, %v473_v6  ;;  %v5716_v12 = vcombine.high %v473_v6, %v473_v6  ;;  %v1274_v40 = vrot.slane %v1272_v29, 5  ;;  %v1278_v43 = vshll.u32 %v7950_v34, 16  ;;  %v1231_v49 = vld [vmem:[#allocation2 + $0x18] sm:$0xf] }
  0xa1   : > { %v5722_v9 = vcombine.low %v7929_v4, %v7931_v5  ;;  %6382 = vmatpush3.bf16.msra.mxu0 %v7266_v53  ;;  %624 = vst [vmem:[#allocation2 + $0x88] sm:$0xf] %v5713_v7  ;;  %625 = vst [vmem:[#allocation2 + $0x8c] sm:$0x1] %v5714_v8  ;;  %v1285_v44 = vrot.slane %v1283_v31, 4  ;;  %v1297_v46 = vshrl.u32 %v1229_v32, 16 }
  0xa2   : > { %6383 = vmatprep.subr.bf16.mxu0 %v7267_v60  ;;  %626 = vst [vmem:[#allocation2 + $0x90] sm:$0xf] %v5715_v11  ;;  %627 = vst [vmem:[#allocation2 + $0x94] sm:$0x1] %v5716_v12  ;;  %v7937_v14 = vld [vmem:[#allocation2 + $0x78] sm:$0xf]  ;;  %v1275_v53 = vor.u32 %v1274_v40, %v1271_v38  ;;  %v7980_v12 = vcombine.low %v7885_v10, %v7899_v24 }
  0xa3   : > { %6366 = vmatmul.mubr.bf16.gmra.mrb[8].mxu0 %v5722_v9  ;;  %v1288_v48 = vrot.slane %v1286_v35, 5  ;;  %v1300_v50 = vshll.u32 %v1229_v32, 16  ;;  %v1233_v51 = vld [vmem:[#allocation2 + $0x20] sm:$0xf]  ;;  %v1292_v54 = vshll.u32 %v7952_v37, 16  ;;  %v1311_v56 = vshrl.u32 %v1231_v49, 16 }
  0xa4   : > { %v1235_v55 = vld [vmem:[#allocation2 + $0x28] sm:$0xf]  ;;  %v7965_v33 = vld [vmem:[#allocation2 + $0x14] sm:$0x1]  ;;  %v7967_v39 = vld [vmem:[#allocation2 + $0x1c] sm:$0x1] }
  0xa5   : > { %6384 = vmatpush3.bf16.msra.mxu0 %v7267_v60  ;;  %v7939_v16 = vld [vmem:[#allocation2 + $0x80] sm:$0xf]  ;;  %v1314_v57 = vshll.u32 %v1231_v49, 16  ;;  %v1299_v45 = vrot.slane %v1297_v46, 4  ;;  %v1302_v62 = vrot.slane %v1300_v50, 5  ;;  %v1325_v58 = vshrl.u32 %v1233_v51, 16 }
  0xa6   : > { %6385 = vmatprep.subr.bf16.mxu0 %v7270_v13  ;;  %v5723_v18 = vcombine.low %v7937_v14, %v7939_v16  ;;  %v1328_v60 = vshll.u32 %v1233_v51, 16  ;;  %v7274_v61 = vld [vmem:[#allocation7 + $0x190] sm:$0xff]   ;;  %v7970_v0 = vrot.slane %v1278_v43, 5  ;;  %v1289_v1 = vor.u32 %v1288_v48, %v1285_v44  ;;  %v7984_v20 = vld [vmem:[#allocation2 + $0x2c] sm:$0x1] }
  0xa7   : > { %v638_v63 = vld [vmem:[#allocation2 + $0x50] sm:$0xf]  ;;  %v1339_v2 = vshrl.u32 %v1235_v55, 16  ;;  %v1342_v3 = vshll.u32 %v1235_v55, 16  ;;  %v7972_v6 = vrot.slane %v1275_v53, 4  ;;  %v7974_v7 = vrot.slane %v1292_v54, 5 }
  0xa8   : > { %v7943_v19 = vld [vmem:[#allocation2 + $0x88] sm:$0xf]  ;;  %6369 = vmatprep.mubr.bf16.mxu0 %v5723_v18  ;;  %v1306_v8 = vshll.u32 %v7965_v33, 16  ;;  %v1320_v9 = vshll.u32 %v7967_v39, 16  ;;  %v1237_v11 = vld [vmem:[#allocation2 + $0x30] sm:$0xf]  ;;  %v1303_v23 = vor.u32 %v1302_v62, %v1299_v45 }
  0xa9   : > { %v7946_v22 = vld [vmem:[#allocation2 + $0x90] sm:$0xf]  ;;  %6386 = vmatpush3.bf16.msra.mxu0 %v7270_v13  ;;  %v7275_v13 = vld [vmem:[#allocation7 + $0x198] sm:$0xff]   ;;  %v1313_v15 = vrot.slane %v1311_v56, 4  ;;  %v7982_v18 = vld [vmem:[#allocation2 + $0x24] sm:$0x1] }
  0xaa   : > { %v5724_v26 = vcombine.low %v7943_v19, %v7946_v22  ;;  %6387 = vmatprep.subr.bf16.mxu0 %v7271_v17  ;;  %v7987_v28 = vld [vmem:[#allocation2 + $0x34] sm:$0x1]  ;;  %v1239_v29 = vld [vmem:[#allocation2 + $0x38] sm:$0xf]  ;;  %v7989_v31 = vrot.slane %v1289_v1, 4  ;;  %v1341_v10 = vrot.slane %v1339_v2, 4  ;;  %v8014_v2 = vcombine.low %v7931_v5, %v7937_v14 }
  0xab   : > { %v1344_v24 = vrot.slane %v1342_v3, 5  ;;  %v1353_v35 = vshrl.u32 %v1237_v11, 16  ;;  %v1334_v32 = vshll.u32 %v7982_v18, 16  ;;  %v7992_v38 = vld [vmem:[#allocation2 + $0x3c] sm:$0x1]  ;;  %v1356_v40 = vshll.u32 %v1237_v11, 16 }
  0xac   : > { %6370 = vmatmul.mubr.bf16.gmra.mrb[12].mxu0 %v5724_v26  ;;  %v1327_v26 = vrot.slane %v1325_v58, 4  ;;  %v1367_v43 = vshrl.u32 %v1239_v29, 16  ;;  %v1370_v44 = vshll.u32 %v1239_v29, 16  ;;  %v1245_v46 = vld [vmem:[#allocation2 + $0x50] sm:$0xf]  ;;  %v7999_v48 = vrot.slane %v1303_v23, 4 }
  0xad   : > { %6388 = vmatpush3.bf16.msra.mxu0 %v7271_v17  ;;  %6389 = vmatprep.mubr.bf16.mxu0 %v5733_v21  ;;  %v1316_v17 = vrot.slane %v1314_v57, 5  ;;  %v5737_v21 = vcombine.low %v638_v63, %v7913_v52  ;;  %v7997_v52 = vcombine.low %v7919_v59, %v7929_v4  ;;  %v8001_v49 = vrot.slane %v1306_v8, 5  ;;  %v7276_v53 = vld [vmem:[#allocation7 + $0x1a0] sm:$0xff]   ;;  %v7277_v58 = vld [vmem:[#allocation7 + $0x1a8] sm:$0xff]   ;;  %v1247_v11 = vld [vmem:[#allocation2 + $0x58] sm:$0xf] }
  0xae   : > { %6405 = vmatprep.subr.bf16.mxu0 %v7272_v27  ;;  %v1348_v51 = vshll.u32 %v7984_v20, 16  ;;  %v8004_v54 = vrot.slane %v1320_v9, 5  ;;  %v1345_v55 = vor.u32 %v1344_v24, %v1341_v10  ;;  %v1355_v59 = vrot.slane %v1353_v35, 4  ;;  %v8020_v9 = vld [vmem:[#allocation2 + $0x54] sm:$0x1] }
  0xaf   : > { %v1362_v4 = vshll.u32 %v7987_v28, 16  ;;  %v1358_v56 = vrot.slane %v1356_v40, 5  ;;  %v1376_v57 = vshll.u32 %v7992_v38, 16  ;;  %v1381_v45 = vshrl.u32 %v1245_v46, 16  ;;  %v7278_v14 = vld [vmem:[#allocation7 + $0x1b0] sm:$0xff]  }
  0xb0   : > { %v1384_v62 = vshll.u32 %v1245_v46, 16  ;;  %v1369_v63 = vrot.slane %v1367_v43, 4  ;;  %v1372_v1 = vrot.slane %v1370_v44, 5  ;;  %v8018_v8 = vrot.slane %v1348_v51, 5  ;;  %v1249_v24 = vld [vmem:[#allocation2 + $0x60] sm:$0xf] }
  0xb1   : > { %v1359_v23 = vor.u32 %v1358_v56, %v1355_v59  ;;  %v1390_v29 = vshll.u32 %v8020_v9, 16  ;;  %v1395_v10 = vshrl.u32 %v1247_v11, 16  ;;  %v1398_v35 = vshll.u32 %v1247_v11, 16  ;;  %v8034_v40 = vld [vmem:[#allocation2 + $0x64] sm:$0x1]  ;;  %v7279_v51 = vld [vmem:[#allocation7 + $0x1b8] sm:$0xff]  }
  0xb2   : > { %v1386_v5 = vrot.slane %v1384_v62, 5  ;;  %v8038_v43 = vcombine.low %v7939_v16, %v7943_v19  ;;  %v1253_v16 = vld [vmem:[#allocation2 + $0x70] sm:$0xf]  ;;  %v7280_v11 = vld [vmem:[#allocation7 + $0x40] sm:$0xff]   ;;  %vm1265_vm6 = vsmask.f32 3328 }
  0xb3   : > { %v8040_v44 = vrot.slane %v1359_v23, 4  ;;  %v1397_v59 = vrot.slane %v1395_v10, 4  ;;  %v1400_v56 = vrot.slane %v1398_v35, 5  ;;  %v8057_v10 = vld [vmem:[#allocation2 + $0x74] sm:$0x1]  ;;  %vm2190_vm8 = vcmask 1042432  }
  0xb4   : > { %6390 = vmatmul.mubr.bf16.vlgmr.msra.gmra.mrb[0].mxu0 %v7956_v41  ;;  %v8059_v35 = vld [vmem:[#allocation2 + $0x7c] sm:$0x1]  ;;  %vm1266_vm7 = vsmask.f32 7440  ;;  %v8063_v30 = vld [vmem:[#allocation2 + $0x84] sm:$0x1] }
  0xb5   : > { %6406 = vmatpush3.bf16.msra.mxu0 %v7272_v27  ;;  %6393 = vmatprep.mubr.bf16.mxu0 %v7961_v47  ;;  %v1330_v27 = vrot.slane %v1328_v60, 5  ;;  %vm2191_vm9 = vcmask 1046532   ;;  %vm8103_vm11 = vmor %vm1265_vm6, %vm1266_vm7 }
  0xb6   : > { %6407 = vmatprep.subr.bf16.mxu0 %v7273_v42  ;;  %vm8094_vm10 = vmor %vm2190_vm8, %vm2191_vm9 }
  0xb7   : > { %v1331_v50 = vor.u32 %v1330_v27, %v1327_v26  ;;  %v1383_v26 = vrot.slane %v1381_v45, 4  ;;  %v1373_v27 = vor.u32 %v1372_v1, %v1369_v63  ;;  %v1418_v45 = vshll.u32 %v8034_v40, 16  ;;  %v8051_v63 = vld [vmem:[#allocation2 + $0x6c] sm:$0x1] }
  0xb9   : > { %6408 = vmatpush3.bf16.msra.mxu0 %v7273_v42  ;;  %v1317_v42 = vor.u32 %v1316_v17, %v1313_v15  ;;  %v8016_v3 = vrot.slane %v1331_v50, 4  ;;  %v8022_v15 = vrot.slane %v1345_v55, 4  ;;  %v8024_v17 = vrot.slane %v1362_v4, 5 }
  0xba   : > { %6409 = vmatprep.subr.bf16.mxu0 %v7274_v61  ;;  %v1387_v46 = vor.u32 %v1386_v5, %v1383_v26  ;;  %v1409_v50 = vshrl.u32 %v1249_v24, 16  ;;  %v8042_v55 = vrot.slane %v1373_v27, 4  ;;  %v1412_v4 = vshll.u32 %v1249_v24, 16  ;;  %v1255_v24 = vld [vmem:[#allocation2 + $0x78] sm:$0xf] }
  0xbb   : > { %v8008_v60 = vrot.slane %v1317_v42, 4  ;;  %v1251_v42 = vld [vmem:[#allocation2 + $0x68] sm:$0xf]  ;;  %v1437_v27 = vshrl.u32 %v1253_v16, 16 }
  0xbc   : > { %6394 = vmatmul.mubr.bf16.gmra.mrb[4].mxu0 %v7980_v12  ;;  %v1423_v62 = vshrl.u32 %v1251_v42, 16  ;;  %v8049_v19 = vrot.slane %v1387_v46, 4  ;;  %v1411_v1 = vrot.slane %v1409_v50, 4  ;;  %v1414_v23 = vrot.slane %v1412_v4, 5  ;;  %v1257_v4 = vld [vmem:[#allocation2 + $0x80] sm:$0xf] }
  0xbd   : > { %6410 = vmatpush3.bf16.msra.mxu0 %v7274_v61  ;;  %6397 = vmatprep.mubr.bf16.mxu0 %v5737_v21  ;;  %v8010_v61 = vrot.slane %v1334_v32, 5  ;;  %v8026_v21 = vld [vmem:[#allocation2 + $0x5c] sm:$0x1]  ;;  %v1426_v26 = vshll.u32 %v1251_v42, 16  ;;  %v1432_v50 = vshll.u32 %v8051_v63, 16  ;;  %v1439_v42 = vrot.slane %v1437_v27, 4 }
  0xbe   : > { %6411 = vmatprep.subr.bf16.mxu0 %v7275_v13  ;;  %v1404_v32 = vshll.u32 %v8026_v21, 16  ;;  %9164 = vst [vmem:[#allocation18_spill] sm:$0xff] %v8049_v19  ;;  %v1425_v5 = vrot.slane %v1423_v62, 4  ;;  %v1451_v62 = vshrl.u32 %v1255_v24, 16  ;;  %v1415_v36 = vor.u32 %v1414_v23, %v1411_v1 }
  0xbf   : > { %v1428_v46 = vrot.slane %v1426_v26, 5  ;;  %v7282_v26 = vld [vmem:[#allocation7 + $0x50] sm:$0xff]   ;;  %v1460_v27 = vshll.u32 %v8059_v35, 16  ;;  %v1465_v19 = vshrl.u32 %v1257_v4, 16 }
  0xc1   : > { %6412 = vmatpush3.bf16.msra.mxu0 %v7275_v13  ;;  %v8028_v13 = vrot.slane %v1376_v57, 5  ;;  %v8046_v57 = vrot.slane %v1404_v32, 5  ;;  %v7281_v32 = vld [vmem:[#allocation7 + $0x48] sm:$0xff]  }
  0xc2   : > { %6413 = vmatprep.subr.bf16.mxu0 %v7276_v53 }
  0xc3   : > { %9163 = vst [vmem:[#allocation17_spill] sm:$0xff] %v8046_v57  ;;  %v1429_v57 = vor.u32 %v1428_v46, %v1425_v5  ;;  %v8077_v5 = vrot.slane %v1432_v50, 5  ;;  %v1453_v46 = vrot.slane %v1451_v62, 4  ;;  %v2195_v62 = vrot.slane %v7950_v34, 5  ;;  %v7284_v34 = vld [vmem:[#allocation7 + $0x60] sm:$0xff]  }
  0xc4   : > { %6398 = vmatmul.mubr.bf16.gmra.mrb[8].mxu0 %v7997_v52 }
  0xc5   : > { %6414 = vmatpush3.bf16.msra.mxu0 %v7276_v53  ;;  %6401 = vmatprep.mubr.bf16.mxu0 %v8014_v2  ;;  %v8044_v53 = vrot.slane %v1390_v29, 5  ;;  %v1440_v29 = vshll.u32 %v1253_v16, 16  ;;  %v1401_v16 = vor.u32 %v1400_v56, %v1397_v59  ;;  %v1474_v56 = vshll.u32 %v8063_v30, 16 }
  0xc6   : > { %6415 = vmatprep.subr.bf16.mxu0 %v7277_v58 }
  0xc7   : > { %9162 = vst [vmem:[#allocation16_spill] sm:$0xff] %v8044_v53  ;;  %v1468_v53 = vshll.u32 %v1257_v4, 16  ;;  %v8073_v23 = vrot.slane %v1401_v16, 4  ;;  %v8089_v16 = vrot.slane %v1474_v56, 5  ;;  %v2199_v56 = vrot.slane %v7952_v37, 5 }
  0xc8   : > { %v2207_v37 = vrot.slane %v7967_v39, 5  ;;  %v2143_v39 = vld [vmem:[#allocation2 + $0x28] sm:$0xe] }
  0xc9   : > { %6416 = vmatpush3.bf16.msra.mxu0 %v7277_v58  ;;  %v8055_v58 = vrot.slane %v1418_v45, 5  ;;  %v1446_v45 = vshll.u32 %v8057_v10, 16  ;;  %9167 = vst [vmem:[#allocation21_spill] sm:$0xff] %v8089_v16  ;;  %v2203_v16 = vrot.slane %v7965_v33, 5 }
  0xca   : > { %6417 = vmatprep.subr.bf16.mxu0 %v7278_v14 }
  0xcb   : > { %9165 = vst [vmem:[#allocation19_spill] sm:$0xff] %v8055_v58  ;;  %v8065_v58 = vld [vmem:[#allocation2 + $0x88] sm:$0xf] }
  0xcc   : > { %6402 = vmatmul.mubr.bf16.gmra.mrb[12].mxu0 %v8038_v43  ;;  %v1479_v1 = vshrl.u32 %v8065_v58, 16 }
  0xcd   : > { %6418 = vmatpush3.bf16.msra.mxu0 %v7278_v14  ;;  %6421 = vmatprep.mubr.bf16.mxu0 %v7956_v41  ;;  %v637_v14 = vld [vmem:[#allocation2 + $0x48] sm:$0xf]  ;;  %v1442_v41 = vrot.slane %v1440_v29, 5 }
  0xce   : > { %6419 = vmatprep.subr.bf16.mxu0 %v7279_v51  ;;  %v5749_v59 = vcombine.low %v7901_v25, %v637_v14  ;;  %v8087_v14 = vld [vmem:[#allocation2 + $0x8c] sm:$0x1]  ;;  %v8091_v50 = vrot.slane %v1479_v1, 4 }
  0xcf   : > { %v1443_v29 = vor.u32 %v1442_v41, %v1439_v42  ;;  %v8083_v42 = vrot.slane %v1460_v27, 5  ;;  %v1467_v41 = vrot.slane %v1465_v19, 4 }
  0xd1   : > { %6420 = vmatpush3.bf16.msra.mxu0 %v7279_v51  ;;  %v1454_v51 = vshll.u32 %v1255_v24, 16  ;;  %v8079_v24 = vrot.slane %v1446_v45, 5  ;;  %9166 = vst [vmem:[#allocation20_spill] sm:$0xff] %v8083_v42  ;;  %v8085_v25 = vrot.slane %v1443_v29, 4  ;;  %v2138_v45 = vld [vmem:[#allocation2] sm:$0xe] }
  0xd2   : > { %6437 = vmatprep.subr.bf16.mxu0 %v7280_v11  ;;  %v5801_v27 = vrot.slane %v2138_v45, 9  ;;  %v2140_v29 = vld [vmem:[#allocation2 + $0x10] sm:$0xe] }
  0xd3   : > { %v1456_v4 = vrot.slane %v1454_v51, 5  ;;  %v5803_v1 = vrot.slane %v2140_v29, 9  ;;  %v7285_v29 = vld [vmem:[#allocation7 + $0x68] sm:$0xff]  }
  0xd4   : > { %6422 = vmatmul.mubr.bf16.vlgmr.msra.gmra.mrb[0].mxu0 %v7961_v47  ;;  %v8075_v47 = vrot.slane %v1415_v36, 4  ;;  %v1470_v36 = vrot.slane %v1468_v53, 5  ;;  %v2141_v53 = vld [vmem:[#allocation2 + $0x18] sm:$0xe] }
  0xd5   : > { %6438 = vmatpush3.bf16.msra.mxu0 %v7280_v11  ;;  %6425 = vmatprep.mubr.bf16.mxu0 %v7980_v12  ;;  %v7283_v11 = vld [vmem:[#allocation7 + $0x58] sm:$0xff]   ;;  %v8081_v12 = vrot.slane %v1429_v57, 4  ;;  %v2139_v57 = vld [vmem:[#allocation2 + $0x8] sm:$0xe]  ;;  %v1457_v51 = vor.u32 %v1456_v4, %v1453_v46  ;;  %v5804_v42 = vrot.slane %v2141_v53, 9  ;;  %v1482_v46 = vshll.u32 %v8065_v58, 16 }
  0xd6   : > { %6439 = vmatprep.subr.bf16.mxu0 %v7281_v32  ;;  %v5802_v19 = vrot.slane %v2139_v57, 9  ;;  %v1471_v33 = vor.u32 %v1470_v36, %v1467_v41  ;;  %v8120_v45 = vsel %vm8094_vm10, %v5803_v1, %v2203_v16  ;;  %v2142_v57 = vld [vmem:[#allocation2 + $0x20] sm:$0xe]  ;;  %v2144_v36 = vld [vmem:[#allocation2 + $0x30] sm:$0xe]  ;;  %v1281_v16 = vsel %vm8103_vm11, %v7972_v6, %v7970_v0 }
  0xd7   : > { %v8122_v53 = vrot.slane %v1457_v51, 4  ;;  %v5805_v41 = vrot.slane %v2142_v57, 9  ;;  %v5807_v1 = vrot.slane %v2144_v36, 9  ;;  %v647_v57 = vld [vmem:[#allocation2 + $0x98] sm:$0xf]  ;;  %v8145_v0 = vsel %vm8103_vm11, %v7989_v31, %v7974_v7 }
  0xd8   : > { %v8116_v4 = vsel %vm8094_vm10, %v5802_v19, %v2199_v56  ;;  %v5806_v19 = vrot.slane %v2143_v39, 9  ;;  %v2145_v56 = vld [vmem:[#allocation2 + $0x38] sm:$0xe]  ;;  %v8147_v6 = vrot.slane %v1471_v33, 4  ;;  %v2223_v39 = vrot.slane %v7992_v38, 5 }
  0xd9   : > { %6440 = vmatpush3.bf16.msra.mxu0 %v7281_v32  ;;  %v2148_v31 = vld [vmem:[#allocation2 + $0x50] sm:$0xe]  ;;  %v2149_v33 = vld [vmem:[#allocation2 + $0x58] sm:$0xe]  ;;  %v8254_v58 = vsel %vm8103_vm11, %v8022_v15, %v8018_v8  ;;  %v9172_v8 = vshll.u32 %v8087_v14, 16 }
  0xda   : > { %6441 = vmatprep.subr.bf16.mxu0 %v7282_v26  ;;  %v5809_v36 = vrot.slane %v2148_v31, 9  ;;  %v5750_v31 = vcombine.low %v7946_v22, %v647_v57  ;;  %v2154_v57 = vld [vmem:[#allocation2 + $0x80] sm:$0xe]  ;;  %v3857_v32 = vld [vmem:[#allocation3 + $0x50] sm:$0xf] }
  0xdb   : > { %v1490_v15 = vrot.slane %v9172_v8, 5 }
  0xdc   : > { %6426 = vmatmul.mubr.bf16.gmra.mrb[4].mxu0 %v5749_v59  ;;  %v7404_v59 = vld [vmem:[#allocation9 + $0x150] sm:$0xff]  }
  0xdd   : > { %6442 = vmatpush3.bf16.msra.mxu0 %v7282_v26  ;;  %6429 = vmatprep.mubr.bf16.mxu0 %v7997_v52  ;;  %v8111_v52 = vsel %vm8094_vm10, %v5801_v27, %v2195_v62  ;;  %v8128_v62 = vsel %vm8094_vm10, %v5804_v42, %v2207_v37  ;;  %v2211_v27 = vrot.slane %v7982_v18, 5  ;;  %v2215_v42 = vrot.slane %v7984_v20, 5 }
  0xde   : > { %6443 = vmatprep.subr.bf16.mxu0 %v7283_v11  ;;  %v8136_v51 = vcombine.low %v8120_v45, %v8128_v62  ;;  %v2219_v37 = vrot.slane %v7987_v28, 5 }
  0xdf   : > { %v8151_v18 = vsel %vm8094_vm10, %v5805_v41, %v2211_v27  ;;  %v8157_v20 = vsel %vm8094_vm10, %v5806_v19, %v2215_v42  ;;  %v2227_v41 = vrot.slane %v8020_v9, 5  ;;  %v5810_v27 = vrot.slane %v2149_v33, 9  ;;  %v2150_v19 = vld [vmem:[#allocation2 + $0x60] sm:$0xe]  ;;  %v7286_v42 = vld [vmem:[#allocation7 + $0x70] sm:$0xff]  }
  0xe0   : > { %v8163_v7 = vsel %vm8094_vm10, %v5807_v1, %v2219_v37  ;;  %v8169_v38 = vcombine.low %v8151_v18, %v8157_v20  ;;  %v2235_v1 = vrot.slane %v8034_v40, 5  ;;  %v5759_v33 = vcombine.low %v1281_v16, %v8145_v0  ;;  %v2152_v40 = vld [vmem:[#allocation2 + $0x70] sm:$0xe] }
  0xe1   : > { %6444 = vmatpush3.bf16.msra.mxu0 %v7283_v11  ;;  %v5808_v11 = vrot.slane %v2145_v56, 9  ;;  %v2151_v56 = vld [vmem:[#allocation2 + $0x68] sm:$0xe]  ;;  %v8183_v37 = vsel %vm8094_vm10, %v5809_v36, %v2227_v41  ;;  %v5813_v22 = vrot.slane %v2152_v40, 9  ;;  %v2243_v16 = vrot.slane %v8057_v10, 5  ;;  %v7295_v41 = vld [vmem:[#allocation7 + $0x138] sm:$0xff]  }
  0xe2   : > { %6445 = vmatprep.subr.bf16.mxu0 %v7284_v34  ;;  %v2155_v36 = vld [vmem:[#allocation2 + $0x88] sm:$0xe]  ;;  %v2255_v10 = vrot.slane %v8087_v14, 5  ;;  %v8218_v40 = vsel %vm8103_vm11, %v7999_v48, %v8001_v49 }
  0xe3   : > { %v5775_v26 = vcombine.low %v8145_v0, %v8218_v40 }
  0xe4   : > { %6430 = vmatmul.mubr.bf16.gmra.mrb[8].mxu0 %v8014_v2  ;;  %v8173_v2 = vsel %vm8094_vm10, %v5808_v11, %v2223_v39  ;;  %v5812_v11 = vrot.slane %v2151_v56, 9  ;;  %v2239_v39 = vrot.slane %v8051_v63, 5 }
  0xe5   : > { %6446 = vmatpush3.bf16.msra.mxu0 %v7284_v34  ;;  %6433 = vmatprep.mubr.bf16.mxu0 %v8038_v43  ;;  %v8177_v9 = vcombine.low %v8163_v7, %v8173_v2  ;;  %v2231_v43 = vrot.slane %v8026_v21, 5  ;;  %v5811_v34 = vrot.slane %v2150_v19, 9  ;;  %v2153_v19 = vld [vmem:[#allocation2 + $0x78] sm:$0xe] }
  0xe6   : > { %6447 = vmatprep.subr.bf16.mxu0 %v7285_v29  ;;  %v8200_v63 = vsel %vm8094_vm10, %v5812_v11, %v2239_v39  ;;  %v2251_v11 = vrot.slane %v8063_v30, 5  ;;  %v5816_v39 = vrot.slane %v2155_v36, 9  ;;  %v7288_v30 = vld [vmem:[#allocation7 + $0x100] sm:$0xff]   ;;  %v7290_v36 = vld [vmem:[#allocation7 + $0x110] sm:$0xff]  }
  0xe7   : > { %v8190_v28 = vsel %vm8094_vm10, %v5810_v27, %v2231_v43  ;;  %v8194_v21 = vsel %vm8094_vm10, %v5811_v34, %v2235_v1  ;;  %v7287_v27 = vld [vmem:[#allocation7 + $0x78] sm:$0xff]   ;;  %v5814_v43 = vrot.slane %v2153_v19, 9  ;;  %v5815_v34 = vrot.slane %v2154_v57, 9 }
  0xe8   : > { %v8205_v56 = vcombine.low %v8194_v21, %v8200_v63  ;;  %v8210_v1 = vsel %vm8094_vm10, %v5813_v22, %v2243_v16  ;;  %v1241_v22 = vld [vmem:[#allocation2 + $0x40] sm:$0xf]  ;;  %v1242_v16 = vld [vmem:[#allocation2 + $0x44] sm:$0x1] }
  0xe9   : > { %6448 = vmatpush3.bf16.msra.mxu0 %v7285_v29  ;;  %v2247_v29 = vrot.slane %v8059_v35, 5  ;;  %v8224_v35 = vsel %vm8103_vm11, %v8008_v60, %v8004_v54  ;;  %v8238_v49 = vsel %vm8094_vm10, %v5815_v34, %v2251_v11  ;;  %v8242_v54 = vsel %vm8094_vm10, %v5816_v39, %v2255_v10  ;;  %v9173_v34 = vld [vmem:[#allocation16_spill] sm:$0xff]  ;;  %v9174_v11 = vld [vmem:[#allocation18_spill] sm:$0xff]  ;;  %v9175_v10 = vld [vmem:[#allocation17_spill] sm:$0xff] }
  0xea   : > { %6449 = vmatprep.subr.bf16.mxu0 %v7286_v42  ;;  %v8248_v60 = vsel %vm8103_vm11, %v8016_v3, %v8010_v61  ;;  %v1703_v57 = vshrl.u32 %v1241_v22, 16  ;;  %v1706_v14 = vshll.u32 %v1241_v22, 16  ;;  %v1393_v39 = vsel %vm8103_vm11, %v9174_v11, %v9173_v34 }
  0xeb   : > { %v8228_v19 = vsel %vm8094_vm10, %v5814_v43, %v2247_v29  ;;  %v8266_v61 = vcombine.low %v8248_v60, %v8254_v58  ;;  %v8284_v43 = vsel %vm8103_vm11, %v8042_v55, %v8028_v13  ;;  %v1712_v29 = vshll.u32 %v1242_v16, 16  ;;  %v7291_v55 = vld [vmem:[#allocation7 + $0x118] sm:$0xff]  }
  0xec   : > { %6434 = vmatmul.mubr.bf16.gmra.mrb[12].mxu0 %v5750_v31  ;;  %v1484_v31 = vrot.slane %v1482_v46, 5  ;;  %v8234_v48 = vcombine.low %v8210_v1, %v8228_v19  ;;  %v8258_v46 = vcombine.low %v8238_v49, %v8242_v54  ;;  %v2473_v8 = vrot.slane %v1242_v16, 5 }
  0xed   : > { %6450 = vmatpush3.bf16.msra.mxu0 %v7286_v42  ;;  %6453 = vmatprep.mubr.bf16.mxu0 %v5759_v33  ;;  %v8262_v42 = vcombine.low %v8218_v40, %v8224_v35  ;;  %v7289_v33 = vld [vmem:[#allocation7 + $0x108] sm:$0xff]   ;;  %v1705_v11 = vrot.slane %v1703_v57, 4  ;;  %v1708_v16 = vrot.slane %v1706_v14, 5  ;;  %v1714_v14 = vrot.slane %v1712_v29, 5  ;;  %v1262_v29 = vld [vmem:[#allocation2 + $0x94] sm:$0x1] }
  0xee   : > { %6451 = vmatprep.subr.bf16.mxu0 %v7287_v27  ;;  %v1485_v3 = vor.u32 %v1484_v31, %v8091_v50  ;;  %v8321_v31 = vsel %vm8103_vm11, %v8081_v12, %v8077_v5  ;;  %v7293_v5 = vld [vmem:[#allocation7 + $0x128] sm:$0xff]   ;;  %v2477_v34 = vrot.slane %v1262_v29, 5  ;;  %v5776_v40 = vcombine.low %v8224_v35, %v8248_v60  ;;  %v7299_v35 = vld [vmem:[#allocation7 + $0x1d8] sm:$0xff]   ;;  %v7300_v60 = vld [vmem:[#allocation7 + $0x1e0] sm:$0xff]  }
  0xf0   : > { %v1486_v57 = vrot.slane %v1485_v3, 4  ;;  %v1261_v3 = vld [vmem:[#allocation2 + $0x90] sm:$0xf] }
  0xf1   : > { %6452 = vmatpush3.bf16.msra.mxu0 %v7287_v27  ;;  %v8278_v27 = vsel %vm8103_vm11, %v8040_v44, %v8024_v17  ;;  %v8294_v17 = vsel %vm8103_vm11, %v8073_v23, %v9175_v10  ;;  %v2146_v44 = vld [vmem:[#allocation2 + $0x40] sm:$0xe] }
  0xf2   : > { %6469 = vmatprep.subr.bf16.mxu0 %v7288_v30  ;;  %v8298_v13 = vcombine.low %v8278_v27, %v8284_v43  ;;  %v5763_v22 = vcombine.low %v1393_v39, %v8294_v17  ;;  %v9176_v39 = vld [vmem:[#allocation19_spill] sm:$0xff] }
  0xf3   : > { %v8315_v50 = vsel %vm8103_vm11, %v8075_v47, %v9176_v39  ;;  %v1717_v39 = vshrl.u32 %v1261_v3, 16 }
  0xf4   : > { %6454 = vmatmul.mubr.bf16.vlgmr.msra.gmra.mrb[0].mxu0 %v8262_v42 }
  0xf5   : > { %6470 = vmatpush3.bf16.msra.mxu0 %v7288_v30  ;;  %6457 = vmatprep.mubr.bf16.mxu0 %v8266_v61  ;;  %v5833_v30 = vrot.slane %v2146_v44, 9  ;;  %v9177_v44 = vld [vmem:[#allocation20_spill] sm:$0xff] }
  0xf6   : > { %6471 = vmatprep.subr.bf16.mxu0 %v7289_v33  ;;  %v8333_v47 = vsel %vm8103_vm11, %v8122_v53, %v9177_v44  ;;  %v7294_v53 = vld [vmem:[#allocation7 + $0x130] sm:$0xff]   ;;  %v1720_v44 = vshll.u32 %v1261_v3, 16  ;;  %v7297_v3 = vld [vmem:[#allocation7 + $0x1c8] sm:$0xff]  }
  0xf7   : > { %v8306_v23 = vsel %vm8094_vm10, %v5833_v30, %v2473_v8  ;;  %v8337_v30 = vcombine.low %v8315_v50, %v8321_v31  ;;  %v9178_v8 = vld [vmem:[#allocation21_spill] sm:$0xff] }
  0xf8   : > { %v1722_v0 = vrot.slane %v1720_v44, 5  ;;  %v7302_v44 = vld [vmem:[#allocation7 + $0x1f0] sm:$0xff]  }
  0xf9   : > { %6472 = vmatpush3.bf16.msra.mxu0 %v7289_v33  ;;  %v7292_v33 = vld [vmem:[#allocation7 + $0x120] sm:$0xff]  }
  0xfa   : > { %6473 = vmatprep.subr.bf16.mxu0 %v7290_v36 }
  0xfc   : > { %6458 = vmatmul.mubr.bf16.gmra.mrb[4].mxu0 %v8298_v13 }
  0xfd   : > { %6474 = vmatpush3.bf16.msra.mxu0 %v7290_v36  ;;  %6461 = vmatprep.mubr.bf16.mxu0 %v5763_v22  ;;  %v8327_v36 = vsel %vm8103_vm11, %v8085_v25, %v8079_v24  ;;  %v8355_v22 = vsel %vm8103_vm11, %v1486_v57, %v1490_v15  ;;  %v1709_v25 = vor.u32 %v1708_v16, %v1705_v11  ;;  %v2156_v24 = vld [vmem:[#allocation2 + $0x90] sm:$0xe]  ;;  %v1726_v16 = vshll.u32 %v1262_v29, 16 }
  0xfe   : > { %6475 = vmatprep.subr.bf16.mxu0 %v7291_v55  ;;  %v8341_v12 = vcombine.low %v8327_v36, %v8333_v47  ;;  %v5834_v10 = vrot.slane %v2156_v24, 9  ;;  %v7296_v24 = vld [vmem:[#allocation7 + $0x1c0] sm:$0xff]  }
  0xff   : > { %v1710_v11 = vrot.slane %v1709_v25, 4  ;;  %v1728_v29 = vrot.slane %v1726_v16, 5  ;;  %v7303_v16 = vld [vmem:[#allocation7 + $0x1f8] sm:$0xff]  }
 0x100   : > { %v8366_v15 = vsel %vm8094_vm10, %v5834_v10, %v2477_v34  ;;  %v5777_v34 = vcombine.low %v8254_v58, %v8278_v27  ;;  %v5780_v58 = vcombine.low %v8321_v31, %v8327_v36  ;;  %v7301_v27 = vld [vmem:[#allocation7 + $0x1e8] sm:$0xff]  }
 0x101   : > { %6476 = vmatpush3.bf16.msra.mxu0 %v7291_v55  ;;  %v1477_v55 = vsel %vm8103_vm11, %v8147_v6, %v9178_v8  ;;  %v5841_v6 = vcombine.low %v8228_v19, %v8238_v49  ;;  %v5842_v57 = vcombine.low %v8242_v54, %v8366_v15  ;;  %v1715_v25 = vsel %vm8103_vm11, %v1710_v11, %v1714_v14  ;;  %v1243_v14 = vld [vmem:[#allocation2 + $0x48] sm:$0xf]  ;;  %v2157_v49 = vld [vmem:[#allocation2 + $0x98] sm:$0xe] }
 0x102   : > { %6477 = vmatprep.subr.bf16.mxu0 %v7292_v33  ;;  %v5778_v8 = vcombine.low %v8284_v43, %v1715_v25 }
 0x104   : > { %6462 = vmatmul.mubr.bf16.gmra.mrb[8].mxu0 %v8337_v30 }
 0x105   : > { %6478 = vmatpush3.bf16.msra.mxu0 %v7292_v33  ;;  %6465 = vmatprep.mubr.bf16.mxu0 %v8341_v12  ;;  %v8358_v33 = vcombine.low %v1477_v55, %v8355_v22 }
 0x106   : > { %6479 = vmatprep.subr.bf16.mxu0 %v7293_v5 }
 0x109   : > { %6480 = vmatpush3.bf16.msra.mxu0 %v7293_v5  ;;  %v1719_v5 = vrot.slane %v1717_v39, 4  ;;  %v5781_v39 = vcombine.low %v8333_v47, %v1477_v55  ;;  %v7328_v47 = vld [vmem:[#allocation9 + $0xc0] sm:$0xff]  }
 0x10a   : > { %6481 = vmatprep.subr.bf16.mxu0 %v7294_v53  ;;  %6629 = vmatprep.subr.bf16.mxu1 %v7328_v47 }
 0x10b   : > { %v1723_v10 = vor.u32 %v1722_v0, %v1719_v5  ;;  %v7304_v0 = vld [vmem:[#allocation7 + $0x80] sm:$0xff]   ;;  %6630 = vmatpush3.bf16.msra.mxu1 %v7328_v47  ;;  %v7319_v47 = vld [vmem:[#allocation7 + $0x178] sm:$0xff]  }
 0x10c   : > { %6466 = vmatmul.mubr.bf16.gmra.mrb[12].mxu0 %v8358_v33 }
 0x10d   : > { %6482 = vmatpush3.bf16.msra.mxu0 %v7294_v53  ;;  %6485 = vmatprep.mubr.bf16.mxu0 %v5775_v26  ;;  %v7298_v26 = vld [vmem:[#allocation7 + $0x1d0] sm:$0xff]   ;;  %v1724_v53 = vrot.slane %v1723_v10, 4 }
 0x10e   : > { %6483 = vmatprep.subr.bf16.mxu0 %v7295_v41 }
 0x10f   : > { %v1729_v43 = vsel %vm8103_vm11, %v1724_v53, %v1728_v29  ;;  %v7306_v53 = vld [vmem:[#allocation7 + $0x90] sm:$0xff]  }
 0x110   : > { %v5782_v11 = vcombine.low %v8355_v22, %v1729_v43 }
 0x111   : > { %6484 = vmatpush3.bf16.msra.mxu0 %v7295_v41  ;;  %v5779_v41 = vcombine.low %v8294_v17, %v8315_v50  ;;  %v1927_v17 = vshrl.u32 %v1243_v14, 16  ;;  %v1930_v50 = vshll.u32 %v1243_v14, 16 }
 0x112   : > { %6501 = vmatprep.subr.bf16.mxu0 %v7296_v24 }
 0x113   : > { %v1929_v31 = vrot.slane %v1927_v17, 4  ;;  %v1932_v36 = vrot.slane %v1930_v50, 5  ;;  %v7311_v50 = vld [vmem:[#allocation7 + $0xb8] sm:$0xff]  }
 0x114   : > { %6486 = vmatmul.mubr.bf16.vlgmr.msra.gmra.mrb[0].mxu0 %v5776_v40 }
 0x115   : > { %6502 = vmatpush3.bf16.msra.mxu0 %v7296_v24  ;;  %6489 = vmatprep.mubr.bf16.mxu0 %v5777_v34  ;;  %v8386_v24 = vld [vmem:[#allocation2 + $0x4c] sm:$0x1]  ;;  %v1933_v55 = vor.u32 %v1932_v36, %v1929_v31  ;;  %v1263_v34 = vld [vmem:[#allocation2 + $0x98] sm:$0xf]  ;;  %v7316_v31 = vld [vmem:[#allocation7 + $0x160] sm:$0xff]  }
 0x116   : > { %6503 = vmatprep.subr.bf16.mxu0 %v7297_v3  ;;  %v1936_v5 = vshll.u32 %v8386_v24, 16  ;;  %v1941_v10 = vshrl.u32 %v1263_v34, 16  ;;  %v7317_v36 = vld [vmem:[#allocation7 + $0x168] sm:$0xff]  }
 0x117   : > { %v1934_v22 = vrot.slane %v1933_v55, 4  ;;  %v7320_v55 = vld [vmem:[#allocation7 + $0x200] sm:$0xff]  }
 0x118   : > { %v1938_v40 = vrot.slane %v1936_v5, 5  ;;  %v7321_v5 = vld [vmem:[#allocation7 + $0x208] sm:$0xff]  }
 0x119   : > { %6504 = vmatpush3.bf16.msra.mxu0 %v7297_v3  ;;  %v7305_v3 = vld [vmem:[#allocation7 + $0x88] sm:$0xff]  }
 0x11a   : > { %6505 = vmatprep.subr.bf16.mxu0 %v7298_v26 }
 0x11c   : > { %6490 = vmatmul.mubr.bf16.gmra.mrb[4].mxu0 %v5778_v8  ;;  %v1943_v8 = vrot.slane %v1941_v10, 4 }
 0x11d   : > { %6506 = vmatpush3.bf16.msra.mxu0 %v7298_v26  ;;  %6493 = vmatprep.mubr.bf16.mxu0 %v5779_v41  ;;  %v1944_v26 = vshll.u32 %v1263_v34, 16  ;;  %v7307_v41 = vld [vmem:[#allocation7 + $0x98] sm:$0xff]   ;;  %v8458_v34 = vld [vmem:[%s9117_s2] ss:$0 sm:$0xff] }
 0x11e   : > { %6507 = vmatprep.subr.bf16.mxu0 %v7299_v35 }
 0x121   : > { %6508 = vmatpush3.bf16.msra.mxu0 %v7299_v35  ;;  %v1946_v35 = vrot.slane %v1944_v26, 5 }
 0x122   : > { %6509 = vmatprep.subr.bf16.mxu0 %v7300_v60 }
 0x124   : > { %6494 = vmatmul.mubr.bf16.gmra.mrb[8].mxu0 %v5780_v58  ;;  %v7308_v58 = vld [vmem:[#allocation7 + $0xa0] sm:$0xff]  }
 0x125   : > { %6510 = vmatpush3.bf16.msra.mxu0 %v7300_v60  ;;  %6497 = vmatprep.mubr.bf16.mxu0 %v5781_v39  ;;  %v8394_v60 = vld [vmem:[#allocation2 + $0x9c] sm:$0x1] }
 0x126   : > { %6511 = vmatprep.subr.bf16.mxu0 %v7301_v27  ;;  %v2685_v54 = vrot.slane %v8394_v60, 5 }
 0x129   : > { %6512 = vmatpush3.bf16.msra.mxu0 %v7301_v27 }
 0x12a   : > { %6513 = vmatprep.subr.bf16.mxu0 %v7302_v44 }
 0x12c   : > { %6498 = vmatmul.mubr.bf16.gmra.mrb[12].mxu0 %v5782_v11  ;;  %v7315_v11 = vld [vmem:[#allocation7 + $0x158] sm:$0xff]  }
 0x12d   : > { %6514 = vmatpush3.bf16.msra.mxu0 %v7302_v44  ;;  %6517 = vmatprep.mubr.bf16.mxu0 %v8262_v42  ;;  %v1939_v42 = vsel %vm8103_vm11, %v1934_v22, %v1938_v40  ;;  %v9179_v44 = vcombine.low %v8111_v52, %v8116_v4  ;;  %v9180_v52 = vcombine.low %v8183_v37, %v8190_v28  ;;  %v7322_v40 = vld [vmem:[#allocation7 + $0x210] sm:$0xff]  }
 0x12e   : > { %6515 = vmatprep.subr.bf16.mxu0 %v7303_v16  ;;  %v5791_v29 = vcombine.low %v1715_v25, %v1939_v42  ;;  %v7309_v25 = vld [vmem:[#allocation7 + $0xa8] sm:$0xff]   ;;  %v9181_v37 = vcombine.low %v8116_v4, %v8120_v45  ;;  %v9183_v22 = vcombine.low %v8157_v20, %v8163_v7  ;;  %v7323_v4 = vld [vmem:[#allocation7 + $0x218] sm:$0xff]   ;;  %v9184_v45 = vcombine.low %v8173_v2, %v8306_v23  ;;  %v7326_v7 = vld [vmem:[#allocation7 + $0x230] sm:$0xff]  }
 0x12f   : > { %v9186_v20 = vcombine.low %v8200_v63, %v8210_v1  ;;  %v2147_v2 = vld [vmem:[#allocation2 + $0x48] sm:$0xe]  ;;  %v2681_v63 = vrot.slane %v8386_v24, 5  ;;  %v8452_v24 = vld [vmem:[#allocation9] sm:$0xff]  }
 0x131   : > { %6516 = vmatpush3.bf16.msra.mxu0 %v7303_v16  ;;  %v7318_v16 = vld [vmem:[#allocation7 + $0x170] sm:$0xff]  }
 0x132   : > { %6533 = vmatprep.subr.bf16.mxu0 %v7304_v0 }
 0x134   : > { %6518 = vmatmul.mubr.bf16.vlgmr.msra.gmra.mrb[0].mxu0 %v8266_v61  ;;  %v1947_v61 = vor.u32 %v1946_v35, %v1943_v8 }
 0x135   : > { %6534 = vmatpush3.bf16.msra.mxu0 %v7304_v0  ;;  %6521 = vmatprep.mubr.bf16.mxu0 %v8298_v13  ;;  %v1950_v13 = vshll.u32 %v8394_v60, 16  ;;  %v9182_v0 = vcombine.low %v8128_v62, %v8151_v18  ;;  %v7324_v62 = vld [vmem:[#allocation7 + $0x220] sm:$0xff]   ;;  %v7325_v18 = vld [vmem:[#allocation7 + $0x228] sm:$0xff]  }
 0x136   : > { %6535 = vmatprep.subr.bf16.mxu0 %v7305_v3  ;;  %v1948_v27 = vrot.slane %v1947_v61, 4 }
 0x137   : > { %v1952_v14 = vrot.slane %v1950_v13, 5 }
 0x139   : > { %6536 = vmatpush3.bf16.msra.mxu0 %v7305_v3  ;;  %v1953_v39 = vsel %vm8103_vm11, %v1948_v27, %v1952_v14  ;;  %v9185_v3 = vcombine.low %v8190_v28, %v8194_v21  ;;  %v7327_v28 = vld [vmem:[#allocation7 + $0x238] sm:$0xff]   ;;  %v5851_v21 = vrot.slane %v2147_v2, 9 }
 0x13a   : > { %6537 = vmatprep.subr.bf16.mxu0 %v7306_v53  ;;  %v5792_v17 = vcombine.low %v1729_v43, %v1953_v39  ;;  %v7314_v43 = vld [vmem:[#allocation7 + $0x150] sm:$0xff]  }
 0x13b   : > { %v2682_v1 = vsel %vm8094_vm10, %v5851_v21, %v2681_v63 }
 0x13c   : > { %6522 = vmatmul.mubr.bf16.gmra.mrb[4].mxu0 %v5791_v29  ;;  %v5853_v19 = vcombine.low %v8306_v23, %v2682_v1  ;;  %v7330_v23 = vld [vmem:[#allocation9 + $0xd0] sm:$0xff]  }
 0x13d   : > { %6538 = vmatpush3.bf16.msra.mxu0 %v7306_v53  ;;  %6525 = vmatprep.mubr.bf16.mxu0 %v8337_v30  ;;  %v7310_v30 = vld [vmem:[#allocation7 + $0xb0] sm:$0xff]  }
 0x13e   : > { %6539 = vmatprep.subr.bf16.mxu0 %v7307_v41 }
 0x141   : > { %6540 = vmatpush3.bf16.msra.mxu0 %v7307_v41 }
 0x142   : > { %6541 = vmatprep.subr.bf16.mxu0 %v7308_v58 }
 0x144   : > { %6526 = vmatmul.mubr.bf16.gmra.mrb[8].mxu0 %v8341_v12  ;;  %v7312_v12 = vld [vmem:[#allocation7 + $0x140] sm:$0xff]  }
 0x145   : > { %6542 = vmatpush3.bf16.msra.mxu0 %v7308_v58  ;;  %6529 = vmatprep.mubr.bf16.mxu0 %v8358_v33  ;;  %v7313_v33 = vld [vmem:[#allocation7 + $0x148] sm:$0xff]  }
 0x146   : > { %6543 = vmatprep.subr.bf16.mxu0 %v7309_v25 }
 0x149   : > { %6544 = vmatpush3.bf16.msra.mxu0 %v7309_v25 }
 0x14a   : > { %6545 = vmatprep.subr.bf16.mxu0 %v7310_v30 }
 0x14c   : > { %6530 = vmatmul.mubr.bf16.gmra.mrb[12].mxu0 %v5792_v17 }
 0x14d   : > { %6546 = vmatpush3.bf16.msra.mxu0 %v7310_v30  ;;  %6549 = vmatprep.mubr.bf16.mxu0 %v9179_v44 }
 0x14e   : > { %6547 = vmatprep.subr.bf16.mxu0 %v7311_v50 }
 0x151   : > { %6548 = vmatpush3.bf16.msra.mxu0 %v7311_v50 }
 0x152   : > { %6565 = vmatprep.subr.bf16.mxu0 %v7312_v12 }
 0x154   : > { %6550 = vmatmul.mubr.bf16.vlgmr.msra.gmra.mrb[0].mxu0 %v8136_v51 }
 0x155   : > { %6566 = vmatpush3.bf16.msra.mxu0 %v7312_v12  ;;  %6553 = vmatprep.mubr.bf16.mxu0 %v8169_v38 }
 0x156   : > { %6567 = vmatprep.subr.bf16.mxu0 %v7313_v33 }
 0x159   : > { %6568 = vmatpush3.bf16.msra.mxu0 %v7313_v33 }
 0x15a   : > { %6569 = vmatprep.subr.bf16.mxu0 %v7314_v43 }
 0x15c   : > { %6554 = vmatmul.mubr.bf16.gmra.mrb[4].mxu0 %v8177_v9 }
 0x15d   : > { %6570 = vmatpush3.bf16.msra.mxu0 %v7314_v43  ;;  %6557 = vmatprep.mubr.bf16.mxu0 %v9180_v52 }
 0x15e   : > { %6571 = vmatprep.subr.bf16.mxu0 %v7315_v11 }
 0x161   : > { %6572 = vmatpush3.bf16.msra.mxu0 %v7315_v11 }
 0x162   : > { %6573 = vmatprep.subr.bf16.mxu0 %v7316_v31 }
 0x164   : > { %6558 = vmatmul.mubr.bf16.gmra.mrb[8].mxu0 %v8205_v56 }
 0x165   : > { %6574 = vmatpush3.bf16.msra.mxu0 %v7316_v31  ;;  %6561 = vmatprep.mubr.bf16.mxu0 %v8234_v48 }
 0x166   : > { %6575 = vmatprep.subr.bf16.mxu0 %v7317_v36 }
 0x169   : > { %6576 = vmatpush3.bf16.msra.mxu0 %v7317_v36 }
 0x16a   : > { %6577 = vmatprep.subr.bf16.mxu0 %v7318_v16 }
 0x16c   : > { %6562 = vmatmul.mubr.bf16.gmra.mrb[12].mxu0 %v8258_v46 }
 0x16d   : > { %6578 = vmatpush3.bf16.msra.mxu0 %v7318_v16  ;;  %6581 = vmatprep.mubr.bf16.mxu0 %v9181_v37 }
 0x16e   : > { %6579 = vmatprep.subr.bf16.mxu0 %v7319_v47 }
 0x171   : > { %6580 = vmatpush3.bf16.msra.mxu0 %v7319_v47 }
 0x172   : > { %6597 = vmatprep.subr.bf16.mxu0 %v7320_v55 }
 0x174   : > { %6582 = vmatmul.mubr.bf16.vlgmr.msra.gmra.mrb[0].mxu0 %v9182_v0 }
 0x175   : > { %6598 = vmatpush3.bf16.msra.mxu0 %v7320_v55  ;;  %6585 = vmatprep.mubr.bf16.mxu0 %v9183_v22 }
 0x176   : > { %6599 = vmatprep.subr.bf16.mxu0 %v7321_v5 }
 0x179   : > { %6600 = vmatpush3.bf16.msra.mxu0 %v7321_v5 }
 0x17a   : > { %6601 = vmatprep.subr.bf16.mxu0 %v7322_v40 }
 0x17c   : > { %6586 = vmatmul.mubr.bf16.gmra.mrb[4].mxu0 %v9184_v45 }
 0x17d   : > { %6602 = vmatpush3.bf16.msra.mxu0 %v7322_v40  ;;  %6589 = vmatprep.mubr.bf16.mxu0 %v9185_v3 }
 0x17e   : > { %6603 = vmatprep.subr.bf16.mxu0 %v7323_v4 }
 0x181   : > { %6604 = vmatpush3.bf16.msra.mxu0 %v7323_v4 }
 0x182   : > { %6605 = vmatprep.subr.bf16.mxu0 %v7324_v62 }
 0x184   : > { %6590 = vmatmul.mubr.bf16.gmra.mrb[8].mxu0 %v9186_v20  ;;  %v7348_v20 = vld [vmem:[#allocation9 + $0x20] sm:$0xff]  }
 0x185   : > { %6606 = vmatpush3.bf16.msra.mxu0 %v7324_v62  ;;  %6593 = vmatprep.mubr.bf16.mxu0 %v5841_v6  ;;  %v7329_v6 = vld [vmem:[#allocation9 + $0xc8] sm:$0xff]  }
 0x186   : > { %6607 = vmatprep.subr.bf16.mxu0 %v7325_v18  ;;  %6631 = vmatprep.subr.bf16.mxu1 %v7329_v6 }
 0x187   : > { %6632 = vmatpush3.bf16.msra.mxu1 %v7329_v6 }
 0x188   : > { %6633 = vmatprep.subr.bf16.mxu1 %v7330_v23 }
 0x189   : > { %6608 = vmatpush3.bf16.msra.mxu0 %v7325_v18 }
 0x18a   : > { %6609 = vmatprep.subr.bf16.mxu0 %v7326_v7 }
 0x18b   : > { %6634 = vmatpush3.bf16.msra.mxu1 %v7330_v23 }
 0x18c   : > { %6594 = vmatmul.mubr.bf16.gmra.mrb[12].mxu0 %v5842_v57  ;;  %v7332_v57 = vld [vmem:[#allocation9 + $0xe0] sm:$0xff]  }
 0x18d   : > { %6610 = vmatpush3.bf16.msra.mxu0 %v7326_v7  ;;  %6613 = vmatprep.mubr.bf16.mxu0 %v8136_v51  ;;  %v5852_v51 = vrot.slane %v2157_v49, 9 }
 0x18e   : > { %6611 = vmatprep.subr.bf16.mxu0 %v7327_v28 }
 0x191   : > { %6612 = vmatpush3.bf16.msra.mxu0 %v7327_v28 }
 0x194   : > { %6614 = vmatmul.mubr.bf16.vlgmr.msra.gmra.mrb[0].mxu0 %v8169_v38  ;;  %v2686_v38 = vsel %vm8094_vm10, %v5852_v51, %v2685_v54 }
 0x195   : > { %6617 = vmatprep.mubr.bf16.mxu0 %v8177_v9  ;;  %v5854_v9 = vcombine.low %v8366_v15, %v2686_v38  ;;  %v7335_v15 = vld [vmem:[#allocation9 + $0xf8] sm:$0xff]  }
 0x19c   : > { %6618 = vmatmul.mubr.bf16.gmra.mrb[4].mxu0 %v5853_v19 }
 0x19d   : > { %6621 = vmatprep.mubr.bf16.mxu0 %v8205_v56  ;;  %v7331_v56 = vld [vmem:[#allocation9 + $0xd8] sm:$0xff]  }
 0x19e   : > { %6635 = vmatprep.subr.bf16.mxu1 %v7331_v56 }
 0x19f   : > { %6636 = vmatpush3.bf16.msra.mxu1 %v7331_v56 }
 0x1a0   : > { %6637 = vmatprep.subr.bf16.mxu1 %v7332_v57 }
 0x1a3   : > { %6638 = vmatpush3.bf16.msra.mxu1 %v7332_v57 }
 0x1a4   : > { %6622 = vmatmul.mubr.bf16.gmra.mrb[8].mxu0 %v8234_v48  ;;  %v7333_v48 = vld [vmem:[#allocation9 + $0xe8] sm:$0xff]  }
 0x1a5   : > { %6625 = vmatprep.mubr.bf16.mxu0 %v8258_v46  ;;  %6639 = vmatprep.subr.bf16.mxu1 %v7333_v48  ;;  %v7334_v46 = vld [vmem:[#allocation9 + $0xf0] sm:$0xff]  }
 0x1a7   : > { %6640 = vmatpush3.bf16.msra.mxu1 %v7333_v48 }
 0x1a8   : > { %6641 = vmatprep.subr.bf16.mxu1 %v7334_v46 }
 0x1ab   : > { %6642 = vmatpush3.bf16.msra.mxu1 %v7334_v46 }
 0x1ac   : > { %6626 = vmatmul.mubr.bf16.gmra.mrb[12].mxu0 %v5854_v9  ;;  %6643 = vmatprep.subr.bf16.mxu1 %v7335_v15 }
 0x1af   : > { %6644 = vmatpush3.bf16.msra.mxu1 %v7335_v15 }
 0x1b0   : > { %6661 = vmatprep.subr.bf16.mxu1 %v8452_v24 }
 0x267   : > { %v6615_v42 = vpop.f32.mrb[0].mxu0 }
 0x268   : > { %v2880_v10 = vadd.f32 %v6615_v42, %v8458_v34  ;;  %v2792_v26 = vpop.f32.mrb[1].mxu0 }
 0x269   : > { %v2878_v53 = vadd.f32 %v8458_v34, %v2792_v26  ;;  %v6616_v29 = vpop.f32.mrb[2].mxu0 }
 0x26a   : > { %v2896_v8 = vmax.f32 %v2880_v10, 0.0  ;;  %v2881_v35 = vadd.f32 %v6616_v29, %v8458_v34  ;;  %v2795_v41 = vpop.f32.mrb[3].mxu0 }
 0x26b   : > { %v2894_v60 = vmax.f32 %v2878_v53, 0.0  ;;  %v2879_v61 = vadd.f32 %v8458_v34, %v2795_v41 }
 0x26c   : > { %v2912_v13 = vpack.c.bf16 %v2896_v8, %v2896_v8  ;;  %v2897_v58 = vmax.f32 %v2881_v35, 0.0 }
 0x26d   : > { %v2910_v27 = vpack.c.bf16 %v2894_v60, %v2894_v60  ;;  %v2895_v14 = vmax.f32 %v2879_v61, 0.0 }
 0x26e   : > { %v2941_v25 = vshrl.u32 %v2912_v13, 16  ;;  %v2913_v39 = vpack.c.bf16 %v2897_v58, %v2897_v58  ;;  %v2944_v30 = vshll.u32 %v2912_v13, 16 }
 0x26f   : > { %v2927_v17 = vshrl.u32 %v2910_v27, 16  ;;  %v2930_v50 = vshll.u32 %v2910_v27, 16  ;;  %v2911_v44 = vpack.c.bf16 %v2895_v14, %v2895_v14  ;;  %v6619_v12 = vpop.f32.mrb[4].mxu0 }
 0x270   : > { %v2943_v33 = vrot.slane %v2941_v25, 7  ;;  %v2948_v43 = vshrl.u32 %v2913_v39, 16  ;;  %v2951_v11 = vshll.u32 %v2913_v39, 16  ;;  %v2884_v52 = vadd.f32 %v6619_v12, %v8458_v34  ;;  %v2808_v31 = vpop.f32.mrb[5].mxu0 }
 0x271   : > { %v2929_v36 = vrot.slane %v2927_v17, 7  ;;  %v2934_v16 = vshrl.u32 %v2911_v44, 16  ;;  %v2937_v47 = vshll.u32 %v2911_v44, 16  ;;  %v2882_v37 = vadd.f32 %v8458_v34, %v2808_v31  ;;  %v6620_v55 = vpop.f32.mrb[6].mxu0 }
 0x272   : > { %v2946_v5 = vor.u32 %v2944_v30, %v2943_v33  ;;  %v2950_v0 = vrot.slane %v2948_v43, 7  ;;  %v2900_v22 = vmax.f32 %v2884_v52, 0.0  ;;  %v2885_v40 = vadd.f32 %v6620_v55, %v8458_v34  ;;  %v2811_v4 = vpop.f32.mrb[7].mxu0 }
 0x273   : > { %v2932_v45 = vor.u32 %v2930_v50, %v2929_v36  ;;  %v2936_v3 = vrot.slane %v2934_v16, 7  ;;  %v2898_v62 = vmax.f32 %v2882_v37, 0.0  ;;  %v2883_v18 = vadd.f32 %v8458_v34, %v2811_v4 }
 0x274   : > { %v3056_v7 = vsel %vm7807_vm4, 0, %v2946_v5  ;;  %v2953_v28 = vor.u32 %v2951_v11, %v2950_v0  ;;  %v2916_v2 = vpack.c.bf16 %v2900_v22, %v2900_v22  ;;  %v2901_v21 = vmax.f32 %v2885_v40, 0.0 }
 0x275   : > { %v3072_v1 = vsel %vm7815_vm5, %v3056_v7, 0  ;;  %v3054_v19 = vsel %vm7807_vm4, 0, %v2932_v45  ;;  %v2939_v49 = vor.u32 %v2937_v47, %v2936_v3  ;;  %v2914_v51 = vpack.c.bf16 %v2898_v62, %v2898_v62 }
 0x276   : > { %v5868_v54 = vcombine.low %v3072_v1, %v3072_v1  ;;  %v5869_v38 = vcombine.high %v3072_v1, %v3072_v1  ;;  %v3070_v9 = vsel %vm7815_vm5, %v3054_v19, 0  ;;  %v3057_v6 = vsel %vm7807_vm4, 0, %v2953_v28 }
 0x277   : > { %v5864_v23 = vcombine.low %v3070_v9, %v3070_v9  ;;  %v5865_v56 = vcombine.high %v3070_v9, %v3070_v9  ;;  %v3073_v57 = vsel %vm7815_vm5, %v3057_v6, 0  ;;  %v3055_v48 = vsel %vm7807_vm4, 0, %v2939_v49  ;;  %v6623_v46 = vpop.f32.mrb[8].mxu0 }
 0x278   : > { %3212 = vst [vmem:[#allocation3 + $0x18] sm:$0xf] %v5868_v54  ;;  %3213 = vst [vmem:[#allocation3 + $0x1c] sm:$0x1] %v5869_v38  ;;  %v5870_v15 = vcombine.low %v3073_v57, %v3073_v57  ;;  %v5871_v42 = vcombine.high %v3073_v57, %v3073_v57  ;;  %v3071_v10 = vsel %vm7815_vm5, %v3055_v48, 0  ;;  %v2969_v26 = vshrl.u32 %v2916_v2, 16 }
 0x279   : > { %v2824_v53 = vpop.f32.mrb[9].mxu0  ;;  %3208 = vst [vmem:[#allocation3 + $0x8] sm:$0xf] %v5864_v23  ;;  %3209 = vst [vmem:[#allocation3 + $0xc] sm:$0x1] %v5865_v56  ;;  %v5866_v29 = vcombine.low %v3071_v10, %v3071_v10  ;;  %v5867_v8 = vcombine.high %v3071_v10, %v3071_v10  ;;  %v2972_v35 = vshll.u32 %v2916_v2, 16  ;;  %v2917_v58 = vpack.c.bf16 %v2901_v21, %v2901_v21 }
 0x27a   : > { %v2955_v41 = vshrl.u32 %v2914_v51, 16  ;;  %v6624_v60 = vpop.f32.mrb[10].mxu0  ;;  %3214 = vst [vmem:[#allocation3 + $0x20] sm:$0xf] %v5870_v15  ;;  %3215 = vst [vmem:[#allocation3 + $0x24] sm:$0x1] %v5871_v42  ;;  %v2888_v39 = vadd.f32 %v6623_v46, %v8458_v34  ;;  %v2886_v30 = vadd.f32 %v8458_v34, %v2824_v53 }
 0x27b   : > { %v2971_v61 = vrot.slane %v2969_v26, 7  ;;  %v2958_v13 = vshll.u32 %v2914_v51, 16  ;;  %v2899_v27 = vmax.f32 %v2883_v18, 0.0  ;;  %v2827_v14 = vpop.f32.mrb[11].mxu0  ;;  %3210 = vst [vmem:[#allocation3 + $0x10] sm:$0xf] %v5866_v29  ;;  %v2889_v17 = vadd.f32 %v6624_v60, %v8458_v34 }
 0x27c   : > { %3211 = vst [vmem:[#allocation3 + $0x14] sm:$0x1] %v5867_v8  ;;  %v2957_v25 = vrot.slane %v2955_v41, 7  ;;  %v2976_v44 = vshrl.u32 %v2917_v58, 16  ;;  %v2979_v12 = vshll.u32 %v2917_v58, 16  ;;  %v2904_v11 = vmax.f32 %v2888_v39, 0.0 }
 0x27d   : > { %v2974_v50 = vor.u32 %v2972_v35, %v2971_v61  ;;  %v2915_v33 = vpack.c.bf16 %v2899_v27, %v2899_v27  ;;  %v2902_v52 = vmax.f32 %v2886_v30, 0.0  ;;  %v2905_v31 = vmax.f32 %v2889_v17, 0.0 }
 0x27e   : > { %v2960_v43 = vor.u32 %v2958_v13, %v2957_v25  ;;  %v2978_v16 = vrot.slane %v2976_v44, 7  ;;  %v2920_v0 = vpack.c.bf16 %v2904_v11, %v2904_v11  ;;  %v2887_v15 = vadd.f32 %v8458_v34, %v2827_v14 }
 0x27f   : > { %v3060_v36 = vsel %vm7807_vm4, 0, %v2974_v50  ;;  %v2962_v47 = vshrl.u32 %v2915_v33, 16  ;;  %v2965_v37 = vshll.u32 %v2915_v33, 16  ;;  %v2918_v22 = vpack.c.bf16 %v2902_v52, %v2902_v52  ;;  %v6627_v40 = vpop.f32.mrb[12].mxu0 }
 0x280   : > { %v3076_v55 = vsel %vm7815_vm5, %v3060_v36, 0  ;;  %v3058_v5 = vsel %vm7807_vm4, 0, %v2960_v43  ;;  %v2981_v62 = vor.u32 %v2979_v12, %v2978_v16  ;;  %v2840_v18 = vpop.f32.mrb[13].mxu0  ;;  %v2997_v21 = vshrl.u32 %v2920_v0, 16 }
 0x281   : > { %v5876_v4 = vcombine.low %v3076_v55, %v3076_v55  ;;  %v5877_v45 = vcombine.high %v3076_v55, %v3076_v55  ;;  %v3074_v3 = vsel %vm7815_vm5, %v3058_v5, 0  ;;  %v2964_v2 = vrot.slane %v2962_v47, 7  ;;  %v6628_v1 = vpop.f32.mrb[14].mxu0 }
 0x282   : > { %v5872_v7 = vcombine.low %v3074_v3, %v3074_v3  ;;  %v5873_v28 = vcombine.high %v3074_v3, %v3074_v3  ;;  %v3061_v19 = vsel %vm7807_vm4, 0, %v2981_v62  ;;  %v3000_v49 = vshll.u32 %v2920_v0, 16  ;;  %v2843_v38 = vpop.f32.mrb[15].mxu0  ;;  %v8513_v12 = vld [vmem:[#allocation3 + $0x10] sm:$0xf] }
 0x283   : > { %3220 = vst [vmem:[#allocation3 + $0x38] sm:$0xf] %v5876_v4  ;;  %3221 = vst [vmem:[#allocation3 + $0x3c] sm:$0x1] %v5877_v45  ;;  %v2983_v51 = vshrl.u32 %v2918_v22, 16  ;;  %v2986_v54 = vshll.u32 %v2918_v22, 16  ;;  %v2967_v6 = vor.u32 %v2965_v37, %v2964_v2  ;;  %v2921_v56 = vpack.c.bf16 %v2905_v31, %v2905_v31 }
 0x284   : > { %3216 = vst [vmem:[#allocation3 + $0x28] sm:$0xf] %v5872_v7  ;;  %3217 = vst [vmem:[#allocation3 + $0x2c] sm:$0x1] %v5873_v28  ;;  %v3077_v9 = vsel %vm7815_vm5, %v3061_v19, 0  ;;  %v2999_v23 = vrot.slane %v2997_v21, 7  ;;  %v2892_v41 = vadd.f32 %v6627_v40, %v8458_v34  ;;  %v2890_v16 = vadd.f32 %v8458_v34, %v2840_v18 }
 0x285   : > { %v5878_v57 = vcombine.low %v3077_v9, %v3077_v9  ;;  %v5879_v48 = vcombine.high %v3077_v9, %v3077_v9  ;;  %v2985_v46 = vrot.slane %v2983_v51, 7  ;;  %v3059_v42 = vsel %vm7807_vm4, 0, %v2967_v6  ;;  %v8519_v37 = vld [vmem:[#allocation3 + $0x8] sm:$0xf]  ;;  %v8526_v40 = vld [vmem:[#allocation3 + $0x20] sm:$0xf] }
 0x286   : > { %v3002_v10 = vor.u32 %v3000_v49, %v2999_v23  ;;  %v3004_v26 = vshrl.u32 %v2921_v56, 16  ;;  %v3007_v53 = vshll.u32 %v2921_v56, 16  ;;  %v3075_v29 = vsel %vm7815_vm5, %v3059_v42, 0  ;;  %v8528_v2 = vld [vmem:[#allocation3 + $0x18] sm:$0xf]  ;;  %v7341_v19 = vld [vmem:[#allocation9 + $0x8] sm:$0xff]  }
 0x287   : > { %3222 = vst [vmem:[#allocation3 + $0x40] sm:$0xf] %v5878_v57  ;;  %3223 = vst [vmem:[#allocation3 + $0x44] sm:$0x1] %v5879_v48  ;;  %v2988_v8 = vor.u32 %v2986_v54, %v2985_v46  ;;  %v2903_v35 = vmax.f32 %v2887_v15, 0.0  ;;  %v5874_v60 = vcombine.low %v3075_v29, %v3075_v29  ;;  %v5875_v61 = vcombine.high %v3075_v29, %v3075_v29  ;;  %v7344_v29 = vld [vmem:[#allocation9 + $0x10] sm:$0xff]  }
 0x288   : > { %v3064_v13 = vsel %vm7807_vm4, 0, %v3002_v10  ;;  %v3006_v58 = vrot.slane %v3004_v26, 7  ;;  %v2908_v39 = vmax.f32 %v2892_v41, 0.0  ;;  %v2893_v47 = vadd.f32 %v6628_v1, %v8458_v34 }
 0x289   : > { %v3080_v27 = vsel %vm7815_vm5, %v3064_v13, 0  ;;  %v3062_v14 = vsel %vm7807_vm4, 0, %v2988_v8  ;;  %v2919_v25 = vpack.c.bf16 %v2903_v35, %v2903_v35  ;;  %3218 = vst [vmem:[#allocation3 + $0x30] sm:$0xf] %v5874_v60  ;;  %3219 = vst [vmem:[#allocation3 + $0x34] sm:$0x1] %v5875_v61  ;;  %v2891_v0 = vadd.f32 %v8458_v34, %v2843_v38 }
 0x28a   : > { %v5884_v30 = vcombine.low %v3080_v27, %v3080_v27  ;;  %v5885_v17 = vcombine.high %v3080_v27, %v3080_v27  ;;  %v3078_v50 = vsel %vm7815_vm5, %v3062_v14, 0  ;;  %v3009_v44 = vor.u32 %v3007_v53, %v3006_v58 }
 0x28b   : > { %v5880_v33 = vcombine.low %v3078_v50, %v3078_v50  ;;  %v5881_v43 = vcombine.high %v3078_v50, %v3078_v50  ;;  %v2990_v11 = vshrl.u32 %v2919_v25, 16  ;;  %v2993_v52 = vshll.u32 %v2919_v25, 16  ;;  %v8534_v9 = vld [vmem:[#allocation3 + $0x28] sm:$0xf]  ;;  %v8549_v25 = vld [vmem:[#allocation3 + $0x38] sm:$0xf] }
 0x28c   : > { %3228 = vst [vmem:[#allocation3 + $0x68] sm:$0xf] %v5884_v30  ;;  %3229 = vst [vmem:[#allocation3 + $0x6c] sm:$0x1] %v5885_v17  ;;  %v3065_v31 = vsel %vm7807_vm4, 0, %v3009_v44  ;;  %v2924_v36 = vpack.c.bf16 %v2908_v39, %v2908_v39  ;;  %v5896_v22 = vcombine.low %v8519_v37, %v8513_v12  ;;  %v2906_v18 = vmax.f32 %v2890_v16, 0.0 }
 0x28d   : > { %3224 = vst [vmem:[#allocation3 + $0x58] sm:$0xf] %v5880_v33  ;;  %3225 = vst [vmem:[#allocation3 + $0x5c] sm:$0x1] %v5881_v43  ;;  %v3081_v55 = vsel %vm7815_vm5, %v3065_v31, 0  ;;  %v2992_v5 = vrot.slane %v2990_v11, 7  ;;  %v5897_v34 = vcombine.low %v8528_v2, %v8526_v40 }
 0x28e   : > { %v5886_v4 = vcombine.low %v3081_v55, %v3081_v55  ;;  %v5887_v45 = vcombine.high %v3081_v55, %v3081_v55  ;;  %v3025_v3 = vshrl.u32 %v2924_v36, 16  ;;  %v2909_v7 = vmax.f32 %v2893_v47, 0.0  ;;  %6645 = vmatprep.mubr.bf16.mxu1 %v5896_v22  ;;  %v8547_v61 = vld [vmem:[#allocation3 + $0x40] sm:$0xf]  ;;  %v7345_v50 = vld [vmem:[#allocation9 + $0x18] sm:$0xff]  }
 0x28f   : > { %v2995_v62 = vor.u32 %v2993_v52, %v2992_v5  ;;  %v2907_v28 = vmax.f32 %v2891_v0, 0.0  ;;  %v3028_v1 = vshll.u32 %v2924_v36, 16  ;;  %v2922_v51 = vpack.c.bf16 %v2906_v18, %v2906_v18  ;;  %6646 = vmatmul.mubr.bf16.vlgmr.msra.gmra.mrb[0].mxu1 %v5897_v34  ;;  %v7349_v18 = vld [vmem:[#allocation9 + $0x28] sm:$0xff]   ;;  %v3240_v34 = vld [vmem:[#allocation3] sm:$0xf] }
 0x290   : > { %3230 = vst [vmem:[#allocation3 + $0x70] sm:$0xf] %v5886_v4  ;;  %3231 = vst [vmem:[#allocation3 + $0x74] sm:$0x1] %v5887_v45  ;;  %v3027_v21 = vrot.slane %v3025_v3, 7  ;;  %v2925_v54 = vpack.c.bf16 %v2909_v7, %v2909_v7  ;;  %6662 = vmatpush3.bf16.msra.mxu1 %v8452_v24  ;;  %v5899_v17 = vcombine.low %v8549_v25, %v8547_v61  ;;  %v7352_v7 = vld [vmem:[#allocation9 + $0x30] sm:$0xff]  }
 0x291   : > { %v3063_v49 = vsel %vm7807_vm4, 0, %v2995_v62  ;;  %v2923_v38 = vpack.c.bf16 %v2907_v28, %v2907_v28  ;;  %v8536_v6 = vld [vmem:[#allocation3 + $0x30] sm:$0xf]  ;;  %v3011_v15 = vshrl.u32 %v2922_v51, 16  ;;  %v3014_v10 = vshll.u32 %v2922_v51, 16  ;;  %6663 = vmatprep.subr.bf16.mxu1 %v7341_v19 }
 0x292   : > { %v3079_v23 = vsel %vm7815_vm5, %v3063_v49, 0  ;;  %v3030_v56 = vor.u32 %v3028_v1, %v3027_v21  ;;  %v5898_v57 = vcombine.low %v8534_v9, %v8536_v6  ;;  %v3032_v26 = vshrl.u32 %v2925_v54, 16 }
 0x293   : > { %v5882_v48 = vcombine.low %v3079_v23, %v3079_v23  ;;  %v5883_v46 = vcombine.high %v3079_v23, %v3079_v23  ;;  %v3018_v53 = vshrl.u32 %v2923_v38, 16  ;;  %v3013_v35 = vrot.slane %v3011_v15, 7  ;;  %v3253_v63 = vld [vmem:[#allocation3 + $0x68] sm:$0xf]  ;;  %v7354_v23 = vld [vmem:[#allocation9 + $0x180] sm:$0xff]  }
 0x294   : > { %v3068_v42 = vsel %vm7807_vm4, 0, %v3030_v56  ;;  %6649 = vmatprep.mubr.bf16.mxu1 %v5898_v57  ;;  %v3035_v41 = vshll.u32 %v2925_v54, 16  ;;  %v3021_v60 = vshll.u32 %v2923_v38, 16  ;;  %v3034_v58 = vrot.slane %v3032_v26, 7  ;;  %6664 = vmatpush3.bf16.msra.mxu1 %v7341_v19  ;;  %v3251_v22 = vld [vmem:[#allocation3 + $0x58] sm:$0xf] }
 0x295   : > { %3226 = vst [vmem:[#allocation3 + $0x60] sm:$0xf] %v5882_v48  ;;  %3227 = vst [vmem:[#allocation3 + $0x64] sm:$0x1] %v5883_v46  ;;  %v3084_v8 = vsel %vm7815_vm5, %v3068_v42, 0  ;;  %v3020_v27 = vrot.slane %v3018_v53, 7  ;;  %v3016_v14 = vor.u32 %v3014_v10, %v3013_v35  ;;  %6665 = vmatprep.subr.bf16.mxu1 %v7344_v29  ;;  %v5912_v38 = vcombine.low %v3240_v34, %v8519_v37 }
 0x296   : > { %v5892_v24 = vcombine.low %v3084_v8, %v3084_v8  ;;  %v5893_v13 = vcombine.high %v3084_v8, %v3084_v8  ;;  %v3037_v39 = vor.u32 %v3035_v41, %v3034_v58  ;;  %v7353_v54 = vld [vmem:[#allocation9 + $0x38] sm:$0xff]   ;;  %v8583_v56 = vcombine.low %v8513_v12, %v8528_v2  ;;  %v7356_v57 = vld [vmem:[#allocation9 + $0x188] sm:$0xff]   ;;  %v7358_v37 = vld [vmem:[#allocation9 + $0x190] sm:$0xff]  }
 0x297   : > { %v3023_v30 = vor.u32 %v3021_v60, %v3020_v27  ;;  %v3066_v44 = vsel %vm7807_vm4, 0, %v3016_v14  ;;  %6650 = vmatmul.mubr.bf16.gmra.mrb[4].mxu1 %v5899_v17  ;;  %v8568_v3 = vld [vmem:[#allocation3 + $0x70] sm:$0xf]  ;;  %v8587_v48 = vcombine.low %v8526_v40, %v8534_v9  ;;  %v8593_v15 = vcombine.low %v8536_v6, %v8549_v25  ;;  %v7360_v12 = vld [vmem:[#allocation9 + $0x198] sm:$0xff]   ;;  %v8596_v40 = vld [vmem:[#allocation3] sm:$0xf] }
 0x298   : > { %3236 = vst [vmem:[#allocation3 + $0x88] sm:$0xf] %v5892_v24  ;;  %3237 = vst [vmem:[#allocation3 + $0x8c] sm:$0x1] %v5893_v13  ;;  %v3082_v33 = vsel %vm7815_vm5, %v3066_v44, 0  ;;  %v3069_v43 = vsel %vm7807_vm4, 0, %v3037_v39  ;;  %6666 = vmatpush3.bf16.msra.mxu1 %v7344_v29  ;;  %v5901_v62 = vcombine.low %v3253_v63, %v8568_v3 }
 0x299   : > { %v3067_v11 = vsel %vm7807_vm4, 0, %v3023_v30  ;;  %v5888_v52 = vcombine.low %v3082_v33, %v3082_v33  ;;  %v5889_v31 = vcombine.high %v3082_v33, %v3082_v33  ;;  %v3085_v36 = vsel %vm7815_vm5, %v3069_v43, 0  ;;  %6667 = vmatprep.subr.bf16.mxu1 %v7345_v50  ;;  %v3250_v46 = vld [vmem:[#allocation3 + $0x50] sm:$0xf]  ;;  %v7362_v9 = vld [vmem:[#allocation9 + $0x1a0] sm:$0xff]   ;;  %v7364_v13 = vld [vmem:[#allocation9 + $0x1a8] sm:$0xff]  }
 0x29a   : > { %v3083_v16 = vsel %vm7815_vm5, %v3067_v11, 0  ;;  %v5894_v47 = vcombine.low %v3085_v36, %v3085_v36  ;;  %v5895_v55 = vcombine.high %v3085_v36, %v3085_v36  ;;  %v5916_v2 = vcombine.low %v3250_v46, %v3251_v22  ;;  %v8598_v42 = vld [vmem:[#allocation3 + $0x4] sm:$0x1]  ;;  %v4747_v10 = vld [vmem:[#allocation3] sm:$0xe] }
 0x29b   : > { %v5890_v5 = vcombine.low %v3083_v16, %v3083_v16  ;;  %v5891_v0 = vcombine.high %v3083_v16, %v3083_v16  ;;  %3232 = vst [vmem:[#allocation3 + $0x78] sm:$0xf] %v5888_v52  ;;  %3233 = vst [vmem:[#allocation3 + $0x7c] sm:$0x1] %v5889_v31  ;;  %v8601_v53 = vld [vmem:[#allocation3 + $0x54] sm:$0x1] }
 0x29c   : > { %v8565_v4 = vld [vmem:[#allocation3 + $0x60] sm:$0xf]  ;;  %3238 = vst [vmem:[#allocation3 + $0x90] sm:$0xf] %v5894_v47  ;;  %3239 = vst [vmem:[#allocation3 + $0x94] sm:$0x1] %v5895_v55  ;;  %6668 = vmatpush3.bf16.msra.mxu1 %v7345_v50 }
 0x29d   : > { %v5900_v45 = vcombine.low %v3251_v22, %v8565_v4  ;;  %3234 = vst [vmem:[#allocation3 + $0x80] sm:$0xf] %v5890_v5  ;;  %3235 = vst [vmem:[#allocation3 + $0x84] sm:$0x1] %v5891_v0  ;;  %6669 = vmatprep.subr.bf16.mxu1 %v7348_v20  ;;  %v8603_v6 = vld [vmem:[#allocation3 + $0x4c] sm:$0x1]  ;;  %v8607_v24 = vcombine.low %v8565_v4, %v3253_v63 }
 0x29e   : > { %v4756_v29 = vld [vmem:[#allocation3 + $0x48] sm:$0xe]  ;;  %v5980_v35 = vrot.slane %v4747_v10, 9  ;;  %v4801_v41 = vrot.slane %v8598_v42, 5  ;;  %v4757_v60 = vld [vmem:[#allocation3 + $0x50] sm:$0xe] }
 0x29f   : > { %6653 = vmatprep.mubr.bf16.mxu1 %v5900_v45  ;;  %v8576_v49 = vld [vmem:[#allocation3 + $0x88] sm:$0xf]  ;;  %v8609_v58 = vld [vmem:[#allocation3 + $0xc] sm:$0x1]  ;;  %v8612_v14 = vld [vmem:[#allocation3 + $0x9c] sm:$0x1] }
 0x2a0   : > { %6654 = vmatmul.mubr.bf16.gmra.mrb[8].mxu1 %v5901_v62  ;;  %v4748_v8 = vld [vmem:[#allocation3 + $0x8] sm:$0xe]  ;;  %v4749_v39 = vld [vmem:[#allocation3 + $0x10] sm:$0xe]  ;;  %v6030_v30 = vrot.slane %v4756_v29, 9  ;;  %v5287_v17 = vrot.slane %v8603_v6, 5  ;;  %v8626_v31 = vsel %vm8094_vm10, %v5980_v35, %v4801_v41 }
 0x2a1   : > { %6670 = vmatpush3.bf16.msra.mxu1 %v7348_v20  ;;  %v4766_v50 = vld [vmem:[#allocation3 + $0x98] sm:$0xe]  ;;  %v8619_v44 = vld [vmem:[#allocation3 + $0x14] sm:$0x1]  ;;  %v5981_v33 = vrot.slane %v4748_v8, 9  ;;  %v5988_v11 = vrot.slane %v4757_v60, 9 }
 0x2a2   : > { %6671 = vmatprep.subr.bf16.mxu1 %v7349_v18  ;;  %v3255_v28 = vld [vmem:[#allocation3 + $0x78] sm:$0xf]  ;;  %v8622_v52 = vld [vmem:[#allocation3 + $0x1c] sm:$0x1]  ;;  %v4805_v36 = vrot.slane %v8609_v58, 5  ;;  %v4833_v47 = vrot.slane %v8601_v53, 5 }
 0x2a3   : > { %v8573_v1 = vld [vmem:[#allocation3 + $0x90] sm:$0xf]  ;;  %v8615_v25 = vcombine.low %v8568_v3, %v3255_v28  ;;  %v4750_v43 = vld [vmem:[#allocation3 + $0x18] sm:$0xe]  ;;  %v4751_v16 = vld [vmem:[#allocation3 + $0x20] sm:$0xe] }
 0x2a4   : > { %v8571_v21 = vld [vmem:[#allocation3 + $0x80] sm:$0xf]  ;;  %v5903_v51 = vcombine.low %v8576_v49, %v8573_v1  ;;  %v7366_v55 = vld [vmem:[#allocation9 + $0x1b0] sm:$0xff]   ;;  %v8630_v5 = vld [vmem:[#allocation3 + $0x24] sm:$0x1]  ;;  %v5982_v0 = vrot.slane %v4749_v39, 9  ;;  %v8639_v3 = vsel %vm8094_vm10, %v5981_v33, %v4805_v36  ;;  %v8661_v46 = vsel %vm8094_vm10, %v5988_v11, %v4833_v47 }
 0x2a5   : > { %v5902_v19 = vcombine.low %v3255_v28, %v8571_v21  ;;  %6672 = vmatpush3.bf16.msra.mxu1 %v7349_v18  ;;  %v6031_v22 = vrot.slane %v4766_v50, 9  ;;  %v5291_v4 = vrot.slane %v8612_v14, 5  ;;  %v8633_v20 = vld [vmem:[#allocation3 + $0x8] sm:$0xf]  ;;  %v8635_v45 = vld [vmem:[#allocation3 + $0x2c] sm:$0x1] }
 0x2a6   : > { %6673 = vmatprep.subr.bf16.mxu1 %v7352_v7  ;;  %v4809_v63 = vrot.slane %v8619_v44, 5  ;;  %v5983_v62 = vrot.slane %v4750_v43, 9  ;;  %v4752_v18 = vld [vmem:[#allocation3 + $0x28] sm:$0xe]  ;;  %v4813_v34 = vrot.slane %v8622_v52, 5  ;;  %v4821_v29 = vrot.slane %v8635_v45, 5 }
 0x2a7   : > { %6657 = vmatprep.mubr.bf16.mxu1 %v5902_v19  ;;  %v5984_v19 = vrot.slane %v4751_v16, 9  ;;  %v5985_v10 = vrot.slane %v4752_v18, 9  ;;  %v4758_v8 = vld [vmem:[#allocation3 + $0x58] sm:$0xe]  ;;  %v4760_v39 = vld [vmem:[#allocation3 + $0x68] sm:$0xe] }
 0x2a8   : > { %6658 = vmatmul.mubr.bf16.gmra.mrb[12].mxu1 %v5903_v51  ;;  %v4753_v51 = vld [vmem:[#allocation3 + $0x30] sm:$0xe]  ;;  %v8687_v33 = vld [vmem:[#allocation3 + $0x64] sm:$0x1]  ;;  %v8698_v47 = vld [vmem:[#allocation3 + $0x74] sm:$0x1] }
 0x2a9   : > { %6674 = vmatpush3.bf16.msra.mxu1 %v7352_v7  ;;  %6677 = vmatprep.mubr.bf16.mxu1 %v5912_v38  ;;  %v8642_v7 = vld [vmem:[#allocation3 + $0x34] sm:$0x1]  ;;  %v8651_v38 = vld [vmem:[#allocation3 + $0x3c] sm:$0x1]  ;;  %v5986_v41 = vrot.slane %v4753_v51, 9  ;;  %v8695_v11 = vsel %vm8094_vm10, %v5985_v10, %v4821_v29  ;;  %v7368_v16 = vld [vmem:[#allocation9 + $0x40] sm:$0xff]  }
 0x2aa   : > { %6675 = vmatprep.subr.bf16.mxu1 %v7353_v54  ;;  %v4825_v60 = vrot.slane %v8642_v7, 5  ;;  %9193 = vst [vmem:[#allocation20_spill] sm:$0xff] %v8695_v11  ;;  %v4761_v36 = vld [vmem:[#allocation3 + $0x70] sm:$0xe]  ;;  %v4829_v18 = vrot.slane %v8651_v38, 5  ;;  %v5991_v10 = vrot.slane %v4760_v39, 9 }
 0x2ab   : > { %v4764_v50 = vld [vmem:[#allocation3 + $0x88] sm:$0xe]  ;;  %v8729_v39 = vld [vmem:[#allocation3 + $0x44] sm:$0x1] }
 0x2ac   : > { %v5995_v26 = vrot.slane %v4764_v50, 9 }
 0x2ad   : > { %6676 = vmatpush3.bf16.msra.mxu1 %v7353_v54  ;;  %v8649_v54 = vcombine.low %v8571_v21, %v8576_v49  ;;  %v7367_v21 = vld [vmem:[#allocation9 + $0x1b8] sm:$0xff]   ;;  %v8667_v49 = vld [vmem:[#allocation3 + $0x6c] sm:$0x1] }
 0x2ae   : > { %6693 = vmatprep.subr.bf16.mxu1 %v7354_v23  ;;  %v4845_v29 = vrot.slane %v8667_v49, 5 }
 0x2b0   : > { %6678 = vmatmul.mubr.bf16.vlgmr.msra.gmra.mrb[0].mxu1 %v8583_v56 }
 0x2b1   : > { %6681 = vmatprep.mubr.bf16.mxu1 %v8587_v48  ;;  %6694 = vmatpush3.bf16.msra.mxu1 %v7354_v23  ;;  %v8653_v23 = vld [vmem:[#allocation3 + $0x5c] sm:$0x1] }
 0x2b2   : > { %6695 = vmatprep.subr.bf16.mxu1 %v7356_v57 }
 0x2b5   : > { %6696 = vmatpush3.bf16.msra.mxu1 %v7356_v57  ;;  %v8657_v57 = vsel %vm8094_vm10, %v5982_v0, %v4809_v63 }
 0x2b6   : > { %6697 = vmatprep.subr.bf16.mxu1 %v7358_v37 }
 0x2b8   : > { %6682 = vmatmul.mubr.bf16.gmra.mrb[4].mxu1 %v8593_v15 }
 0x2b9   : > { %6685 = vmatprep.mubr.bf16.mxu1 %v5916_v2  ;;  %6698 = vmatpush3.bf16.msra.mxu1 %v7358_v37  ;;  %v4754_v37 = vld [vmem:[#allocation3 + $0x38] sm:$0xe]  ;;  %v8671_v2 = vsel %vm8094_vm10, %v5983_v62, %v4813_v34  ;;  %v5989_v34 = vrot.slane %v4758_v8, 9  ;;  %v4849_v8 = vrot.slane %v8698_v47, 5 }
 0x2ba   : > { %6699 = vmatprep.subr.bf16.mxu1 %v7360_v12  ;;  %9190 = vst [vmem:[#allocation18_spill] sm:$0xff] %v8671_v2  ;;  %v8677_v35 = vcombine.low %v8657_v57, %v8671_v2  ;;  %v5987_v63 = vrot.slane %v4754_v37, 9  ;;  %v4762_v62 = vld [vmem:[#allocation3 + $0x78] sm:$0xe]  ;;  %v8718_v37 = vld [vmem:[#allocation3 + $0x84] sm:$0x1] }
 0x2bb   : > { %v5079_v2 = vrot.slane %v8729_v39, 5 }
 0x2bd   : > { %6700 = vmatpush3.bf16.msra.mxu1 %v7360_v12  ;;  %v8665_v12 = vsel %vm8094_vm10, %v6030_v30, %v5287_v17  ;;  %v8682_v30 = vsel %vm8094_vm10, %v6031_v22, %v5291_v4  ;;  %v8708_v4 = vsel %vm8094_vm10, %v5986_v41, %v4825_v60  ;;  %v5992_v41 = vrot.slane %v4761_v36, 9  ;;  %v4763_v60 = vld [vmem:[#allocation3 + $0x80] sm:$0xe] }
 0x2be   : > { %6701 = vmatprep.subr.bf16.mxu1 %v7362_v9  ;;  %9189 = vst [vmem:[#allocation16_spill] sm:$0xff] %v8665_v12  ;;  %9191 = vst [vmem:[#allocation17_spill] sm:$0xff] %v8682_v30  ;;  %v8722_v22 = vsel %vm8094_vm10, %v5987_v63, %v4829_v18  ;;  %v8743_v18 = vsel %vm8094_vm10, %v5991_v10, %v4845_v29  ;;  %v5994_v27 = vrot.slane %v4763_v60, 9  ;;  %v7371_v60 = vld [vmem:[#allocation9 + $0x50] sm:$0xff]   ;;  %v9207_v29 = vshll.u32 %v8633_v20, 16 }
 0x2bf   : > { %9194 = vst [vmem:[#allocation21_spill] sm:$0xff] %v8708_v4  ;;  %9195 = vst [vmem:[#allocation14_spill] sm:$0xff] %v8722_v22  ;;  %v8733_v36 = vcombine.low %v8708_v4, %v8722_v22  ;;  %v3841_v4 = vld [vmem:[#allocation3 + $0x10] sm:$0xf]  ;;  %v3843_v12 = vld [vmem:[#allocation3 + $0x18] sm:$0xf] }
 0x2c0   : > { %6686 = vmatmul.mubr.bf16.gmra.mrb[8].mxu1 %v8607_v24  ;;  %9197 = vst [vmem:[#allocation22_spill] sm:$0xff] %v8743_v18 }
 0x2c1   : > { %6689 = vmatprep.mubr.bf16.mxu1 %v8615_v25  ;;  %6702 = vmatpush3.bf16.msra.mxu1 %v7362_v9  ;;  %v4817_v9 = vrot.slane %v8630_v5, 5 }
 0x2c2   : > { %6703 = vmatprep.subr.bf16.mxu1 %v7364_v13 }
 0x2c3   : > { %v8691_v43 = vsel %vm8094_vm10, %v5984_v19, %v4817_v9  ;;  %v4837_v19 = vrot.slane %v8653_v23, 5  ;;  %v4841_v9 = vrot.slane %v8687_v33, 5 }
 0x2c4   : > { %9192 = vst [vmem:[#allocation19_spill] sm:$0xff] %v8691_v43  ;;  %v8702_v0 = vcombine.low %v8691_v43, %v8695_v11  ;;  %v8759_v43 = vld [vmem:[#allocation3 + $0x94] sm:$0x1] }
 0x2c5   : > { %6704 = vmatpush3.bf16.msra.mxu1 %v7364_v13  ;;  %v4759_v13 = vld [vmem:[#allocation3 + $0x60] sm:$0xe]  ;;  %v8726_v28 = vsel %vm8094_vm10, %v5989_v34, %v4837_v19  ;;  %v8751_v19 = vsel %vm8094_vm10, %v5992_v41, %v4849_v8 }
 0x2c6   : > { %6705 = vmatprep.subr.bf16.mxu1 %v7366_v55  ;;  %v5990_v51 = vrot.slane %v4759_v13, 9  ;;  %v5993_v13 = vrot.slane %v4762_v62, 9  ;;  %v4755_v62 = vld [vmem:[#allocation3 + $0x40] sm:$0xe]  ;;  %9198 = vst [vmem:[#allocation23_spill] sm:$0xff] %v8751_v19 }
 0x2c7   : > { %v6012_v8 = vrot.slane %v4755_v62, 9  ;;  %v3249_v62 = vld [vmem:[#allocation3 + $0x48] sm:$0xf] }
 0x2c8   : > { %6690 = vmatmul.mubr.bf16.gmra.mrb[12].mxu1 %v8649_v54  ;;  %v8739_v63 = vsel %vm8094_vm10, %v5990_v51, %v4841_v9  ;;  %v4765_v51 = vld [vmem:[#allocation3 + $0x90] sm:$0xe]  ;;  %v4857_v9 = vrot.slane %v8718_v37, 5 }
 0x2c9   : > { %6706 = vmatpush3.bf16.msra.mxu1 %v7366_v55  ;;  %6709 = vmatprep.mubr.bf16.mxu1 %v8583_v56  ;;  %v8710_v55 = vld [vmem:[#allocation3 + $0x7c] sm:$0x1]  ;;  %v8712_v56 = vld [vmem:[#allocation3 + $0x8c] sm:$0x1]  ;;  %9196 = vst [vmem:[#allocation15_spill] sm:$0xff] %v8739_v63  ;;  %v8747_v34 = vcombine.low %v8739_v63, %v8743_v18  ;;  %v3887_v18 = vshll.u32 %v8598_v42, 16 }
 0x2ca   : > { %6707 = vmatprep.subr.bf16.mxu1 %v7367_v21  ;;  %v4853_v17 = vrot.slane %v8710_v55, 5  ;;  %v4861_v10 = vrot.slane %v8712_v56, 5  ;;  %v3993_v63 = vshll.u32 %v3857_v32, 16 }
 0x2cb   : > { %v3889_v22 = vrot.slane %v3887_v18, 5  ;;  %v7376_v18 = vld [vmem:[#allocation9 + $0x70] sm:$0xff]  }
 0x2cc   : > { %v8763_v41 = vsel %vm8094_vm10, %v5993_v13, %v4853_v17  ;;  %v8779_v17 = vsel %vm8094_vm10, %v5995_v26, %v4861_v10  ;;  %v6013_v13 = vrot.slane %v4765_v51, 9  ;;  %v5083_v10 = vrot.slane %v8759_v43, 5  ;;  %v7372_v51 = vld [vmem:[#allocation9 + $0x58] sm:$0xff]  }
 0x2cd   : > { %6708 = vmatpush3.bf16.msra.mxu1 %v7367_v21  ;;  %v7369_v21 = vld [vmem:[#allocation9 + $0x48] sm:$0xff]   ;;  %9199 = vst [vmem:[#allocation24_spill] sm:$0xff] %v8763_v41  ;;  %v8771_v50 = vcombine.low %v8751_v19, %v8763_v41  ;;  %9201 = vst [vmem:[#allocation26_spill] sm:$0xff] %v8779_v17 }
 0x2ce   : > { %6725 = vmatprep.subr.bf16.mxu1 %v7368_v16  ;;  %v8807_v26 = vsel %vm8094_vm10, %v6013_v13, %v5083_v10  ;;  %v3845_v13 = vld [vmem:[#allocation3 + $0x20] sm:$0xf] }
 0x2cf   : > { %9205 = vst [vmem:[#allocation28_spill] sm:$0xff] %v8807_v26  ;;  %v3937_v26 = vshll.u32 %v3845_v13, 16 }
 0x2d0   : > { %6710 = vmatmul.mubr.bf16.vlgmr.msra.gmra.mrb[0].mxu1 %v8587_v48  ;;  %v8775_v48 = vsel %vm8094_vm10, %v5994_v27, %v4857_v9  ;;  %v9204_v9 = vshll.u32 %v8596_v40, 16 }
 0x2d1   : > { %6713 = vmatprep.mubr.bf16.mxu1 %v8593_v15  ;;  %6726 = vmatpush3.bf16.msra.mxu1 %v7368_v16  ;;  %9200 = vst [vmem:[#allocation25_spill] sm:$0xff] %v8775_v48  ;;  %v8783_v15 = vcombine.low %v8775_v48, %v8779_v17  ;;  %v8787_v16 = vsel %vm8094_vm10, %v6012_v8, %v5079_v2  ;;  %v9203_v8 = vshrl.u32 %v8596_v40, 16  ;;  %v9206_v48 = vshrl.u32 %v8633_v20, 16  ;;  %v3847_v20 = vld [vmem:[#allocation3 + $0x28] sm:$0xf] }
 0x2d2   : > { %6727 = vmatprep.subr.bf16.mxu1 %v7369_v21  ;;  %9202 = vst [vmem:[#allocation27_spill] sm:$0xff] %v8787_v16  ;;  %v5928_v2 = vcombine.low %v8547_v61, %v3249_v62  ;;  %v3883_v19 = vrot.slane %v9204_v9, 5  ;;  %v3906_v62 = vshrl.u32 %v3841_v4, 16  ;;  %v3909_v9 = vshll.u32 %v3841_v4, 16 }
 0x2d3   : > { %v3880_v27 = vrot.slane %v9203_v8, 4  ;;  %v3894_v41 = vrot.slane %v9206_v48, 4  ;;  %v3920_v48 = vshrl.u32 %v3843_v12, 16  ;;  %v3923_v8 = vshll.u32 %v3843_v12, 16 }
 0x2d4   : > { %v3990_v17 = vshrl.u32 %v3857_v32, 16  ;;  %v3908_v40 = vrot.slane %v3906_v62, 4  ;;  %v3911_v30 = vrot.slane %v3909_v9, 5  ;;  %v3934_v4 = vshrl.u32 %v3845_v13, 16 }
 0x2d5   : > { %6728 = vmatpush3.bf16.msra.mxu1 %v7369_v21  ;;  %v3897_v21 = vrot.slane %v9207_v29, 5  ;;  %v3884_v10 = vor.u32 %v3883_v19, %v3880_v27  ;;  %v7373_v29 = vld [vmem:[#allocation9 + $0x60] sm:$0xff]   ;;  %v3948_v16 = vshrl.u32 %v3847_v20, 16  ;;  %v3925_v12 = vrot.slane %v3923_v8, 5  ;;  %v7374_v27 = vld [vmem:[#allocation9 + $0x68] sm:$0xff]  }
 0x2d6   : > { %6729 = vmatprep.subr.bf16.mxu1 %v7371_v60  ;;  %v3992_v42 = vrot.slane %v3990_v17, 4  ;;  %v3936_v32 = vrot.slane %v3934_v4, 4  ;;  %v3939_v62 = vrot.slane %v3937_v26, 5 }
 0x2d7   : > { %v3898_v61 = vor.u32 %v3897_v21, %v3894_v41  ;;  %v3885_v19 = vrot.slane %v3884_v10, 4  ;;  %v3995_v41 = vrot.slane %v3993_v63, 5  ;;  %v3912_v21 = vor.u32 %v3911_v30, %v3908_v40 }
 0x2d8   : > { %6714 = vmatmul.mubr.bf16.gmra.mrb[4].mxu1 %v5928_v2  ;;  %v3901_v2 = vshll.u32 %v8609_v58, 16  ;;  %v3915_v58 = vshll.u32 %v8619_v44, 16  ;;  %v3950_v13 = vrot.slane %v3948_v16, 4  ;;  %v3851_v44 = vld [vmem:[#allocation3 + $0x38] sm:$0xf] }
 0x2d9   : > { %6717 = vmatprep.mubr.bf16.mxu1 %v8607_v24  ;;  %6730 = vmatpush3.bf16.msra.mxu1 %v7371_v60  ;;  %v3951_v24 = vshll.u32 %v3847_v20, 16  ;;  %v3922_v60 = vrot.slane %v3920_v48, 4  ;;  %v3899_v11 = vrot.slane %v3898_v61, 4  ;;  %v3859_v48 = vld [vmem:[#allocation3 + $0x58] sm:$0xf]  ;;  %v3890_v30 = vsel %vm8103_vm11, %v3885_v19, %v3889_v22 }
 0x2da   : > { %6731 = vmatprep.subr.bf16.mxu1 %v7372_v51  ;;  %v3903_v9 = vrot.slane %v3901_v2, 5  ;;  %v3996_v17 = vor.u32 %v3995_v41, %v3992_v42  ;;  %v3259_v16 = vld [vmem:[#allocation3 + $0x98] sm:$0xf]  ;;  %v3913_v26 = vrot.slane %v3912_v21, 4  ;;  %v3940_v61 = vor.u32 %v3939_v62, %v3936_v32 }
 0x2db   : > { %v3953_v20 = vrot.slane %v3951_v24, 5  ;;  %v3926_v10 = vor.u32 %v3925_v12, %v3922_v60  ;;  %v3917_v8 = vrot.slane %v3915_v58, 5  ;;  %v4004_v4 = vshrl.u32 %v3859_v48, 16  ;;  %v7377_v12 = vld [vmem:[#allocation9 + $0x78] sm:$0xff]  }
 0x2dc   : > { %v8827_v63 = vsel %vm8103_vm11, %v3899_v11, %v3903_v9  ;;  %v4007_v2 = vshll.u32 %v3859_v48, 16  ;;  %v3943_v22 = vshll.u32 %v8630_v5, 16  ;;  %v3976_v19 = vshrl.u32 %v3851_v44, 16 }
 0x2dd   : > { %6732 = vmatpush3.bf16.msra.mxu1 %v7372_v51  ;;  %v3849_v51 = vld [vmem:[#allocation3 + $0x30] sm:$0xf]  ;;  %v3927_v24 = vrot.slane %v3926_v10, 4  ;;  %v3979_v11 = vshll.u32 %v3851_v44, 16  ;;  %v5929_v60 = vcombine.low %v8573_v1, %v3259_v16  ;;  %v3957_v41 = vshll.u32 %v8635_v45, 16 }
 0x2de   : > { %6733 = vmatprep.subr.bf16.mxu1 %v7373_v29  ;;  %v3965_v40 = vshll.u32 %v3849_v51, 16  ;;  %v8836_v21 = vsel %vm8103_vm11, %v3913_v26, %v3917_v8  ;;  %v3941_v32 = vrot.slane %v3940_v61, 4  ;;  %v4006_v9 = vrot.slane %v4004_v4, 4  ;;  %v3867_v10 = vld [vmem:[#allocation3 + $0x78] sm:$0xf] }
 0x2df   : > { %v4009_v58 = vrot.slane %v4007_v2, 5  ;;  %v3978_v45 = vrot.slane %v3976_v19, 4  ;;  %v8846_v44 = vrot.slane %v3996_v17, 4  ;;  %v3863_v16 = vld [vmem:[#allocation3 + $0x68] sm:$0xf]  ;;  %v4060_v2 = vshrl.u32 %v3867_v10, 16 }
 0x2e0   : > { %6718 = vmatmul.mubr.bf16.gmra.mrb[8].mxu1 %v8615_v25  ;;  %v3929_v25 = vshll.u32 %v8622_v52, 16  ;;  %v5938_v52 = vcombine.low %v3890_v30, %v8827_v63  ;;  %v3967_v62 = vrot.slane %v3965_v40, 5  ;;  %v7378_v30 = vld [vmem:[#allocation9 + $0x100] sm:$0xff]   ;;  %v3865_v8 = vld [vmem:[#allocation3 + $0x70] sm:$0xf]  ;;  %v3971_v17 = vshll.u32 %v8642_v7, 16 }
 0x2e1   : > { %6721 = vmatprep.mubr.bf16.mxu1 %v8649_v54  ;;  %6734 = vmatpush3.bf16.msra.mxu1 %v7373_v29  ;;  %v3962_v54 = vshrl.u32 %v3849_v51, 16  ;;  %v3954_v29 = vor.u32 %v3953_v20, %v3950_v13  ;;  %v3861_v13 = vld [vmem:[#allocation3 + $0x60] sm:$0xf]  ;;  %v3945_v20 = vrot.slane %v3943_v22, 5  ;;  %v3981_v51 = vrot.slane %v3979_v11, 5  ;;  %v7379_v11 = vld [vmem:[#allocation9 + $0x108] sm:$0xff]  }
 0x2e2   : > { %6735 = vmatprep.subr.bf16.mxu1 %v7374_v27  ;;  %v3931_v42 = vrot.slane %v3929_v25, 5  ;;  %v3959_v25 = vrot.slane %v3957_v41, 5  ;;  %v4021_v40 = vshll.u32 %v3861_v13, 16  ;;  %v4010_v4 = vor.u32 %v4009_v58, %v4006_v9 }
 0x2e3   : > { %v3955_v5 = vrot.slane %v3954_v29, 4  ;;  %v8851_v26 = vsel %vm8103_vm11, %v3941_v32, %v3945_v20  ;;  %v4032_v22 = vshrl.u32 %v3863_v16, 16  ;;  %v4035_v19 = vshll.u32 %v3863_v16, 16  ;;  %v7380_v20 = vld [vmem:[#allocation9 + $0x110] sm:$0xff]  }
 0x2e4   : > { %v8840_v1 = vsel %vm8103_vm11, %v3927_v24, %v3931_v42  ;;  %v4063_v24 = vshll.u32 %v3867_v10, 16  ;;  %v4046_v42 = vshrl.u32 %v3865_v8, 16  ;;  %v4049_v41 = vshll.u32 %v3865_v8, 16 }
 0x2e5   : > { %6736 = vmatpush3.bf16.msra.mxu1 %v7374_v27  ;;  %v3964_v27 = vrot.slane %v3962_v54, 4  ;;  %v8844_v48 = vcombine.low %v8836_v21, %v8840_v1  ;;  %v4018_v54 = vshrl.u32 %v3861_v13, 16  ;;  %v8855_v29 = vsel %vm8103_vm11, %v3955_v5, %v3959_v25  ;;  %v3869_v13 = vld [vmem:[#allocation3 + $0x80] sm:$0xf] }
 0x2e6   : > { %6737 = vmatprep.subr.bf16.mxu1 %v7376_v18  ;;  %v8862_v32 = vcombine.low %v8851_v26, %v8855_v29  ;;  %v4011_v5 = vrot.slane %v4010_v4, 4  ;;  %v4062_v9 = vrot.slane %v4060_v2, 4  ;;  %v4065_v58 = vrot.slane %v4063_v24, 5 }
 0x2e7   : > { %v3968_v61 = vor.u32 %v3967_v62, %v3964_v27  ;;  %v4020_v62 = vrot.slane %v4018_v54, 4  ;;  %v4048_v16 = vrot.slane %v4046_v42, 4  ;;  %v3871_v54 = vld [vmem:[#allocation3 + $0x88] sm:$0xf]  ;;  %v4074_v8 = vshrl.u32 %v3869_v13, 16 }
 0x2e8   : > { %6722 = vmatmul.mubr.bf16.gmra.mrb[12].mxu1 %v5929_v60  ;;  %v3985_v60 = vshll.u32 %v8651_v38, 16  ;;  %v3973_v38 = vrot.slane %v3971_v17, 5  ;;  %v4077_v4 = vshll.u32 %v3869_v13, 16  ;;  %v4027_v24 = vshll.u32 %v8687_v33, 16 }
 0x2e9   : > { %6738 = vmatpush3.bf16.msra.mxu1 %v7376_v18  ;;  %6741 = vmatprep.mubr.bf16.mxu1 %v5938_v52  ;;  %v3999_v18 = vshll.u32 %v8601_v53, 16  ;;  %v3982_v53 = vor.u32 %v3981_v51, %v3978_v45  ;;  %v4013_v52 = vshll.u32 %v8653_v23, 16  ;;  %v3969_v27 = vrot.slane %v3968_v61, 4 }
 0x2ea   : > { %6739 = vmatprep.subr.bf16.mxu1 %v7377_v12  ;;  %v4034_v45 = vrot.slane %v4032_v22, 4  ;;  %v4037_v51 = vrot.slane %v4035_v19, 5  ;;  %v3987_v10 = vrot.slane %v3985_v60, 5  ;;  %v4051_v61 = vrot.slane %v4049_v41, 5 }
 0x2eb   : > { %v4001_v7 = vrot.slane %v3999_v18, 5  ;;  %v3983_v23 = vrot.slane %v3982_v53, 4  ;;  %v4015_v25 = vrot.slane %v4013_v52, 5  ;;  %v8868_v18 = vsel %vm8103_vm11, %v3969_v27, %v3973_v38 }
 0x2ec   : > { %v4066_v17 = vor.u32 %v4065_v58, %v4062_v9  ;;  %v4038_v22 = vor.u32 %v4037_v51, %v4034_v45  ;;  %v4088_v19 = vshrl.u32 %v3871_v54, 16  ;;  %v4091_v60 = vshll.u32 %v3871_v54, 16 }
 0x2ed   : > { %6740 = vmatpush3.bf16.msra.mxu1 %v7377_v12  ;;  %v4023_v12 = vrot.slane %v4021_v40, 5  ;;  %v8875_v2 = vsel %vm8103_vm11, %v4011_v5, %v4015_v25  ;;  %v8880_v53 = vsel %vm8103_vm11, %v3983_v23, %v3987_v10  ;;  %v4041_v42 = vshll.u32 %v8667_v49, 16  ;;  %v7382_v49 = vld [vmem:[#allocation9 + $0x120] sm:$0xff]  }
 0x2ee   : > { %6757 = vmatprep.subr.bf16.mxu1 %v7378_v30  ;;  %v8884_v52 = vcombine.low %v8868_v18, %v8880_v53  ;;  %v4052_v41 = vor.u32 %v4051_v61, %v4048_v16  ;;  %v4069_v33 = vshll.u32 %v8710_v55, 16  ;;  %v4067_v5 = vrot.slane %v4066_v17, 4 }
 0x2ef   : > { %v4024_v40 = vor.u32 %v4023_v12, %v4020_v62  ;;  %v4076_v62 = vrot.slane %v4074_v8, 4  ;;  %v4079_v12 = vrot.slane %v4077_v4, 5  ;;  %v4029_v9 = vrot.slane %v4027_v24, 5  ;;  %v7383_v8 = vld [vmem:[#allocation9 + $0x128] sm:$0xff]  }
 0x2f0   : > { %6742 = vmatmul.mubr.bf16.vlgmr.msra.gmra.mrb[0].mxu1 %v8844_v48  ;;  %v4039_v58 = vrot.slane %v4038_v22, 4  ;;  %v4090_v13 = vrot.slane %v4088_v19, 4  ;;  %v4093_v38 = vrot.slane %v4091_v60, 5  ;;  %v4053_v23 = vrot.slane %v4052_v41, 4  ;;  %v7384_v19 = vld [vmem:[#allocation9 + $0x130] sm:$0xff]  }
 0x2f1   : > { %6745 = vmatprep.mubr.bf16.mxu1 %v8862_v32  ;;  %6758 = vmatpush3.bf16.msra.mxu1 %v7378_v30  ;;  %v4002_v30 = vsel %vm8103_vm11, %v8846_v44, %v4001_v7  ;;  %v7381_v44 = vld [vmem:[#allocation9 + $0x118] sm:$0xff]   ;;  %v4025_v27 = vrot.slane %v4024_v40, 4  ;;  %v4055_v7 = vshll.u32 %v8698_v47, 16  ;;  %v4071_v55 = vrot.slane %v4069_v33, 5 }
 0x2f2   : > { %6759 = vmatprep.subr.bf16.mxu1 %v7379_v11  ;;  %v4043_v51 = vrot.slane %v4041_v42, 5  ;;  %v4080_v10 = vor.u32 %v4079_v12, %v4076_v62  ;;  %v4083_v16 = vshll.u32 %v8718_v37, 16  ;;  %v4094_v61 = vor.u32 %v4093_v38, %v4090_v13  ;;  %v3853_v37 = vld [vmem:[#allocation3 + $0x40] sm:$0xf]  ;;  %v7387_v13 = vld [vmem:[#allocation9 + $0x1c8] sm:$0xff]  }
 0x2f3   : > { %v8893_v45 = vsel %vm8103_vm11, %v4025_v27, %v4029_v9  ;;  %v4057_v25 = vrot.slane %v4055_v7, 5  ;;  %v8897_v47 = vsel %vm8103_vm11, %v4067_v5, %v4071_v55  ;;  %v4097_v24 = vshll.u32 %v8712_v56, 16  ;;  %v7386_v7 = vld [vmem:[#allocation9 + $0x1c0] sm:$0xff]   ;;  %v3873_v38 = vld [vmem:[#allocation3 + $0x90] sm:$0xf] }
 0x2f4   : > { %v4085_v17 = vrot.slane %v4083_v16, 5  ;;  %v4095_v22 = vrot.slane %v4094_v61, 4  ;;  %v4312_v42 = vshrl.u32 %v3853_v37, 16  ;;  %v4315_v41 = vshll.u32 %v3853_v37, 16  ;;  %v7392_v37 = vld [vmem:[#allocation9 + $0x1f0] sm:$0xff]  }
 0x2f5   : > { %6760 = vmatpush3.bf16.msra.mxu1 %v7379_v11  ;;  %v5942_v11 = vcombine.low %v4002_v30, %v8875_v2  ;;  %v8910_v40 = vsel %vm8103_vm11, %v4053_v23, %v4057_v25  ;;  %v4081_v30 = vrot.slane %v4080_v10, 4  ;;  %v5954_v27 = vcombine.low %v8827_v63, %v8836_v21  ;;  %v7388_v23 = vld [vmem:[#allocation9 + $0x1d0] sm:$0xff]   ;;  %v7390_v25 = vld [vmem:[#allocation9 + $0x1e0] sm:$0xff]  }
 0x2f6   : > { %6761 = vmatprep.subr.bf16.mxu1 %v7380_v20  ;;  %v8914_v4 = vcombine.low %v8910_v40, %v8897_v47  ;;  %v4314_v62 = vrot.slane %v4312_v42, 4  ;;  %v4317_v12 = vrot.slane %v4315_v41, 5  ;;  %v4321_v9 = vshll.u32 %v8729_v39, 16  ;;  %v7395_v41 = vld [vmem:[#allocation9 + $0x88] sm:$0xff]  }
 0x2f7   : > { %v4086_v60 = vsel %vm8103_vm11, %v4081_v30, %v4085_v17  ;;  %v5956_v63 = vcombine.low %v8855_v29, %v8868_v18  ;;  %v4326_v39 = vshrl.u32 %v3873_v38, 16  ;;  %v5958_v29 = vcombine.low %v8875_v2, %v8893_v45  ;;  %v3855_v2 = vld [vmem:[#allocation3 + $0x48] sm:$0xf] }
 0x2f8   : > { %6746 = vmatmul.mubr.bf16.gmra.mrb[4].mxu1 %v8884_v52  ;;  %v4318_v5 = vor.u32 %v4317_v12, %v4314_v62  ;;  %v4335_v61 = vshll.u32 %v8759_v43, 16  ;;  %v5960_v30 = vcombine.low %v8897_v47, %v4086_v60  ;;  %v4539_v43 = vshll.u32 %v3855_v2, 16  ;;  %v7396_v62 = vld [vmem:[#allocation9 + $0x90] sm:$0xff]  }
 0x2f9   : > { %6749 = vmatprep.mubr.bf16.mxu1 %v5942_v11  ;;  %6762 = vmatpush3.bf16.msra.mxu1 %v7380_v20  ;;  %v8901_v20 = vsel %vm8103_vm11, %v4039_v58, %v4043_v51  ;;  %v7385_v11 = vld [vmem:[#allocation9 + $0x138] sm:$0xff]   ;;  %v5955_v58 = vcombine.low %v8840_v1, %v8851_v26  ;;  %v4329_v51 = vshll.u32 %v3873_v38, 16  ;;  %v4328_v18 = vrot.slane %v4326_v39, 4 }
 0x2fa   : > { %6763 = vmatprep.subr.bf16.mxu1 %v7381_v44  ;;  %v8906_v54 = vcombine.low %v8893_v45, %v8901_v20  ;;  %v4319_v21 = vrot.slane %v4318_v5, 4  ;;  %v7389_v26 = vld [vmem:[#allocation9 + $0x1d8] sm:$0xff]   ;;  %v4337_v45 = vrot.slane %v4335_v61, 5  ;;  %v4541_v47 = vrot.slane %v4539_v43, 5  ;;  %v7415_v43 = vld [vmem:[#allocation9 + $0x228] sm:$0xff]  }
 0x2fb   : > { %v4331_v10 = vrot.slane %v4329_v51, 5  ;;  %v4545_v42 = vshll.u32 %v8603_v6, 16  ;;  %v7397_v5 = vld [vmem:[#allocation9 + $0x98] sm:$0xff]   ;;  %v7406_v51 = vld [vmem:[#allocation9 + $0x160] sm:$0xff]  }
 0x2fc   : > { %v7405_v39 = vld [vmem:[#allocation9 + $0x158] sm:$0xff]  }
 0x2fd   : > { %6764 = vmatpush3.bf16.msra.mxu1 %v7381_v44  ;;  %v4099_v44 = vrot.slane %v4097_v24, 5  ;;  %v4332_v16 = vor.u32 %v4331_v10, %v4328_v18  ;;  %v7410_v18 = vld [vmem:[#allocation9 + $0x200] sm:$0xff]   ;;  %v7411_v10 = vld [vmem:[#allocation9 + $0x208] sm:$0xff]  }
 0x2fe   : > { %6765 = vmatprep.subr.bf16.mxu1 %v7382_v49 }
 0x2ff   : > { %v8923_v56 = vsel %vm8103_vm11, %v4095_v22, %v4099_v44  ;;  %v4333_v24 = vrot.slane %v4332_v16, 4  ;;  %v4536_v22 = vshrl.u32 %v3855_v2, 16  ;;  %v9212_v16 = vld [vmem:[#allocation19_spill] sm:$0xff] }
 0x300   : > { %6750 = vmatmul.mubr.bf16.gmra.mrb[8].mxu1 %v8906_v54  ;;  %v8926_v33 = vcombine.low %v4086_v60, %v8923_v56  ;;  %v7394_v60 = vld [vmem:[#allocation9 + $0x80] sm:$0xff]   ;;  %v9218_v2 = vld [vmem:[#allocation27_spill] sm:$0xff] }
 0x301   : > { %6753 = vmatprep.mubr.bf16.mxu1 %v8914_v4  ;;  %6766 = vmatpush3.bf16.msra.mxu1 %v7382_v49  ;;  %v4323_v49 = vrot.slane %v4321_v9, 5  ;;  %v4338_v17 = vsel %vm8103_vm11, %v4333_v24, %v4337_v45  ;;  %v7412_v24 = vld [vmem:[#allocation9 + $0x210] sm:$0xff]  }
 0x302   : > { %6767 = vmatprep.subr.bf16.mxu1 %v7383_v8 }
 0x303   : > { %v4324_v55 = vsel %vm8103_vm11, %v4319_v21, %v4323_v49  ;;  %v7400_v49 = vld [vmem:[#allocation9 + $0xb0] sm:$0xff]  }
 0x304   : > { %v5957_v1 = vcombine.low %v8880_v53, %v4324_v55  ;;  %v7391_v53 = vld [vmem:[#allocation9 + $0x1e8] sm:$0xff]  }
 0x305   : > { %6768 = vmatpush3.bf16.msra.mxu1 %v7383_v8  ;;  %v5959_v8 = vcombine.low %v8901_v20, %v8910_v40  ;;  %v5961_v20 = vcombine.low %v8923_v56, %v4338_v17  ;;  %v7393_v40 = vld [vmem:[#allocation9 + $0x1f8] sm:$0xff]  }
 0x306   : > { %6769 = vmatprep.subr.bf16.mxu1 %v7384_v19  ;;  %v3875_v56 = vld [vmem:[#allocation3 + $0x98] sm:$0xf] }
 0x307   : > { %v4550_v12 = vshrl.u32 %v3875_v56, 16 }
 0x308   : > { %6754 = vmatmul.mubr.bf16.gmra.mrb[12].mxu1 %v8926_v33 }
 0x309   : > { %6770 = vmatpush3.bf16.msra.mxu1 %v7384_v19  ;;  %6773 = vmatprep.mubr.bf16.mxu1 %v5954_v27  ;;  %v4538_v19 = vrot.slane %v4536_v22, 4  ;;  %v4547_v27 = vrot.slane %v4545_v42, 5  ;;  %v4552_v9 = vrot.slane %v4550_v12, 4  ;;  %v7414_v22 = vld [vmem:[#allocation9 + $0x220] sm:$0xff]   ;;  %v7416_v42 = vld [vmem:[#allocation9 + $0x230] sm:$0xff]  }
 0x30a   : > { %6771 = vmatprep.subr.bf16.mxu1 %v7385_v11  ;;  %v5502_v12 = vld [vmem:[%s7787_s6 + $0x10] sm:$0xff] }
 0x30b   : > { %v4542_v44 = vor.u32 %v4541_v47, %v4538_v19  ;;  %v9225_v47 = vld [vmem:[#allocation24_spill] sm:$0xff] }
 0x30d   : > { %6772 = vmatpush3.bf16.msra.mxu1 %v7385_v11  ;;  %v4543_v11 = vrot.slane %v4542_v44, 4 }
 0x30e   : > { %6789 = vmatprep.subr.bf16.mxu1 %v7386_v7 }
 0x310   : > { %6774 = vmatmul.mubr.bf16.vlgmr.msra.gmra.mrb[0].mxu1 %v5955_v58 }
 0x311   : > { %6777 = vmatprep.mubr.bf16.mxu1 %v5956_v63  ;;  %6790 = vmatpush3.bf16.msra.mxu1 %v7386_v7  ;;  %v4553_v7 = vshll.u32 %v3875_v56, 16  ;;  %v7399_v63 = vld [vmem:[#allocation9 + $0xa8] sm:$0xff]   ;;  %v9231_v56 = vld [vmem:[#allocation16_spill] sm:$0xff] }
 0x312   : > { %6791 = vmatprep.subr.bf16.mxu1 %v7387_v13 }
 0x313   : > { %v4555_v58 = vrot.slane %v4553_v7, 5 }
 0x315   : > { %6792 = vmatpush3.bf16.msra.mxu1 %v7387_v13  ;;  %v4559_v13 = vshll.u32 %v8612_v14, 16  ;;  %v9208_v14 = vcombine.low %v8626_v31, %v8639_v3  ;;  %v9209_v31 = vcombine.low %v8661_v46, %v8726_v28  ;;  %v9210_v46 = vcombine.low %v8639_v3, %v8657_v57  ;;  %v7413_v3 = vld [vmem:[#allocation9 + $0x218] sm:$0xff]   ;;  %v9217_v57 = vld [vmem:[#allocation14_spill] sm:$0xff] }
 0x316   : > { %6793 = vmatprep.subr.bf16.mxu1 %v7388_v23  ;;  %v9219_v45 = vcombine.low %v9217_v57, %v9218_v2  ;;  %v5510_v57 = vld [vmem:[%s7787_s6 + $0x50] sm:$0xff] }
 0x317   : > { %v4561_v38 = vrot.slane %v4559_v13, 5 }
 0x318   : > { %6778 = vmatmul.mubr.bf16.gmra.mrb[4].mxu1 %v5957_v1  ;;  %v7407_v1 = vld [vmem:[#allocation9 + $0x168] sm:$0xff]  }
 0x319   : > { %6781 = vmatprep.mubr.bf16.mxu1 %v5958_v29  ;;  %6794 = vmatpush3.bf16.msra.mxu1 %v7388_v23  ;;  %v7409_v29 = vld [vmem:[#allocation9 + $0x178] sm:$0xff]  }
 0x31a   : > { %6795 = vmatprep.subr.bf16.mxu1 %v7389_v26 }
 0x31d   : > { %6796 = vmatpush3.bf16.msra.mxu1 %v7389_v26  ;;  %v7408_v26 = vld [vmem:[#allocation9 + $0x170] sm:$0xff]  }
 0x31e   : > { %6797 = vmatprep.subr.bf16.mxu1 %v7390_v25 }
 0x320   : > { %6782 = vmatmul.mubr.bf16.gmra.mrb[8].mxu1 %v5959_v8  ;;  %v9214_v8 = vld [vmem:[#allocation20_spill] sm:$0xff] }
 0x321   : > { %6785 = vmatprep.mubr.bf16.mxu1 %v5960_v30  ;;  %6798 = vmatpush3.bf16.msra.mxu1 %v7390_v25  ;;  %v9211_v25 = vld [vmem:[#allocation18_spill] sm:$0xff] }
 0x322   : > { %6799 = vmatprep.subr.bf16.mxu1 %v7391_v53  ;;  %v9213_v61 = vcombine.low %v9211_v25, %v9212_v16 }
 0x325   : > { %6800 = vmatpush3.bf16.msra.mxu1 %v7391_v53  ;;  %v9215_v53 = vld [vmem:[#allocation21_spill] sm:$0xff] }
 0x326   : > { %6801 = vmatprep.subr.bf16.mxu1 %v7392_v37  ;;  %v9216_v30 = vcombine.low %v9214_v8, %v9215_v53 }
 0x328   : > { %6786 = vmatmul.mubr.bf16.gmra.mrb[12].mxu1 %v5961_v20  ;;  %v9222_v20 = vld [vmem:[#allocation22_spill] sm:$0xff] }
 0x329   : > { %6802 = vmatpush3.bf16.msra.mxu1 %v7392_v37  ;;  %6805 = vmatprep.mubr.bf16.mxu1 %v8844_v48  ;;  %v4548_v48 = vsel %vm8103_vm11, %v4543_v11, %v4547_v27  ;;  %v9220_v37 = vld [vmem:[#allocation15_spill] sm:$0xff]  ;;  %v9229_v11 = vld [vmem:[#allocation28_spill] sm:$0xff] }
 0x32a   : > { %6803 = vmatprep.subr.bf16.mxu1 %v7393_v40  ;;  %v5970_v6 = vcombine.low %v4324_v55, %v4548_v48  ;;  %v7401_v55 = vld [vmem:[#allocation9 + $0xb8] sm:$0xff]  }
 0x32d   : > { %6804 = vmatpush3.bf16.msra.mxu1 %v7393_v40  ;;  %v9223_v40 = vld [vmem:[#allocation23_spill] sm:$0xff] }
 0x32e   : > { %6821 = vmatprep.subr.bf16.mxu1 %v7394_v60  ;;  %v9224_v19 = vcombine.low %v9222_v20, %v9223_v40 }
 0x330   : > { %6806 = vmatmul.mubr.bf16.vlgmr.msra.gmra.mrb[0].mxu1 %v8862_v32  ;;  %v7398_v32 = vld [vmem:[#allocation9 + $0xa0] sm:$0xff]  }
 0x331   : > { %6809 = vmatprep.mubr.bf16.mxu1 %v8884_v52  ;;  %6822 = vmatpush3.bf16.msra.mxu1 %v7394_v60  ;;  %v4556_v52 = vor.u32 %v4555_v58, %v4552_v9  ;;  %v9226_v60 = vld [vmem:[#allocation25_spill] sm:$0xff] }
 0x332   : > { %6823 = vmatprep.subr.bf16.mxu1 %v7395_v41  ;;  %v9227_v44 = vcombine.low %v9225_v47, %v9226_v60  ;;  %v5509_v47 = vld [vmem:[%s7787_s6 + $0x48] sm:$0xff] }
 0x333   : > { %v4557_v21 = vrot.slane %v4556_v52, 4  ;;  %v5501_v52 = vld [vmem:[%s7787_s6 + $0x8] sm:$0xff] }
 0x335   : > { %6824 = vmatpush3.bf16.msra.mxu1 %v7395_v41  ;;  %v9228_v41 = vld [vmem:[#allocation26_spill] sm:$0xff] }
 0x336   : > { %6825 = vmatprep.subr.bf16.mxu1 %v7396_v62  ;;  %v9230_v27 = vcombine.low %v9228_v41, %v9229_v11 }
 0x338   : > { %6810 = vmatmul.mubr.bf16.gmra.mrb[4].mxu1 %v5970_v6  ;;  %v5500_v6 = vld [vmem:[%s7787_s6] sm:$0xff] }
 0x339   : > { %6813 = vmatprep.mubr.bf16.mxu1 %v8906_v54  ;;  %6826 = vmatpush3.bf16.msra.mxu1 %v7396_v62  ;;  %v4562_v54 = vsel %vm8103_vm11, %v4557_v21, %v4561_v38  ;;  %v9232_v62 = vcombine.low %v9218_v2, %v9231_v56 }
 0x33a   : > { %6827 = vmatprep.subr.bf16.mxu1 %v7397_v5  ;;  %v5971_v23 = vcombine.low %v4338_v17, %v4562_v54  ;;  %v9221_v17 = vcombine.low %v8726_v28, %v9220_v37  ;;  %v7417_v28 = vld [vmem:[#allocation9 + $0x238] sm:$0xff]   ;;  %v5508_v37 = vld [vmem:[%s7787_s6 + $0x40] sm:$0xff] }
 0x33d   : > { %6828 = vmatpush3.bf16.msra.mxu1 %v7397_v5 }
 0x33e   : > { %6829 = vmatprep.subr.bf16.mxu1 %v7398_v32 }
 0x340   : > { %6814 = vmatmul.mubr.bf16.gmra.mrb[8].mxu1 %v8914_v4  ;;  %v7402_v4 = vld [vmem:[#allocation9 + $0x140] sm:$0xff]  }
 0x341   : > { %6817 = vmatprep.mubr.bf16.mxu1 %v8926_v33  ;;  %6830 = vmatpush3.bf16.msra.mxu1 %v7398_v32  ;;  %v7403_v33 = vld [vmem:[#allocation9 + $0x148] sm:$0xff]  }
 0x342   : > { %6831 = vmatprep.subr.bf16.mxu1 %v7399_v63 }
 0x345   : > { %6832 = vmatpush3.bf16.msra.mxu1 %v7399_v63 }
 0x346   : > { %6833 = vmatprep.subr.bf16.mxu1 %v7400_v49 }
 0x348   : > { %6818 = vmatmul.mubr.bf16.gmra.mrb[12].mxu1 %v5971_v23 }
 0x349   : > { %6834 = vmatpush3.bf16.msra.mxu1 %v7400_v49  ;;  %6837 = vmatprep.mubr.bf16.mxu1 %v9208_v14 }
 0x34a   : > { %6835 = vmatprep.subr.bf16.mxu1 %v7401_v55 }
 0x34d   : > { %6836 = vmatpush3.bf16.msra.mxu1 %v7401_v55 }
 0x34e   : > { %6853 = vmatprep.subr.bf16.mxu1 %v7402_v4 }
 0x350   : > { %6838 = vmatmul.mubr.bf16.vlgmr.msra.gmra.mrb[0].mxu1 %v8677_v35 }
 0x351   : > { %6841 = vmatprep.mubr.bf16.mxu1 %v8702_v0  ;;  %6854 = vmatpush3.bf16.msra.mxu1 %v7402_v4  ;;  %v5506_v4 = vld [vmem:[%s7787_s6 + $0x30] sm:$0xff] }
 0x352   : > { %6855 = vmatprep.subr.bf16.mxu1 %v7403_v33 }
 0x355   : > { %6856 = vmatpush3.bf16.msra.mxu1 %v7403_v33 }
 0x356   : > { %6857 = vmatprep.subr.bf16.mxu1 %v7404_v59 }
 0x358   : > { %6842 = vmatmul.mubr.bf16.gmra.mrb[4].mxu1 %v8733_v36 }
 0x359   : > { %6845 = vmatprep.mubr.bf16.mxu1 %v9209_v31  ;;  %6858 = vmatpush3.bf16.msra.mxu1 %v7404_v59 }
 0x35a   : > { %6859 = vmatprep.subr.bf16.mxu1 %v7405_v39 }
 0x35d   : > { %6860 = vmatpush3.bf16.msra.mxu1 %v7405_v39  ;;  %v5504_v39 = vld [vmem:[%s7787_s6 + $0x20] sm:$0xff] }
 0x35e   : > { %6861 = vmatprep.subr.bf16.mxu1 %v7406_v51 }
 0x360   : > { %6846 = vmatmul.mubr.bf16.gmra.mrb[8].mxu1 %v8747_v34 }
 0x361   : > { %6849 = vmatprep.mubr.bf16.mxu1 %v8771_v50  ;;  %6862 = vmatpush3.bf16.msra.mxu1 %v7406_v51 }
 0x362   : > { %6863 = vmatprep.subr.bf16.mxu1 %v7407_v1 }
 0x365   : > { %6864 = vmatpush3.bf16.msra.mxu1 %v7407_v1  ;;  %v5507_v1 = vld [vmem:[%s7787_s6 + $0x38] sm:$0xff] }
 0x366   : > { %6865 = vmatprep.subr.bf16.mxu1 %v7408_v26 }
 0x368   : > { %6850 = vmatmul.mubr.bf16.gmra.mrb[12].mxu1 %v8783_v15 }
 0x369   : > { %6866 = vmatpush3.bf16.msra.mxu1 %v7408_v26  ;;  %6869 = vmatprep.mubr.bf16.mxu1 %v9210_v46 }
 0x36a   : > { %6867 = vmatprep.subr.bf16.mxu1 %v7409_v29 }
 0x36d   : > { %6868 = vmatpush3.bf16.msra.mxu1 %v7409_v29 }
 0x36e   : > { %6885 = vmatprep.subr.bf16.mxu1 %v7410_v18 }
 0x370   : > { %6870 = vmatmul.mubr.bf16.vlgmr.msra.gmra.mrb[0].mxu1 %v9213_v61 }
 0x371   : > { %6873 = vmatprep.mubr.bf16.mxu1 %v9216_v30  ;;  %6886 = vmatpush3.bf16.msra.mxu1 %v7410_v18  ;;  %v5505_v18 = vld [vmem:[%s7787_s6 + $0x28] sm:$0xff] }
 0x372   : > { %6887 = vmatprep.subr.bf16.mxu1 %v7411_v10 }
 0x375   : > { %6888 = vmatpush3.bf16.msra.mxu1 %v7411_v10 }
 0x376   : > { %6889 = vmatprep.subr.bf16.mxu1 %v7412_v24 }
 0x378   : > { %6874 = vmatmul.mubr.bf16.gmra.mrb[4].mxu1 %v9219_v45 }
 0x379   : > { %6877 = vmatprep.mubr.bf16.mxu1 %v9221_v17  ;;  %6890 = vmatpush3.bf16.msra.mxu1 %v7412_v24 }
 0x37a   : > { %6891 = vmatprep.subr.bf16.mxu1 %v7413_v3 }
 0x37d   : > { %6892 = vmatpush3.bf16.msra.mxu1 %v7413_v3 }
 0x37e   : > { %6893 = vmatprep.subr.bf16.mxu1 %v7414_v22 }
 0x380   : > { %6878 = vmatmul.mubr.bf16.gmra.mrb[8].mxu1 %v9224_v19 }
 0x381   : > { %6881 = vmatprep.mubr.bf16.mxu1 %v9227_v44  ;;  %6894 = vmatpush3.bf16.msra.mxu1 %v7414_v22 }
 0x382   : > { %6895 = vmatprep.subr.bf16.mxu1 %v7415_v43 }
 0x385   : > { %6896 = vmatpush3.bf16.msra.mxu1 %v7415_v43  ;;  %v5511_v43 = vld [vmem:[%s7787_s6 + $0x58] sm:$0xff] }
 0x386   : > { %6897 = vmatprep.subr.bf16.mxu1 %v7416_v42 }
 0x388   : > { %6882 = vmatmul.mubr.bf16.gmra.mrb[12].mxu1 %v9230_v27 }
 0x389   : > { %6898 = vmatpush3.bf16.msra.mxu1 %v7416_v42  ;;  %6901 = vmatprep.mubr.bf16.mxu1 %v8677_v35  ;;  %v9233_v35 = vld [vmem:[#allocation17_spill] sm:$0xff] }
 0x38a   : > { %6899 = vmatprep.subr.bf16.mxu1 %v7417_v28  ;;  %v9234_v48 = vcombine.low %v9229_v11, %v9233_v35  ;;  %v5514_v35 = vld [vmem:[%s7787_s6 + $0x70] sm:$0xff] }
 0x38d   : > { %6900 = vmatpush3.bf16.msra.mxu1 %v7417_v28 }
 0x390   : > { %6902 = vmatmul.mubr.bf16.vlgmr.msra.gmra.mrb[0].mxu1 %v8702_v0  ;;  %v9011_v0 = vld [vmem:[%s9119_s4] ss:$0 sm:$0xff] }
 0x391   : > { %6905 = vmatprep.mubr.bf16.mxu1 %v8733_v36 }
 0x398   : > { %6906 = vmatmul.mubr.bf16.gmra.mrb[4].mxu1 %v9232_v62 }
 0x399   : > { %6909 = vmatprep.mubr.bf16.mxu1 %v8747_v34 }
 0x3a0   : > { %6910 = vmatmul.mubr.bf16.gmra.mrb[8].mxu1 %v8771_v50 }
 0x3a1   : > { %6913 = vmatprep.mubr.bf16.mxu1 %v8783_v15  ;;  %v5503_v15 = vld [vmem:[%s7787_s6 + $0x18] sm:$0xff] }
 0x3a8   : > { %6914 = vmatmul.mubr.bf16.gmra.mrb[12].mxu1 %v9234_v48 }
 0x463   : > { %v6903_v36 = vpop.f32.mrb[0].mxu1 }
 0x464   : > { %v5486_v7 = vadd.f32 %v6903_v36, %v9011_v0  ;;  %v5398_v34 = vpop.f32.mrb[1].mxu1 }
 0x465   : > { %v5484_v50 = vadd.f32 %v9011_v0, %v5398_v34  ;;  %v6904_v5 = vpop.f32.mrb[2].mxu1 }
 0x466   : > { %v5518_v9 = vadd.f32 %v5502_v12, %v5486_v7  ;;  %v5487_v58 = vadd.f32 %v6904_v5, %v9011_v0  ;;  %v5401_v32 = vpop.f32.mrb[3].mxu1  ;;  %v5512_v12 = vld [vmem:[%s7787_s6 + $0x60] sm:$0xff] }
 0x467   : > { %v5516_v13 = vadd.f32 %v5500_v6, %v5484_v50  ;;  %v5485_v63 = vadd.f32 %v9011_v0, %v5401_v32  ;;  %v5515_v6 = vld [vmem:[%s7787_s6 + $0x78] sm:$0xff] }
 0x468   : > { %v5534_v21 = vmax.f32 %v5518_v9, 0.0  ;;  %v5519_v38 = vadd.f32 %v5503_v15, %v5487_v58  ;;  %v5513_v9 = vld [vmem:[%s7787_s6 + $0x68] sm:$0xff] }
 0x469   : > { %v5532_v49 = vmax.f32 %v5516_v13, 0.0  ;;  %v5517_v54 = vadd.f32 %v5501_v52, %v5485_v63 }
 0x46a   : > { %5550 = vst [vmem:[%s9023_s11 + $0x10] sm:$0xff] %v5534_v21  ;;  %v5535_v23 = vmax.f32 %v5519_v38, 0.0 }
 0x46b   : > { %5548 = vst [vmem:[%s9023_s11] sm:$0xff] %v5532_v49  ;;  %v5533_v55 = vmax.f32 %v5517_v54, 0.0  ;;  %v6907_v14 = vpop.f32.mrb[4].mxu1 }
 0x46c   : > { %5551 = vst [vmem:[%s9023_s11 + $0x18] sm:$0xff] %v5535_v23  ;;  %v5490_v33 = vadd.f32 %v6907_v14, %v9011_v0  ;;  %v5414_v59 = vpop.f32.mrb[5].mxu1 }
 0x46d   : > { %5549 = vst [vmem:[%s9023_s11 + $0x8] sm:$0xff] %v5533_v55  ;;  %v5488_v31 = vadd.f32 %v9011_v0, %v5414_v59  ;;  %v6908_v51 = vpop.f32.mrb[6].mxu1 }
 0x46e   : > { %v5522_v26 = vadd.f32 %v5506_v4, %v5490_v33  ;;  %v5491_v29 = vadd.f32 %v6908_v51, %v9011_v0  ;;  %v5417_v46 = vpop.f32.mrb[7].mxu1 }
 0x46f   : > { %v5520_v10 = vadd.f32 %v5504_v39, %v5488_v31  ;;  %v5489_v25 = vadd.f32 %v9011_v0, %v5417_v46 }
 0x470   : > { %v5538_v16 = vmax.f32 %v5522_v26, 0.0  ;;  %v5523_v61 = vadd.f32 %v5507_v1, %v5491_v29 }
 0x471   : > { %v5536_v8 = vmax.f32 %v5520_v10, 0.0  ;;  %v5521_v53 = vadd.f32 %v5505_v18, %v5489_v25 }
 0x472   : > { %5554 = vst [vmem:[%s9023_s11 + $0x30] sm:$0xff] %v5538_v16  ;;  %v5539_v30 = vmax.f32 %v5523_v61, 0.0 }
 0x473   : > { %5552 = vst [vmem:[%s9023_s11 + $0x20] sm:$0xff] %v5536_v8  ;;  %v5537_v24 = vmax.f32 %v5521_v53, 0.0  ;;  %v6911_v3 = vpop.f32.mrb[8].mxu1 }
 0x474   : > { %5555 = vst [vmem:[%s9023_s11 + $0x38] sm:$0xff] %v5539_v30  ;;  %v5494_v2 = vadd.f32 %v6911_v3, %v9011_v0  ;;  %v5430_v45 = vpop.f32.mrb[9].mxu1 }
 0x475   : > { %5553 = vst [vmem:[%s9023_s11 + $0x28] sm:$0xff] %v5537_v24  ;;  %v5492_v17 = vadd.f32 %v9011_v0, %v5430_v45  ;;  %v6912_v22 = vpop.f32.mrb[10].mxu1 }
 0x476   : > { %v5526_v20 = vadd.f32 %v5510_v57, %v5494_v2  ;;  %v5495_v40 = vadd.f32 %v6912_v22, %v9011_v0  ;;  %v5433_v19 = vpop.f32.mrb[11].mxu1 }
 0x477   : > { %v5524_v60 = vadd.f32 %v5508_v37, %v5492_v17  ;;  %v5493_v44 = vadd.f32 %v9011_v0, %v5433_v19 }
 0x478   : > { %v5542_v42 = vmax.f32 %v5526_v20, 0.0  ;;  %v5527_v28 = vadd.f32 %v5511_v43, %v5495_v40 }
 0x479   : > { %v5540_v41 = vmax.f32 %v5524_v60, 0.0  ;;  %v5525_v11 = vadd.f32 %v5509_v47, %v5493_v44 }
 0x47a   : > { %5558 = vst [vmem:[%s9023_s11 + $0x50] sm:$0xff] %v5542_v42  ;;  %v5543_v27 = vmax.f32 %v5527_v28, 0.0 }
 0x47b   : > { %5556 = vst [vmem:[%s9023_s11 + $0x40] sm:$0xff] %v5540_v41  ;;  %v5541_v56 = vmax.f32 %v5525_v11, 0.0  ;;  %v6915_v62 = vpop.f32.mrb[12].mxu1 }
 0x47c   : > { %5559 = vst [vmem:[%s9023_s11 + $0x58] sm:$0xff] %v5543_v27  ;;  %v5498_v48 = vadd.f32 %v6915_v62, %v9011_v0  ;;  %v5446_v36 = vpop.f32.mrb[13].mxu1 }
 0x47d   : > { %5557 = vst [vmem:[%s9023_s11 + $0x48] sm:$0xff] %v5541_v56  ;;  %v5496_v7 = vadd.f32 %v9011_v0, %v5446_v36  ;;  %v6916_v34 = vpop.f32.mrb[14].mxu1 }
 0x47e   : > { %v5530_v50 = vadd.f32 %v5514_v35, %v5498_v48  ;;  %v5499_v5 = vadd.f32 %v6916_v34, %v9011_v0  ;;  %v5449_v15 = vpop.f32.mrb[15].mxu1 }
 0x47f   : > { %v5528_v58 = vadd.f32 %v5512_v12, %v5496_v7  ;;  %v5497_v32 = vadd.f32 %v9011_v0, %v5449_v15 }
 0x480   : > { %v5546_v52 = vmax.f32 %v5530_v50, 0.0  ;;  %v5531_v13 = vadd.f32 %v5515_v6, %v5499_v5 }
 0x481   : > { %v5544_v63 = vmax.f32 %v5528_v58, 0.0  ;;  %v5529_v21 = vadd.f32 %v5513_v9, %v5497_v32 }
 0x482   : > { %5562 = vst [vmem:[%s9023_s11 + $0x70] sm:$0xff] %v5546_v52  ;;  %v5547_v38 = vmax.f32 %v5531_v13, 0.0 }
 0x483   : > { %5560 = vst [vmem:[%s9023_s11 + $0x60] sm:$0xff] %v5544_v63  ;;  %v5545_v0 = vmax.f32 %v5529_v21, 0.0 }
 0x484   : > { %5563 = vst [vmem:[%s9023_s11 + $0x78] sm:$0xff] %v5547_v38 }
 0x485   : > { %5561 = vst [vmem:[%s9023_s11 + $0x68] sm:$0xff] %v5545_v0 }
 0x486   : > { %7517 = shalt.err (!%p7514_p7)
}
 0x487   : > { %s7518_s6 = scalar_lea.hbm %s9067_s9, 2048  ;;  %s7522_s8 = scalar_lea.hbm %s9120_s5, 16384 }
 0x488   : > { %p7519_p9 = scmp.ne.s32.totalorder %s9067_s9, %s7518_s6  ;;  %p7523_p5 = scmp.lt.u32.totalorder %s9067_s9, %s9120_s5 }
 0x489   : > { %p7524_p10 = scmp.lt.u32.totalorder %s7522_s8, %s7518_s6  ;;  %p7526_p1 = scmp.lt.u32.totalorder %s7518_s6, %s9067_s9 }
 0x48a   : > { %p7520_p12 = pnand %p7519_p9, %p7729_p4 }
 0x48b   : > { %p7525_p11 = por %p7524_p10, %p7523_p5 }
 0x48c   : > { %p7521_p0 = pneg %p7520_p12 }
 0x48d   : > { %p7527_p2 = por %p7526_p1, %p7525_p11 }
 0x48f   : > { %p7528_p6 = pnand %p7527_p2, %p7521_p0 }
 0x491   : > { %7531 = shalt.err (!%p7528_p6)
}
 0x492   : > { %s7585_s28 = smov 128   ;;  %s7586_s15 = smov 8  }
 0x493   : > { %7183 = dma.vmem_to_hbm [thread:$0]  (%p7729_p4), %s9069_s30, 2048, %s9067_s9, %s5565_s22, %s7585_s28, %s7585_s28, %s7586_s15  }
 0x494 PF: > { %p7205_p8 = scmp.ge.s32.totalorder %s7574_s21, 2  ;;  %s5594_s16 = sand.u32 1, %s7562_s18  }
 0x495   : > { %p9235_p13 = scmp.ne.s32.totalorder %s9146_s25, 0  ;;  %s5595_s12 = scalar_lea.sflag [#allocation6], %s5594_s16 }
 0x497   : > { %p7197_p3 = pnand %p7205_p8, %p9235_p13 }
 0x499   : > { %7557 = dma.done.wait (!%p7197_p3), %s5595_s12, 2048  }
 0x49a   : > { %7559 = vsyncadd (!%p7197_p3), %s5595_s12, 4294965248  ;;  %p19_p7 = scmp.ge.s32.totalorder %s7719_s14, 10   ;;  %s9236_s18 = smov %s7566_s19 }
 0x49b   : > { %s9237_s19 = smov %s7570_s20  ;;  %s9238_s20 = smov %s7735_s27 }
 0x49c   : > { %s9239_s21 = smov %s7719_s14  ;;  %21 = sbr.rel (!%p19_p7) target bundleno = 6 (0x6), region = 113 }
 0x4a3   :  { %5600 = vsyncpa [#allocation5], 1 }
 0x4a4   :  { %5602 = vsyncpa [#allocation5 + $0x1], 1 }
 0x4a5   :  { %5603 = vsyncpa [#allocation8], 1 }
 0x4a6   :  { %5604 = vsyncpa [#allocation6], 1 }
 0x4a7   :  { %5606 = vsyncpa [#allocation6 + $0x1], 1 }

</bundles_post_ra>
